<compile_context>
chip_gen: v5e
topology: v5e:2x2
jax: 0.10.0
libtpu: 0.0.40
codegen_flags: <defaults>
</compile_context>

<pallas_src>
import functools

import jax
import jax.numpy as jnp
from jax.experimental import pallas as pl
from jax.experimental.pallas import tpu as pltpu

NEG_SLOPE = 0.01   # nn.LeakyReLU() default
H_IN, W_IN = 22, 20          # Scan1 (k=5, pad=(1,2)) maps 22x20 -> 20x20
H_OUT, W_OUT = 20, 20        # so the flatten is 20*20*N_filters, as in torch


def _leaky(x):
    return jnp.where(x >= 0, x, NEG_SLOPE * x)


# ----------------------------------------------------------------------------
# Fused forward kernel: mask -> Scan1 -> conv1..5 -> Phi/Theta heads
# ----------------------------------------------------------------------------
def fused_forward_kernel(main_ref, s1m_ref, s1b_ref, cvm_ref, cvb_ref,
                         w1_ref, b1_ref, w2_ref, b2_ref, w3_ref, b3_ref,
                         o_ref, pad0_ref, pad_ref, *, n_filters, n_dense):
    f32, bf16 = jnp.float32, jnp.bfloat16
    WC = W_OUT * n_filters          # 160 lanes per activation row
    NDH = 2 * n_dense               # fused Phi|Theta head width (128)

    # ActivePixel mask of channel 1: (Main[:, 1, :, :] != 0).float()
    x0 = (main_ref[...] != 0.0).astype(f32)                    # (22, 20)

    # ---- Scan1: 5x5 conv, stride 1, padding (1, 2) + LeakyReLU -------------
    # Height padding via zeroed scratch rows; width padding folded into the
    # banded weight matrices.
    pad0_ref[...] = jnp.zeros_like(pad0_ref)
    pad0_ref[1:1 + H_IN, :] = x0                                # (24, 20)
    acc = jnp.zeros((H_OUT, WC), f32)
    for ky in range(5):
        acc = acc + jnp.dot(pad0_ref[ky:ky + H_OUT, :].astype(bf16),
                            s1m_ref[ky], preferred_element_type=f32)
    act = _leaky(acc + s1b_ref[...])                            # (20, 160)

    # ---- conv1..conv5: 3x3 conv, stride 1, padding (1, 1) + LeakyReLU ------
    pad_ref[...] = jnp.zeros_like(pad_ref)                      # (22, 160)
    for layer in range(5):
        pad_ref[1:1 + H_OUT, :] = act
        acc = jnp.zeros((H_OUT, WC), f32)
        for ky in range(3):
            acc = acc + jnp.dot(pad_ref[ky:ky + H_OUT, :].astype(bf16),
                                cvm_ref[layer * 3 + ky],
                                preferred_element_type=f32)
        act = _leaky(acc + cvb_ref[layer])                      # (20, 160)

    # ---- fused Phi/Theta dense heads (lane-dense 2*n_dense columns) --------
    # feat = act flattened in (h, w, c) order; the torch NCHW flatten order is
    # already folded into w1's row permutation (see pack_params).
    h1 = jnp.zeros((1, NDH), f32)
    for h in range(H_OUT):
        h1 = h1 + jnp.dot(act[h:h + 1, :].astype(bf16), w1_ref[h],
                          preferred_element_type=f32)
    h1 = _leaky(h1 + b1_ref[...])
    h2 = _leaky(jnp.dot(h1.astype(bf16), w2_ref[...],
                        preferred_element_type=f32) + b2_ref[...])
    out = jnp.dot(h2.astype(bf16), w3_ref[...],
                  preferred_element_type=f32) + b3_ref[...]     # (1, 2)
    o_ref[0] = out.astype(o_ref.dtype)


# ----------------------------------------------------------------------------
# One-time weight transforms (outside the hot path)
# ----------------------------------------------------------------------------
def _band_mats(w_hwio, w_in, w_out, pad_w):
    """(KH, w_in*Cin, w_out*Cout) band matrices: conv over (width, Cin) folded
    into one matmul per vertical tap ky.  Out-of-range width taps (the width
    zero-padding) are simply dropped."""
    KH, KW, Ci, Co = w_hwio.shape
    mats = []
    for ky in range(KH):
        m = jnp.zeros((w_in, Ci, w_out, Co), jnp.float32)
        for kx in range(KW):
            shift = jnp.eye(w_in, w_out, k=pad_w - kx, dtype=jnp.float32)
            m = m + jnp.einsum("pq,io->piqo", shift,
                               w_hwio[ky, kx].astype(jnp.float32))
        mats.append(m.reshape(w_in * Ci, w_out * Co))
    return jnp.stack(mats)


def pack_params(p, n_filters, n_dense):
    """Build kernel-ready (bf16) weights: banded conv matrices, tiled bias
    rows, fused/permuted dense-head matrices."""
    assert n_filters % 4 == 0 and n_dense % 2 == 0
    bf16 = jnp.bfloat16
    WC = W_OUT * n_filters
    NDH = 2 * n_dense

    s1m = _band_mats(p["scan1_w"], W_IN, W_OUT, pad_w=2)         # (5, 20, WC)
    s1b = jnp.tile(p["scan1_b"], W_OUT)[None, :]                 # (1, WC)
    cvm = jnp.concatenate(
        [_band_mats(p[f"conv{i}_w"], W_OUT, W_OUT, pad_w=1) for i in range(1, 6)],
        axis=0)                                                  # (15, WC, WC)
    cvb = jnp.stack([jnp.tile(p[f"conv{i}_b"], W_OUT)
                     for i in range(1, 6)])[:, None, :]          # (5, 1, WC)

    def head_w1(w):
        # torch layout (n_dense, 20*20*NF) with the flat index in (c, h, w)
        # order (view(B,-1) on NCHW); permute to the kernel's (h, w, c) order.
        wt = w.T.reshape(n_filters, H_OUT, W_OUT, n_dense)
        return jnp.transpose(wt, (1, 2, 0, 3)).reshape(H_OUT, WC, n_dense)

    w1 = jnp.concatenate([head_w1(p["phi1_w"]), head_w1(p["theta1_w"])],
                         axis=-1)                                # (20, WC, NDH)
    b1 = jnp.concatenate([p["phi1_b"], p["theta1_b"]])[None, :]  # (1, NDH)
    w2 = jnp.zeros((NDH, NDH), jnp.float32)
    w2 = w2.at[:n_dense, :n_dense].set(p["phi2_w"].T)
    w2 = w2.at[n_dense:, n_dense:].set(p["theta2_w"].T)          # block-diag
    b2 = jnp.concatenate([p["phi2_b"], p["theta2_b"]])[None, :]  # (1, NDH)
    w3 = jnp.zeros((NDH, 2), jnp.float32)
    w3 = w3.at[:n_dense, 0].set(p["phi3_w"][0])
    w3 = w3.at[n_dense:, 1].set(p["theta3_w"][0])                # (NDH, 2)
    b3 = jnp.stack([p["phi3_b"][0], p["theta3_b"][0]])[None, :]  # (1, 2)

    return dict(s1m=s1m.astype(bf16), s1b=s1b,
                cvm=cvm.astype(bf16), cvb=cvb,
                w1=w1.astype(bf16), b1=b1,
                w2=w2.astype(bf16), b2=b2,
                w3=w3.astype(bf16), b3=b3)


# ----------------------------------------------------------------------------
# Forward pass (matches Model_ImportanceAnalysis_ActivePixel.forward)
# ----------------------------------------------------------------------------
def model_forward(packed, main_nchw, normStateIn="Net", normStateOut="Net"):
    assert normStateIn == "Net", "normStateIn must be Net"
    assert normStateOut == "Net", "normStateOut must be Net"
    B, C, H, W = main_nchw.shape
    assert C >= 2, "input needs a channel index 1 (ActivePixel uses Main[:, 1])"
    assert (H, W) == (H_IN, W_IN), "architecture requires 22x20 input"

    n_filters = packed["s1b"].shape[1] // W_OUT
    n_dense = packed["w2"].shape[0] // 2
    WC = W_OUT * n_filters

    weight_names = ("s1m", "s1b", "cvm", "cvb",
                    "w1", "b1", "w2", "b2", "w3", "b3")
    weights = [packed[name] for name in weight_names]

    def _resident_spec(arr):
        zero_idx = (0,) * arr.ndim
        return pl.BlockSpec(arr.shape, lambda b, _z=zero_idx: _z)

    in_specs = [
        # channel-1 slice of the NCHW input, squeezed to an (H, W) tile / step
        pl.BlockSpec((None, None, H, W), lambda b: (b, 1, 0, 0)),
    ] + [_resident_spec(w) for w in weights]

    kernel = functools.partial(fused_forward_kernel,
                               n_filters=n_filters, n_dense=n_dense)

    out3 = pl.pallas_call(
        kernel,
        out_shape=jax.ShapeDtypeStruct((B, 1, 2), jnp.float32),
        grid=(B,),
        in_specs=in_specs,
        out_specs=pl.BlockSpec((1, 1, 2), lambda b: (b, 0, 0)),
        scratch_shapes=[
            pltpu.VMEM((H_IN + 2, W_IN), jnp.float32),    # Scan1 height pad
            pltpu.VMEM((H_OUT + 2, WC), jnp.float32),     # conv height pad
        ],
        compiler_params=pltpu.CompilerParams(
            dimension_semantics=("parallel",)),
    )(main_nchw, *weights)

    return out3.reshape(B, 2), normStateOut


# ----------------------------------------------------------------------------
# Parameter init (deterministic, kaiming-normal style like the torch module)
# ----------------------------------------------------------------------------
def init_params(key, n_filters=8, n_dense=64):
    assert n_filters % 4 == 0, "N_filters must be a multiple of 4"
    assert n_dense % 2 == 0, "NDenseNodes must be a multiple of 2"
    keys = iter(jax.random.split(key, 32))

    def conv_w(kh, kw, cin, cout):
        std = (2.0 / (kh * kw * cin)) ** 0.5
        return std * jax.random.normal(next(keys), (kh, kw, cin, cout),
                                       jnp.float32)

    def dense_w(n_in, n_out):
        std = (2.0 / n_in) ** 0.5
        return std * jax.random.normal(next(keys), (n_out, n_in), jnp.float32)

    def bias(n, fan_in):
        bound = 1.0 / (fan_in ** 0.5)
        return jax.random.uniform(next(keys), (n,), jnp.float32, -bound, bound)

    p = {}
    p["scan1_w"] = conv_w(5, 5, 1, n_filters)         # ActivePixel -> 1 channel
    p["scan1_b"] = bias(n_filters, 5 * 5 * 1)
    for i in range(1, 6):
        p[f"conv{i}_w"] = conv_w(3, 3, n_filters, n_filters)
        p[f"conv{i}_b"] = bias(n_filters, 3 * 3 * n_filters)
    flat = H_OUT * W_OUT * n_filters
    for head in ("phi", "theta"):
        p[f"{head}1_w"] = dense_w(flat, n_dense)
        p[f"{head}1_b"] = bias(n_dense, flat)
        p[f"{head}2_w"] = dense_w(n_dense, n_dense)
        p[f"{head}2_b"] = bias(n_dense, n_dense)
        p[f"{head}3_w"] = dense_w(n_dense, 1)
        p[f"{head}3_b"] = bias(1, n_dense)
    return p


# ----------------------------------------------------------------------------
if __name__ == "__main__":
    B, C_IN, N_FILTERS, N_DENSE = 2, 3, 8, 64

    root = jax.random.PRNGKey(0)
    k_params, k_x = jax.random.split(root)
    params = init_params(k_params, N_FILTERS, N_DENSE)
    packed = pack_params(params, N_FILTERS, N_DENSE)

    main = jax.random.normal(k_x, (B, C_IN, H_IN, W_IN), jnp.float32)
    # make channel 1 have some exact zeros so the ActivePixel mask is non-trivial
    main = main.at[:, 1].set(jnp.where(main[:, 1] > 0, main[:, 1], 0.0))

    out, norm_state = model_forward(packed, main)
    out = jax.block_until_ready(out)

    assert out.shape == (B, 2), out.shape
    assert norm_state == "Net"
    assert bool(jnp.all(jnp.isfinite(out)))
    print("KERNEL_OK")
</pallas_src>

<mosaic_0001>
module attributes {stable_mosaic.version = 11 : i64} {
  func.func @fused_forward_kernel(%arg0: i32, %arg1: memref<1x1x22x20xf32, #tpu.memory_space<vmem>>, %arg2: memref<5x20x160xbf16, #tpu.memory_space<vmem>>, %arg3: memref<1x160xf32, #tpu.memory_space<vmem>>, %arg4: memref<15x160x160xbf16, #tpu.memory_space<vmem>>, %arg5: memref<5x1x160xf32, #tpu.memory_space<vmem>>, %arg6: memref<20x160x128xbf16, #tpu.memory_space<vmem>>, %arg7: memref<1x128xf32, #tpu.memory_space<vmem>>, %arg8: memref<128x128xbf16, #tpu.memory_space<vmem>>, %arg9: memref<1x128xf32, #tpu.memory_space<vmem>>, %arg10: memref<128x2xbf16, #tpu.memory_space<vmem>>, %arg11: memref<1x2xf32, #tpu.memory_space<vmem>>, %arg12: memref<1x1x2xf32, #tpu.memory_space<vmem>>, %arg13: memref<24x20xf32, #tpu.memory_space<vmem>>, %arg14: memref<22x160xf32, #tpu.memory_space<vmem>>) attributes {dimension_semantics = [#tpu.dimension_semantics<parallel>], iteration_bounds = array<i64: 2>, scalar_prefetch = 0 : i64, scratch_operands = 2 : i64, tpu.core_type = #tpu.core_type<tc>, window_params = [{transform_indices = @transform_0, window_bounds = array<i64: 1, 1, 22, 20>}, {pipeline_mode = #tpu.pipeline_mode<synchronous>, transform_indices = @transform_1, window_bounds = array<i64: 5, 20, 160>}, {pipeline_mode = #tpu.pipeline_mode<synchronous>, transform_indices = @transform_2, window_bounds = array<i64: 1, 160>}, {pipeline_mode = #tpu.pipeline_mode<synchronous>, transform_indices = @transform_3, window_bounds = array<i64: 15, 160, 160>}, {pipeline_mode = #tpu.pipeline_mode<synchronous>, transform_indices = @transform_4, window_bounds = array<i64: 5, 1, 160>}, {pipeline_mode = #tpu.pipeline_mode<synchronous>, transform_indices = @transform_5, window_bounds = array<i64: 20, 160, 128>}, {pipeline_mode = #tpu.pipeline_mode<synchronous>, transform_indices = @transform_6, window_bounds = array<i64: 1, 128>}, {pipeline_mode = #tpu.pipeline_mode<synchronous>, transform_indices = @transform_7, window_bounds = array<i64: 128, 128>}, {pipeline_mode = #tpu.pipeline_mode<synchronous>, transform_indices = @transform_8, window_bounds = array<i64: 1, 128>}, {pipeline_mode = #tpu.pipeline_mode<synchronous>, transform_indices = @transform_9, window_bounds = array<i64: 128, 2>}, {pipeline_mode = #tpu.pipeline_mode<synchronous>, transform_indices = @transform_10, window_bounds = array<i64: 1, 2>}, {transform_indices = @transform_11, window_bounds = array<i64: 1, 1, 2>}]} {
    %c0 = arith.constant 0 : index
    %c0_0 = arith.constant 0 : index
    %c0_1 = arith.constant 0 : index
    %c0_2 = arith.constant 0 : index
    %0 = vector.load %arg1[%c0, %c0_0, %c0_1, %c0_2] : memref<1x1x22x20xf32, #tpu.memory_space<vmem>>, vector<1x1x22x20xf32>
    %1 = vector.shape_cast %0 : vector<1x1x22x20xf32> to vector<22x20xf32>
    %cst = arith.constant 0.000000e+00 : f32
    %2 = vector.broadcast %cst : f32 to vector<22x20xf32>
    %3 = arith.cmpf one, %1, %2 : vector<22x20xf32>
    %4 = arith.extui %3 : vector<22x20xi1> to vector<22x20xi32>
    %5 = arith.sitofp %4 : vector<22x20xi32> to vector<22x20xf32>
    %cst_3 = arith.constant 0.000000e+00 : f32
    %6 = vector.broadcast %cst_3 : f32 to vector<24x20xf32>
    %c0_4 = arith.constant 0 : index
    %c0_5 = arith.constant 0 : index
    %7 = vector.load %arg13[%c0_4, %c0_5] : memref<24x20xf32, #tpu.memory_space<vmem>>, vector<24x20xf32>
    tpu.vector_store %arg13[%c0_4, %c0_5], %6 {strides = array<i32>} : memref<24x20xf32, #tpu.memory_space<vmem>>, vector<24x20xf32>,
    %c1 = arith.constant 1 : index
    %c0_6 = arith.constant 0 : index
    %8 = vector.load %arg13[%c1, %c0_6] : memref<24x20xf32, #tpu.memory_space<vmem>>, vector<22x20xf32>
    tpu.vector_store %arg13[%c1, %c0_6], %5 {strides = array<i32>} : memref<24x20xf32, #tpu.memory_space<vmem>>, vector<22x20xf32>,
    %cst_7 = arith.constant 0.000000e+00 : f32
    %9 = vector.broadcast %cst_7 : f32 to vector<20x160xf32>
    %c0_8 = arith.constant 0 : index
    %c0_9 = arith.constant 0 : index
    %10 = vector.load %arg13[%c0_8, %c0_9] : memref<24x20xf32, #tpu.memory_space<vmem>>, vector<20x20xf32>
    %11 = arith.truncf %10 : vector<20x20xf32> to vector<20x20xbf16>
    %c0_10 = arith.constant 0 : index
    %c0_11 = arith.constant 0 : index
    %c0_12 = arith.constant 0 : index
    %12 = vector.load %arg2[%c0_10, %c0_11, %c0_12] : memref<5x20x160xbf16, #tpu.memory_space<vmem>>, vector<1x20x160xbf16>
    %13 = vector.shape_cast %12 : vector<1x20x160xbf16> to vector<20x160xbf16>
    %cst_13 = arith.constant dense<0.000000e+00> : vector<20x160xf32>
    %14 = tpu.matmul %11, %13, %cst_13 {dimension_numbers = #tpu.dot_dimension_numbers<[1], [0], [0], [1], [0, 0, 1, 1], [], []>} : vector<20x20xbf16>, vector<20x160xbf16>, vector<20x160xf32> -> vector<20x160xf32>
    %15 = arith.addf %9, %14 : vector<20x160xf32>
    %c1_14 = arith.constant 1 : index
    %c0_15 = arith.constant 0 : index
    %16 = vector.load %arg13[%c1_14, %c0_15] : memref<24x20xf32, #tpu.memory_space<vmem>>, vector<20x20xf32>
    %17 = arith.truncf %16 : vector<20x20xf32> to vector<20x20xbf16>
    %c1_16 = arith.constant 1 : index
    %c0_17 = arith.constant 0 : index
    %c0_18 = arith.constant 0 : index
    %18 = vector.load %arg2[%c1_16, %c0_17, %c0_18] : memref<5x20x160xbf16, #tpu.memory_space<vmem>>, vector<1x20x160xbf16>
    %19 = vector.shape_cast %18 : vector<1x20x160xbf16> to vector<20x160xbf16>
    %cst_19 = arith.constant dense<0.000000e+00> : vector<20x160xf32>
    %20 = tpu.matmul %17, %19, %cst_19 {dimension_numbers = #tpu.dot_dimension_numbers<[1], [0], [0], [1], [0, 0, 1, 1], [], []>} : vector<20x20xbf16>, vector<20x160xbf16>, vector<20x160xf32> -> vector<20x160xf32>
    %21 = arith.addf %15, %20 : vector<20x160xf32>
    %c2 = arith.constant 2 : index
    %c0_20 = arith.constant 0 : index
    %22 = vector.load %arg13[%c2, %c0_20] : memref<24x20xf32, #tpu.memory_space<vmem>>, vector<20x20xf32>
    %23 = arith.truncf %22 : vector<20x20xf32> to vector<20x20xbf16>
    %c2_21 = arith.constant 2 : index
    %c0_22 = arith.constant 0 : index
    %c0_23 = arith.constant 0 : index
    %24 = vector.load %arg2[%c2_21, %c0_22, %c0_23] : memref<5x20x160xbf16, #tpu.memory_space<vmem>>, vector<1x20x160xbf16>
    %25 = vector.shape_cast %24 : vector<1x20x160xbf16> to vector<20x160xbf16>
    %cst_24 = arith.constant dense<0.000000e+00> : vector<20x160xf32>
    %26 = tpu.matmul %23, %25, %cst_24 {dimension_numbers = #tpu.dot_dimension_numbers<[1], [0], [0], [1], [0, 0, 1, 1], [], []>} : vector<20x20xbf16>, vector<20x160xbf16>, vector<20x160xf32> -> vector<20x160xf32>
    %27 = arith.addf %21, %26 : vector<20x160xf32>
    %c3 = arith.constant 3 : index
    %c0_25 = arith.constant 0 : index
    %28 = vector.load %arg13[%c3, %c0_25] : memref<24x20xf32, #tpu.memory_space<vmem>>, vector<20x20xf32>
    %29 = arith.truncf %28 : vector<20x20xf32> to vector<20x20xbf16>
    %c3_26 = arith.constant 3 : index
    %c0_27 = arith.constant 0 : index
    %c0_28 = arith.constant 0 : index
    %30 = vector.load %arg2[%c3_26, %c0_27, %c0_28] : memref<5x20x160xbf16, #tpu.memory_space<vmem>>, vector<1x20x160xbf16>
    %31 = vector.shape_cast %30 : vector<1x20x160xbf16> to vector<20x160xbf16>
    %cst_29 = arith.constant dense<0.000000e+00> : vector<20x160xf32>
    %32 = tpu.matmul %29, %31, %cst_29 {dimension_numbers = #tpu.dot_dimension_numbers<[1], [0], [0], [1], [0, 0, 1, 1], [], []>} : vector<20x20xbf16>, vector<20x160xbf16>, vector<20x160xf32> -> vector<20x160xf32>
    %33 = arith.addf %27, %32 : vector<20x160xf32>
    %c4 = arith.constant 4 : index
    %c0_30 = arith.constant 0 : index
    %34 = vector.load %arg13[%c4, %c0_30] : memref<24x20xf32, #tpu.memory_space<vmem>>, vector<20x20xf32>
    %35 = arith.truncf %34 : vector<20x20xf32> to vector<20x20xbf16>
    %c4_31 = arith.constant 4 : index
    %c0_32 = arith.constant 0 : index
    %c0_33 = arith.constant 0 : index
    %36 = vector.load %arg2[%c4_31, %c0_32, %c0_33] : memref<5x20x160xbf16, #tpu.memory_space<vmem>>, vector<1x20x160xbf16>
    %37 = vector.shape_cast %36 : vector<1x20x160xbf16> to vector<20x160xbf16>
    %cst_34 = arith.constant dense<0.000000e+00> : vector<20x160xf32>
    %38 = tpu.matmul %35, %37, %cst_34 {dimension_numbers = #tpu.dot_dimension_numbers<[1], [0], [0], [1], [0, 0, 1, 1], [], []>} : vector<20x20xbf16>, vector<20x160xbf16>, vector<20x160xf32> -> vector<20x160xf32>
    %39 = arith.addf %33, %38 : vector<20x160xf32>
    %c0_35 = arith.constant 0 : index
    %c0_36 = arith.constant 0 : index
    %40 = vector.load %arg3[%c0_35, %c0_36] : memref<1x160xf32, #tpu.memory_space<vmem>>, vector<1x160xf32>
    %41 = vector.broadcast %40 : vector<1x160xf32> to vector<20x160xf32>
    %42 = arith.addf %39, %41 : vector<20x160xf32>
    %cst_37 = arith.constant 0.000000e+00 : f32
    %43 = vector.broadcast %cst_37 : f32 to vector<20x160xf32>
    %44 = arith.cmpf oge, %42, %43 : vector<20x160xf32>
    %cst_38 = arith.constant 0.00999999977 : f32
    %45 = vector.broadcast %cst_38 : f32 to vector<20x160xf32>
    %46 = arith.mulf %45, %42 : vector<20x160xf32>
    %47 = arith.select %44, %42, %46 : vector<20x160xi1>, vector<20x160xf32>
    %cst_39 = arith.constant 0.000000e+00 : f32
    %48 = vector.broadcast %cst_39 : f32 to vector<22x160xf32>
    %c0_40 = arith.constant 0 : index
    %c0_41 = arith.constant 0 : index
    %49 = vector.load %arg14[%c0_40, %c0_41] : memref<22x160xf32, #tpu.memory_space<vmem>>, vector<22x160xf32>
    tpu.vector_store %arg14[%c0_40, %c0_41], %48 {strides = array<i32>} : memref<22x160xf32, #tpu.memory_space<vmem>>, vector<22x160xf32>,
    %c1_42 = arith.constant 1 : index
    %c0_43 = arith.constant 0 : index
    %50 = vector.load %arg14[%c1_42, %c0_43] : memref<22x160xf32, #tpu.memory_space<vmem>>, vector<20x160xf32>
    tpu.vector_store %arg14[%c1_42, %c0_43], %47 {strides = array<i32>} : memref<22x160xf32, #tpu.memory_space<vmem>>, vector<20x160xf32>,
    %cst_44 = arith.constant 0.000000e+00 : f32
    %51 = vector.broadcast %cst_44 : f32 to vector<20x160xf32>
    %c0_45 = arith.constant 0 : index
    %c0_46 = arith.constant 0 : index
    %52 = vector.load %arg14[%c0_45, %c0_46] : memref<22x160xf32, #tpu.memory_space<vmem>>, vector<20x160xf32>
    %53 = arith.truncf %52 : vector<20x160xf32> to vector<20x160xbf16>
    %c0_47 = arith.constant 0 : index
    %c0_48 = arith.constant 0 : index
    %c0_49 = arith.constant 0 : index
    %54 = vector.load %arg4[%c0_47, %c0_48, %c0_49] : memref<15x160x160xbf16, #tpu.memory_space<vmem>>, vector<1x160x160xbf16>
    %55 = vector.shape_cast %54 : vector<1x160x160xbf16> to vector<160x160xbf16>
    %cst_50 = arith.constant dense<0.000000e+00> : vector<20x160xf32>
    %56 = tpu.matmul %53, %55, %cst_50 {dimension_numbers = #tpu.dot_dimension_numbers<[1], [0], [0], [1], [0, 0, 1, 1], [], []>} : vector<20x160xbf16>, vector<160x160xbf16>, vector<20x160xf32> -> vector<20x160xf32>
    %57 = arith.addf %51, %56 : vector<20x160xf32>
    %c1_51 = arith.constant 1 : index
    %c0_52 = arith.constant 0 : index
    %58 = vector.load %arg14[%c1_51, %c0_52] : memref<22x160xf32, #tpu.memory_space<vmem>>, vector<20x160xf32>
    %59 = arith.truncf %58 : vector<20x160xf32> to vector<20x160xbf16>
    %c1_53 = arith.constant 1 : index
    %c0_54 = arith.constant 0 : index
    %c0_55 = arith.constant 0 : index
    %60 = vector.load %arg4[%c1_53, %c0_54, %c0_55] : memref<15x160x160xbf16, #tpu.memory_space<vmem>>, vector<1x160x160xbf16>
    %61 = vector.shape_cast %60 : vector<1x160x160xbf16> to vector<160x160xbf16>
    %cst_56 = arith.constant dense<0.000000e+00> : vector<20x160xf32>
    %62 = tpu.matmul %59, %61, %cst_56 {dimension_numbers = #tpu.dot_dimension_numbers<[1], [0], [0], [1], [0, 0, 1, 1], [], []>} : vector<20x160xbf16>, vector<160x160xbf16>, vector<20x160xf32> -> vector<20x160xf32>
    %63 = arith.addf %57, %62 : vector<20x160xf32>
    %c2_57 = arith.constant 2 : index
    %c0_58 = arith.constant 0 : index
    %64 = vector.load %arg14[%c2_57, %c0_58] : memref<22x160xf32, #tpu.memory_space<vmem>>, vector<20x160xf32>
    %65 = arith.truncf %64 : vector<20x160xf32> to vector<20x160xbf16>
    %c2_59 = arith.constant 2 : index
    %c0_60 = arith.constant 0 : index
    %c0_61 = arith.constant 0 : index
    %66 = vector.load %arg4[%c2_59, %c0_60, %c0_61] : memref<15x160x160xbf16, #tpu.memory_space<vmem>>, vector<1x160x160xbf16>
    %67 = vector.shape_cast %66 : vector<1x160x160xbf16> to vector<160x160xbf16>
    %cst_62 = arith.constant dense<0.000000e+00> : vector<20x160xf32>
    %68 = tpu.matmul %65, %67, %cst_62 {dimension_numbers = #tpu.dot_dimension_numbers<[1], [0], [0], [1], [0, 0, 1, 1], [], []>} : vector<20x160xbf16>, vector<160x160xbf16>, vector<20x160xf32> -> vector<20x160xf32>
    %69 = arith.addf %63, %68 : vector<20x160xf32>
    %c0_63 = arith.constant 0 : index
    %c0_64 = arith.constant 0 : index
    %c0_65 = arith.constant 0 : index
    %70 = vector.load %arg5[%c0_63, %c0_64, %c0_65] : memref<5x1x160xf32, #tpu.memory_space<vmem>>, vector<1x1x160xf32>
    %71 = vector.shape_cast %70 : vector<1x1x160xf32> to vector<1x160xf32>
    %72 = vector.broadcast %71 : vector<1x160xf32> to vector<20x160xf32>
    %73 = arith.addf %69, %72 : vector<20x160xf32>
    %cst_66 = arith.constant 0.000000e+00 : f32
    %74 = vector.broadcast %cst_66 : f32 to vector<20x160xf32>
    %75 = arith.cmpf oge, %73, %74 : vector<20x160xf32>
    %cst_67 = arith.constant 0.00999999977 : f32
    %76 = vector.broadcast %cst_67 : f32 to vector<20x160xf32>
    %77 = arith.mulf %76, %73 : vector<20x160xf32>
    %78 = arith.select %75, %73, %77 : vector<20x160xi1>, vector<20x160xf32>
    %c1_68 = arith.constant 1 : index
    %c0_69 = arith.constant 0 : index
    %79 = vector.load %arg14[%c1_68, %c0_69] : memref<22x160xf32, #tpu.memory_space<vmem>>, vector<20x160xf32>
    tpu.vector_store %arg14[%c1_68, %c0_69], %78 {strides = array<i32>} : memref<22x160xf32, #tpu.memory_space<vmem>>, vector<20x160xf32>,
    %cst_70 = arith.constant 0.000000e+00 : f32
    %80 = vector.broadcast %cst_70 : f32 to vector<20x160xf32>
    %c0_71 = arith.constant 0 : index
    %c0_72 = arith.constant 0 : index
    %81 = vector.load %arg14[%c0_71, %c0_72] : memref<22x160xf32, #tpu.memory_space<vmem>>, vector<20x160xf32>
    %82 = arith.truncf %81 : vector<20x160xf32> to vector<20x160xbf16>
    %c3_73 = arith.constant 3 : index
    %c0_74 = arith.constant 0 : index
    %c0_75 = arith.constant 0 : index
    %83 = vector.load %arg4[%c3_73, %c0_74, %c0_75] : memref<15x160x160xbf16, #tpu.memory_space<vmem>>, vector<1x160x160xbf16>
    %84 = vector.shape_cast %83 : vector<1x160x160xbf16> to vector<160x160xbf16>
    %cst_76 = arith.constant dense<0.000000e+00> : vector<20x160xf32>
    %85 = tpu.matmul %82, %84, %cst_76 {dimension_numbers = #tpu.dot_dimension_numbers<[1], [0], [0], [1], [0, 0, 1, 1], [], []>} : vector<20x160xbf16>, vector<160x160xbf16>, vector<20x160xf32> -> vector<20x160xf32>
    %86 = arith.addf %80, %85 : vector<20x160xf32>
    %c1_77 = arith.constant 1 : index
    %c0_78 = arith.constant 0 : index
    %87 = vector.load %arg14[%c1_77, %c0_78] : memref<22x160xf32, #tpu.memory_space<vmem>>, vector<20x160xf32>
    %88 = arith.truncf %87 : vector<20x160xf32> to vector<20x160xbf16>
    %c4_79 = arith.constant 4 : index
    %c0_80 = arith.constant 0 : index
    %c0_81 = arith.constant 0 : index
    %89 = vector.load %arg4[%c4_79, %c0_80, %c0_81] : memref<15x160x160xbf16, #tpu.memory_space<vmem>>, vector<1x160x160xbf16>
    %90 = vector.shape_cast %89 : vector<1x160x160xbf16> to vector<160x160xbf16>
    %cst_82 = arith.constant dense<0.000000e+00> : vector<20x160xf32>
    %91 = tpu.matmul %88, %90, %cst_82 {dimension_numbers = #tpu.dot_dimension_numbers<[1], [0], [0], [1], [0, 0, 1, 1], [], []>} : vector<20x160xbf16>, vector<160x160xbf16>, vector<20x160xf32> -> vector<20x160xf32>
    %92 = arith.addf %86, %91 : vector<20x160xf32>
    %c2_83 = arith.constant 2 : index
    %c0_84 = arith.constant 0 : index
    %93 = vector.load %arg14[%c2_83, %c0_84] : memref<22x160xf32, #tpu.memory_space<vmem>>, vector<20x160xf32>
    %94 = arith.truncf %93 : vector<20x160xf32> to vector<20x160xbf16>
    %c5 = arith.constant 5 : index
    %c0_85 = arith.constant 0 : index
    %c0_86 = arith.constant 0 : index
    %95 = vector.load %arg4[%c5, %c0_85, %c0_86] : memref<15x160x160xbf16, #tpu.memory_space<vmem>>, vector<1x160x160xbf16>
    %96 = vector.shape_cast %95 : vector<1x160x160xbf16> to vector<160x160xbf16>
    %cst_87 = arith.constant dense<0.000000e+00> : vector<20x160xf32>
    %97 = tpu.matmul %94, %96, %cst_87 {dimension_numbers = #tpu.dot_dimension_numbers<[1], [0], [0], [1], [0, 0, 1, 1], [], []>} : vector<20x160xbf16>, vector<160x160xbf16>, vector<20x160xf32> -> vector<20x160xf32>
    %98 = arith.addf %92, %97 : vector<20x160xf32>
    %c1_88 = arith.constant 1 : index
    %c0_89 = arith.constant 0 : index
    %c0_90 = arith.constant 0 : index
    %99 = vector.load %arg5[%c1_88, %c0_89, %c0_90] : memref<5x1x160xf32, #tpu.memory_space<vmem>>, vector<1x1x160xf32>
    %100 = vector.shape_cast %99 : vector<1x1x160xf32> to vector<1x160xf32>
    %101 = vector.broadcast %100 : vector<1x160xf32> to vector<20x160xf32>
    %102 = arith.addf %98, %101 : vector<20x160xf32>
    %cst_91 = arith.constant 0.000000e+00 : f32
    %103 = vector.broadcast %cst_91 : f32 to vector<20x160xf32>
    %104 = arith.cmpf oge, %102, %103 : vector<20x160xf32>
    %cst_92 = arith.constant 0.00999999977 : f32
    %105 = vector.broadcast %cst_92 : f32 to vector<20x160xf32>
    %106 = arith.mulf %105, %102 : vector<20x160xf32>
    %107 = arith.select %104, %102, %106 : vector<20x160xi1>, vector<20x160xf32>
    %c1_93 = arith.constant 1 : index
    %c0_94 = arith.constant 0 : index
    %108 = vector.load %arg14[%c1_93, %c0_94] : memref<22x160xf32, #tpu.memory_space<vmem>>, vector<20x160xf32>
    tpu.vector_store %arg14[%c1_93, %c0_94], %107 {strides = array<i32>} : memref<22x160xf32, #tpu.memory_space<vmem>>, vector<20x160xf32>,
    %cst_95 = arith.constant 0.000000e+00 : f32
    %109 = vector.broadcast %cst_95 : f32 to vector<20x160xf32>
    %c0_96 = arith.constant 0 : index
    %c0_97 = arith.constant 0 : index
    %110 = vector.load %arg14[%c0_96, %c0_97] : memref<22x160xf32, #tpu.memory_space<vmem>>, vector<20x160xf32>
    %111 = arith.truncf %110 : vector<20x160xf32> to vector<20x160xbf16>
    %c6 = arith.constant 6 : index
    %c0_98 = arith.constant 0 : index
    %c0_99 = arith.constant 0 : index
    %112 = vector.load %arg4[%c6, %c0_98, %c0_99] : memref<15x160x160xbf16, #tpu.memory_space<vmem>>, vector<1x160x160xbf16>
    %113 = vector.shape_cast %112 : vector<1x160x160xbf16> to vector<160x160xbf16>
    %cst_100 = arith.constant dense<0.000000e+00> : vector<20x160xf32>
    %114 = tpu.matmul %111, %113, %cst_100 {dimension_numbers = #tpu.dot_dimension_numbers<[1], [0], [0], [1], [0, 0, 1, 1], [], []>} : vector<20x160xbf16>, vector<160x160xbf16>, vector<20x160xf32> -> vector<20x160xf32>
    %115 = arith.addf %109, %114 : vector<20x160xf32>
    %c1_101 = arith.constant 1 : index
    %c0_102 = arith.constant 0 : index
    %116 = vector.load %arg14[%c1_101, %c0_102] : memref<22x160xf32, #tpu.memory_space<vmem>>, vector<20x160xf32>
    %117 = arith.truncf %116 : vector<20x160xf32> to vector<20x160xbf16>
    %c7 = arith.constant 7 : index
    %c0_103 = arith.constant 0 : index
    %c0_104 = arith.constant 0 : index
    %118 = vector.load %arg4[%c7, %c0_103, %c0_104] : memref<15x160x160xbf16, #tpu.memory_space<vmem>>, vector<1x160x160xbf16>
    %119 = vector.shape_cast %118 : vector<1x160x160xbf16> to vector<160x160xbf16>
    %cst_105 = arith.constant dense<0.000000e+00> : vector<20x160xf32>
    %120 = tpu.matmul %117, %119, %cst_105 {dimension_numbers = #tpu.dot_dimension_numbers<[1], [0], [0], [1], [0, 0, 1, 1], [], []>} : vector<20x160xbf16>, vector<160x160xbf16>, vector<20x160xf32> -> vector<20x160xf32>
    %121 = arith.addf %115, %120 : vector<20x160xf32>
    %c2_106 = arith.constant 2 : index
    %c0_107 = arith.constant 0 : index
    %122 = vector.load %arg14[%c2_106, %c0_107] : memref<22x160xf32, #tpu.memory_space<vmem>>, vector<20x160xf32>
    %123 = arith.truncf %122 : vector<20x160xf32> to vector<20x160xbf16>
    %c8 = arith.constant 8 : index
    %c0_108 = arith.constant 0 : index
    %c0_109 = arith.constant 0 : index
    %124 = vector.load %arg4[%c8, %c0_108, %c0_109] : memref<15x160x160xbf16, #tpu.memory_space<vmem>>, vector<1x160x160xbf16>
    %125 = vector.shape_cast %124 : vector<1x160x160xbf16> to vector<160x160xbf16>
    %cst_110 = arith.constant dense<0.000000e+00> : vector<20x160xf32>
    %126 = tpu.matmul %123, %125, %cst_110 {dimension_numbers = #tpu.dot_dimension_numbers<[1], [0], [0], [1], [0, 0, 1, 1], [], []>} : vector<20x160xbf16>, vector<160x160xbf16>, vector<20x160xf32> -> vector<20x160xf32>
    %127 = arith.addf %121, %126 : vector<20x160xf32>
    %c2_111 = arith.constant 2 : index
    %c0_112 = arith.constant 0 : index
    %c0_113 = arith.constant 0 : index
    %128 = vector.load %arg5[%c2_111, %c0_112, %c0_113] : memref<5x1x160xf32, #tpu.memory_space<vmem>>, vector<1x1x160xf32>
    %129 = vector.shape_cast %128 : vector<1x1x160xf32> to vector<1x160xf32>
    %130 = vector.broadcast %129 : vector<1x160xf32> to vector<20x160xf32>
    %131 = arith.addf %127, %130 : vector<20x160xf32>
    %cst_114 = arith.constant 0.000000e+00 : f32
    %132 = vector.broadcast %cst_114 : f32 to vector<20x160xf32>
    %133 = arith.cmpf oge, %131, %132 : vector<20x160xf32>
    %cst_115 = arith.constant 0.00999999977 : f32
    %134 = vector.broadcast %cst_115 : f32 to vector<20x160xf32>
    %135 = arith.mulf %134, %131 : vector<20x160xf32>
    %136 = arith.select %133, %131, %135 : vector<20x160xi1>, vector<20x160xf32>
    %c1_116 = arith.constant 1 : index
    %c0_117 = arith.constant 0 : index
    %137 = vector.load %arg14[%c1_116, %c0_117] : memref<22x160xf32, #tpu.memory_space<vmem>>, vector<20x160xf32>
    tpu.vector_store %arg14[%c1_116, %c0_117], %136 {strides = array<i32>} : memref<22x160xf32, #tpu.memory_space<vmem>>, vector<20x160xf32>,
    %cst_118 = arith.constant 0.000000e+00 : f32
    %138 = vector.broadcast %cst_118 : f32 to vector<20x160xf32>
    %c0_119 = arith.constant 0 : index
    %c0_120 = arith.constant 0 : index
    %139 = vector.load %arg14[%c0_119, %c0_120] : memref<22x160xf32, #tpu.memory_space<vmem>>, vector<20x160xf32>
    %140 = arith.truncf %139 : vector<20x160xf32> to vector<20x160xbf16>
    %c9 = arith.constant 9 : index
    %c0_121 = arith.constant 0 : index
    %c0_122 = arith.constant 0 : index
    %141 = vector.load %arg4[%c9, %c0_121, %c0_122] : memref<15x160x160xbf16, #tpu.memory_space<vmem>>, vector<1x160x160xbf16>
    %142 = vector.shape_cast %141 : vector<1x160x160xbf16> to vector<160x160xbf16>
    %cst_123 = arith.constant dense<0.000000e+00> : vector<20x160xf32>
    %143 = tpu.matmul %140, %142, %cst_123 {dimension_numbers = #tpu.dot_dimension_numbers<[1], [0], [0], [1], [0, 0, 1, 1], [], []>} : vector<20x160xbf16>, vector<160x160xbf16>, vector<20x160xf32> -> vector<20x160xf32>
    %144 = arith.addf %138, %143 : vector<20x160xf32>
    %c1_124 = arith.constant 1 : index
    %c0_125 = arith.constant 0 : index
    %145 = vector.load %arg14[%c1_124, %c0_125] : memref<22x160xf32, #tpu.memory_space<vmem>>, vector<20x160xf32>
    %146 = arith.truncf %145 : vector<20x160xf32> to vector<20x160xbf16>
    %c10 = arith.constant 10 : index
    %c0_126 = arith.constant 0 : index
    %c0_127 = arith.constant 0 : index
    %147 = vector.load %arg4[%c10, %c0_126, %c0_127] : memref<15x160x160xbf16, #tpu.memory_space<vmem>>, vector<1x160x160xbf16>
    %148 = vector.shape_cast %147 : vector<1x160x160xbf16> to vector<160x160xbf16>
    %cst_128 = arith.constant dense<0.000000e+00> : vector<20x160xf32>
    %149 = tpu.matmul %146, %148, %cst_128 {dimension_numbers = #tpu.dot_dimension_numbers<[1], [0], [0], [1], [0, 0, 1, 1], [], []>} : vector<20x160xbf16>, vector<160x160xbf16>, vector<20x160xf32> -> vector<20x160xf32>
    %150 = arith.addf %144, %149 : vector<20x160xf32>
    %c2_129 = arith.constant 2 : index
    %c0_130 = arith.constant 0 : index
    %151 = vector.load %arg14[%c2_129, %c0_130] : memref<22x160xf32, #tpu.memory_space<vmem>>, vector<20x160xf32>
    %152 = arith.truncf %151 : vector<20x160xf32> to vector<20x160xbf16>
    %c11 = arith.constant 11 : index
    %c0_131 = arith.constant 0 : index
    %c0_132 = arith.constant 0 : index
    %153 = vector.load %arg4[%c11, %c0_131, %c0_132] : memref<15x160x160xbf16, #tpu.memory_space<vmem>>, vector<1x160x160xbf16>
    %154 = vector.shape_cast %153 : vector<1x160x160xbf16> to vector<160x160xbf16>
    %cst_133 = arith.constant dense<0.000000e+00> : vector<20x160xf32>
    %155 = tpu.matmul %152, %154, %cst_133 {dimension_numbers = #tpu.dot_dimension_numbers<[1], [0], [0], [1], [0, 0, 1, 1], [], []>} : vector<20x160xbf16>, vector<160x160xbf16>, vector<20x160xf32> -> vector<20x160xf32>
    %156 = arith.addf %150, %155 : vector<20x160xf32>
    %c3_134 = arith.constant 3 : index
    %c0_135 = arith.constant 0 : index
    %c0_136 = arith.constant 0 : index
    %157 = vector.load %arg5[%c3_134, %c0_135, %c0_136] : memref<5x1x160xf32, #tpu.memory_space<vmem>>, vector<1x1x160xf32>
    %158 = vector.shape_cast %157 : vector<1x1x160xf32> to vector<1x160xf32>
    %159 = vector.broadcast %158 : vector<1x160xf32> to vector<20x160xf32>
    %160 = arith.addf %156, %159 : vector<20x160xf32>
    %cst_137 = arith.constant 0.000000e+00 : f32
    %161 = vector.broadcast %cst_137 : f32 to vector<20x160xf32>
    %162 = arith.cmpf oge, %160, %161 : vector<20x160xf32>
    %cst_138 = arith.constant 0.00999999977 : f32
    %163 = vector.broadcast %cst_138 : f32 to vector<20x160xf32>
    %164 = arith.mulf %163, %160 : vector<20x160xf32>
    %165 = arith.select %162, %160, %164 : vector<20x160xi1>, vector<20x160xf32>
    %c1_139 = arith.constant 1 : index
    %c0_140 = arith.constant 0 : index
    %166 = vector.load %arg14[%c1_139, %c0_140] : memref<22x160xf32, #tpu.memory_space<vmem>>, vector<20x160xf32>
    tpu.vector_store %arg14[%c1_139, %c0_140], %165 {strides = array<i32>} : memref<22x160xf32, #tpu.memory_space<vmem>>, vector<20x160xf32>,
    %cst_141 = arith.constant 0.000000e+00 : f32
    %167 = vector.broadcast %cst_141 : f32 to vector<20x160xf32>
    %c0_142 = arith.constant 0 : index
    %c0_143 = arith.constant 0 : index
    %168 = vector.load %arg14[%c0_142, %c0_143] : memref<22x160xf32, #tpu.memory_space<vmem>>, vector<20x160xf32>
    %169 = arith.truncf %168 : vector<20x160xf32> to vector<20x160xbf16>
    %c12 = arith.constant 12 : index
    %c0_144 = arith.constant 0 : index
    %c0_145 = arith.constant 0 : index
    %170 = vector.load %arg4[%c12, %c0_144, %c0_145] : memref<15x160x160xbf16, #tpu.memory_space<vmem>>, vector<1x160x160xbf16>
    %171 = vector.shape_cast %170 : vector<1x160x160xbf16> to vector<160x160xbf16>
    %cst_146 = arith.constant dense<0.000000e+00> : vector<20x160xf32>
    %172 = tpu.matmul %169, %171, %cst_146 {dimension_numbers = #tpu.dot_dimension_numbers<[1], [0], [0], [1], [0, 0, 1, 1], [], []>} : vector<20x160xbf16>, vector<160x160xbf16>, vector<20x160xf32> -> vector<20x160xf32>
    %173 = arith.addf %167, %172 : vector<20x160xf32>
    %c1_147 = arith.constant 1 : index
    %c0_148 = arith.constant 0 : index
    %174 = vector.load %arg14[%c1_147, %c0_148] : memref<22x160xf32, #tpu.memory_space<vmem>>, vector<20x160xf32>
    %175 = arith.truncf %174 : vector<20x160xf32> to vector<20x160xbf16>
    %c13 = arith.constant 13 : index
    %c0_149 = arith.constant 0 : index
    %c0_150 = arith.constant 0 : index
    %176 = vector.load %arg4[%c13, %c0_149, %c0_150] : memref<15x160x160xbf16, #tpu.memory_space<vmem>>, vector<1x160x160xbf16>
    %177 = vector.shape_cast %176 : vector<1x160x160xbf16> to vector<160x160xbf16>
    %cst_151 = arith.constant dense<0.000000e+00> : vector<20x160xf32>
    %178 = tpu.matmul %175, %177, %cst_151 {dimension_numbers = #tpu.dot_dimension_numbers<[1], [0], [0], [1], [0, 0, 1, 1], [], []>} : vector<20x160xbf16>, vector<160x160xbf16>, vector<20x160xf32> -> vector<20x160xf32>
    %179 = arith.addf %173, %178 : vector<20x160xf32>
    %c2_152 = arith.constant 2 : index
    %c0_153 = arith.constant 0 : index
    %180 = vector.load %arg14[%c2_152, %c0_153] : memref<22x160xf32, #tpu.memory_space<vmem>>, vector<20x160xf32>
    %181 = arith.truncf %180 : vector<20x160xf32> to vector<20x160xbf16>
    %c14 = arith.constant 14 : index
    %c0_154 = arith.constant 0 : index
    %c0_155 = arith.constant 0 : index
    %182 = vector.load %arg4[%c14, %c0_154, %c0_155] : memref<15x160x160xbf16, #tpu.memory_space<vmem>>, vector<1x160x160xbf16>
    %183 = vector.shape_cast %182 : vector<1x160x160xbf16> to vector<160x160xbf16>
    %cst_156 = arith.constant dense<0.000000e+00> : vector<20x160xf32>
    %184 = tpu.matmul %181, %183, %cst_156 {dimension_numbers = #tpu.dot_dimension_numbers<[1], [0], [0], [1], [0, 0, 1, 1], [], []>} : vector<20x160xbf16>, vector<160x160xbf16>, vector<20x160xf32> -> vector<20x160xf32>
    %185 = arith.addf %179, %184 : vector<20x160xf32>
    %c4_157 = arith.constant 4 : index
    %c0_158 = arith.constant 0 : index
    %c0_159 = arith.constant 0 : index
    %186 = vector.load %arg5[%c4_157, %c0_158, %c0_159] : memref<5x1x160xf32, #tpu.memory_space<vmem>>, vector<1x1x160xf32>
    %187 = vector.shape_cast %186 : vector<1x1x160xf32> to vector<1x160xf32>
    %188 = vector.broadcast %187 : vector<1x160xf32> to vector<20x160xf32>
    %189 = arith.addf %185, %188 : vector<20x160xf32>
    %cst_160 = arith.constant 0.000000e+00 : f32
    %190 = vector.broadcast %cst_160 : f32 to vector<20x160xf32>
    %191 = arith.cmpf oge, %189, %190 : vector<20x160xf32>
    %cst_161 = arith.constant 0.00999999977 : f32
    %192 = vector.broadcast %cst_161 : f32 to vector<20x160xf32>
    %193 = arith.mulf %192, %189 : vector<20x160xf32>
    %194 = arith.select %191, %189, %193 : vector<20x160xi1>, vector<20x160xf32>
    %cst_162 = arith.constant 0.000000e+00 : f32
    %195 = vector.broadcast %cst_162 : f32 to vector<1x128xf32>
    %196 = vector.extract_strided_slice %194 {offsets = [0, 0], sizes = [1, 160], strides = [1, 1]} : vector<20x160xf32> to vector<1x160xf32>
    %197 = arith.truncf %196 : vector<1x160xf32> to vector<1x160xbf16>
    %c0_163 = arith.constant 0 : index
    %c0_164 = arith.constant 0 : index
    %c0_165 = arith.constant 0 : index
    %198 = vector.load %arg6[%c0_163, %c0_164, %c0_165] : memref<20x160x128xbf16, #tpu.memory_space<vmem>>, vector<1x160x128xbf16>
    %199 = vector.shape_cast %198 : vector<1x160x128xbf16> to vector<160x128xbf16>
    %cst_166 = arith.constant dense<0.000000e+00> : vector<1x128xf32>
    %200 = tpu.matmul %197, %199, %cst_166 {dimension_numbers = #tpu.dot_dimension_numbers<[1], [0], [0], [1], [0, 0, 1, 1], [], []>} : vector<1x160xbf16>, vector<160x128xbf16>, vector<1x128xf32> -> vector<1x128xf32>
    %201 = arith.addf %195, %200 : vector<1x128xf32>
    %202 = vector.extract_strided_slice %194 {offsets = [1, 0], sizes = [1, 160], strides = [1, 1]} : vector<20x160xf32> to vector<1x160xf32>
    %203 = arith.truncf %202 : vector<1x160xf32> to vector<1x160xbf16>
    %c1_167 = arith.constant 1 : index
    %c0_168 = arith.constant 0 : index
    %c0_169 = arith.constant 0 : index
    %204 = vector.load %arg6[%c1_167, %c0_168, %c0_169] : memref<20x160x128xbf16, #tpu.memory_space<vmem>>, vector<1x160x128xbf16>
    %205 = vector.shape_cast %204 : vector<1x160x128xbf16> to vector<160x128xbf16>
    %cst_170 = arith.constant dense<0.000000e+00> : vector<1x128xf32>
    %206 = tpu.matmul %203, %205, %cst_170 {dimension_numbers = #tpu.dot_dimension_numbers<[1], [0], [0], [1], [0, 0, 1, 1], [], []>} : vector<1x160xbf16>, vector<160x128xbf16>, vector<1x128xf32> -> vector<1x128xf32>
    %207 = arith.addf %201, %206 : vector<1x128xf32>
    %208 = vector.extract_strided_slice %194 {offsets = [2, 0], sizes = [1, 160], strides = [1, 1]} : vector<20x160xf32> to vector<1x160xf32>
    %209 = arith.truncf %208 : vector<1x160xf32> to vector<1x160xbf16>
    %c2_171 = arith.constant 2 : index
    %c0_172 = arith.constant 0 : index
    %c0_173 = arith.constant 0 : index
    %210 = vector.load %arg6[%c2_171, %c0_172, %c0_173] : memref<20x160x128xbf16, #tpu.memory_space<vmem>>, vector<1x160x128xbf16>
    %211 = vector.shape_cast %210 : vector<1x160x128xbf16> to vector<160x128xbf16>
    %cst_174 = arith.constant dense<0.000000e+00> : vector<1x128xf32>
    %212 = tpu.matmul %209, %211, %cst_174 {dimension_numbers = #tpu.dot_dimension_numbers<[1], [0], [0], [1], [0, 0, 1, 1], [], []>} : vector<1x160xbf16>, vector<160x128xbf16>, vector<1x128xf32> -> vector<1x128xf32>
    %213 = arith.addf %207, %212 : vector<1x128xf32>
    %214 = vector.extract_strided_slice %194 {offsets = [3, 0], sizes = [1, 160], strides = [1, 1]} : vector<20x160xf32> to vector<1x160xf32>
    %215 = arith.truncf %214 : vector<1x160xf32> to vector<1x160xbf16>
    %c3_175 = arith.constant 3 : index
    %c0_176 = arith.constant 0 : index
    %c0_177 = arith.constant 0 : index
    %216 = vector.load %arg6[%c3_175, %c0_176, %c0_177] : memref<20x160x128xbf16, #tpu.memory_space<vmem>>, vector<1x160x128xbf16>
    %217 = vector.shape_cast %216 : vector<1x160x128xbf16> to vector<160x128xbf16>
    %cst_178 = arith.constant dense<0.000000e+00> : vector<1x128xf32>
    %218 = tpu.matmul %215, %217, %cst_178 {dimension_numbers = #tpu.dot_dimension_numbers<[1], [0], [0], [1], [0, 0, 1, 1], [], []>} : vector<1x160xbf16>, vector<160x128xbf16>, vector<1x128xf32> -> vector<1x128xf32>
    %219 = arith.addf %213, %218 : vector<1x128xf32>
    %220 = vector.extract_strided_slice %194 {offsets = [4, 0], sizes = [1, 160], strides = [1, 1]} : vector<20x160xf32> to vector<1x160xf32>
    %221 = arith.truncf %220 : vector<1x160xf32> to vector<1x160xbf16>
    %c4_179 = arith.constant 4 : index
    %c0_180 = arith.constant 0 : index
    %c0_181 = arith.constant 0 : index
    %222 = vector.load %arg6[%c4_179, %c0_180, %c0_181] : memref<20x160x128xbf16, #tpu.memory_space<vmem>>, vector<1x160x128xbf16>
    %223 = vector.shape_cast %222 : vector<1x160x128xbf16> to vector<160x128xbf16>
    %cst_182 = arith.constant dense<0.000000e+00> : vector<1x128xf32>
    %224 = tpu.matmul %221, %223, %cst_182 {dimension_numbers = #tpu.dot_dimension_numbers<[1], [0], [0], [1], [0, 0, 1, 1], [], []>} : vector<1x160xbf16>, vector<160x128xbf16>, vector<1x128xf32> -> vector<1x128xf32>
    %225 = arith.addf %219, %224 : vector<1x128xf32>
    %226 = vector.extract_strided_slice %194 {offsets = [5, 0], sizes = [1, 160], strides = [1, 1]} : vector<20x160xf32> to vector<1x160xf32>
    %227 = arith.truncf %226 : vector<1x160xf32> to vector<1x160xbf16>
    %c5_183 = arith.constant 5 : index
    %c0_184 = arith.constant 0 : index
    %c0_185 = arith.constant 0 : index
    %228 = vector.load %arg6[%c5_183, %c0_184, %c0_185] : memref<20x160x128xbf16, #tpu.memory_space<vmem>>, vector<1x160x128xbf16>
    %229 = vector.shape_cast %228 : vector<1x160x128xbf16> to vector<160x128xbf16>
    %cst_186 = arith.constant dense<0.000000e+00> : vector<1x128xf32>
    %230 = tpu.matmul %227, %229, %cst_186 {dimension_numbers = #tpu.dot_dimension_numbers<[1], [0], [0], [1], [0, 0, 1, 1], [], []>} : vector<1x160xbf16>, vector<160x128xbf16>, vector<1x128xf32> -> vector<1x128xf32>
    %231 = arith.addf %225, %230 : vector<1x128xf32>
    %232 = vector.extract_strided_slice %194 {offsets = [6, 0], sizes = [1, 160], strides = [1, 1]} : vector<20x160xf32> to vector<1x160xf32>
    %233 = arith.truncf %232 : vector<1x160xf32> to vector<1x160xbf16>
    %c6_187 = arith.constant 6 : index
    %c0_188 = arith.constant 0 : index
    %c0_189 = arith.constant 0 : index
    %234 = vector.load %arg6[%c6_187, %c0_188, %c0_189] : memref<20x160x128xbf16, #tpu.memory_space<vmem>>, vector<1x160x128xbf16>
    %235 = vector.shape_cast %234 : vector<1x160x128xbf16> to vector<160x128xbf16>
    %cst_190 = arith.constant dense<0.000000e+00> : vector<1x128xf32>
    %236 = tpu.matmul %233, %235, %cst_190 {dimension_numbers = #tpu.dot_dimension_numbers<[1], [0], [0], [1], [0, 0, 1, 1], [], []>} : vector<1x160xbf16>, vector<160x128xbf16>, vector<1x128xf32> -> vector<1x128xf32>
    %237 = arith.addf %231, %236 : vector<1x128xf32>
    %238 = vector.extract_strided_slice %194 {offsets = [7, 0], sizes = [1, 160], strides = [1, 1]} : vector<20x160xf32> to vector<1x160xf32>
    %239 = arith.truncf %238 : vector<1x160xf32> to vector<1x160xbf16>
    %c7_191 = arith.constant 7 : index
    %c0_192 = arith.constant 0 : index
    %c0_193 = arith.constant 0 : index
    %240 = vector.load %arg6[%c7_191, %c0_192, %c0_193] : memref<20x160x128xbf16, #tpu.memory_space<vmem>>, vector<1x160x128xbf16>
    %241 = vector.shape_cast %240 : vector<1x160x128xbf16> to vector<160x128xbf16>
    %cst_194 = arith.constant dense<0.000000e+00> : vector<1x128xf32>
    %242 = tpu.matmul %239, %241, %cst_194 {dimension_numbers = #tpu.dot_dimension_numbers<[1], [0], [0], [1], [0, 0, 1, 1], [], []>} : vector<1x160xbf16>, vector<160x128xbf16>, vector<1x128xf32> -> vector<1x128xf32>
    %243 = arith.addf %237, %242 : vector<1x128xf32>
    %244 = vector.extract_strided_slice %194 {offsets = [8, 0], sizes = [1, 160], strides = [1, 1]} : vector<20x160xf32> to vector<1x160xf32>
    %245 = arith.truncf %244 : vector<1x160xf32> to vector<1x160xbf16>
    %c8_195 = arith.constant 8 : index
    %c0_196 = arith.constant 0 : index
    %c0_197 = arith.constant 0 : index
    %246 = vector.load %arg6[%c8_195, %c0_196, %c0_197] : memref<20x160x128xbf16, #tpu.memory_space<vmem>>, vector<1x160x128xbf16>
    %247 = vector.shape_cast %246 : vector<1x160x128xbf16> to vector<160x128xbf16>
    %cst_198 = arith.constant dense<0.000000e+00> : vector<1x128xf32>
    %248 = tpu.matmul %245, %247, %cst_198 {dimension_numbers = #tpu.dot_dimension_numbers<[1], [0], [0], [1], [0, 0, 1, 1], [], []>} : vector<1x160xbf16>, vector<160x128xbf16>, vector<1x128xf32> -> vector<1x128xf32>
    %249 = arith.addf %243, %248 : vector<1x128xf32>
    %250 = vector.extract_strided_slice %194 {offsets = [9, 0], sizes = [1, 160], strides = [1, 1]} : vector<20x160xf32> to vector<1x160xf32>
    %251 = arith.truncf %250 : vector<1x160xf32> to vector<1x160xbf16>
    %c9_199 = arith.constant 9 : index
    %c0_200 = arith.constant 0 : index
    %c0_201 = arith.constant 0 : index
    %252 = vector.load %arg6[%c9_199, %c0_200, %c0_201] : memref<20x160x128xbf16, #tpu.memory_space<vmem>>, vector<1x160x128xbf16>
    %253 = vector.shape_cast %252 : vector<1x160x128xbf16> to vector<160x128xbf16>
    %cst_202 = arith.constant dense<0.000000e+00> : vector<1x128xf32>
    %254 = tpu.matmul %251, %253, %cst_202 {dimension_numbers = #tpu.dot_dimension_numbers<[1], [0], [0], [1], [0, 0, 1, 1], [], []>} : vector<1x160xbf16>, vector<160x128xbf16>, vector<1x128xf32> -> vector<1x128xf32>
    %255 = arith.addf %249, %254 : vector<1x128xf32>
    %256 = vector.extract_strided_slice %194 {offsets = [10, 0], sizes = [1, 160], strides = [1, 1]} : vector<20x160xf32> to vector<1x160xf32>
    %257 = arith.truncf %256 : vector<1x160xf32> to vector<1x160xbf16>
    %c10_203 = arith.constant 10 : index
    %c0_204 = arith.constant 0 : index
    %c0_205 = arith.constant 0 : index
    %258 = vector.load %arg6[%c10_203, %c0_204, %c0_205] : memref<20x160x128xbf16, #tpu.memory_space<vmem>>, vector<1x160x128xbf16>
    %259 = vector.shape_cast %258 : vector<1x160x128xbf16> to vector<160x128xbf16>
    %cst_206 = arith.constant dense<0.000000e+00> : vector<1x128xf32>
    %260 = tpu.matmul %257, %259, %cst_206 {dimension_numbers = #tpu.dot_dimension_numbers<[1], [0], [0], [1], [0, 0, 1, 1], [], []>} : vector<1x160xbf16>, vector<160x128xbf16>, vector<1x128xf32> -> vector<1x128xf32>
    %261 = arith.addf %255, %260 : vector<1x128xf32>
    %262 = vector.extract_strided_slice %194 {offsets = [11, 0], sizes = [1, 160], strides = [1, 1]} : vector<20x160xf32> to vector<1x160xf32>
    %263 = arith.truncf %262 : vector<1x160xf32> to vector<1x160xbf16>
    %c11_207 = arith.constant 11 : index
    %c0_208 = arith.constant 0 : index
    %c0_209 = arith.constant 0 : index
    %264 = vector.load %arg6[%c11_207, %c0_208, %c0_209] : memref<20x160x128xbf16, #tpu.memory_space<vmem>>, vector<1x160x128xbf16>
    %265 = vector.shape_cast %264 : vector<1x160x128xbf16> to vector<160x128xbf16>
    %cst_210 = arith.constant dense<0.000000e+00> : vector<1x128xf32>
    %266 = tpu.matmul %263, %265, %cst_210 {dimension_numbers = #tpu.dot_dimension_numbers<[1], [0], [0], [1], [0, 0, 1, 1], [], []>} : vector<1x160xbf16>, vector<160x128xbf16>, vector<1x128xf32> -> vector<1x128xf32>
    %267 = arith.addf %261, %266 : vector<1x128xf32>
    %268 = vector.extract_strided_slice %194 {offsets = [12, 0], sizes = [1, 160], strides = [1, 1]} : vector<20x160xf32> to vector<1x160xf32>
    %269 = arith.truncf %268 : vector<1x160xf32> to vector<1x160xbf16>
    %c12_211 = arith.constant 12 : index
    %c0_212 = arith.constant 0 : index
    %c0_213 = arith.constant 0 : index
    %270 = vector.load %arg6[%c12_211, %c0_212, %c0_213] : memref<20x160x128xbf16, #tpu.memory_space<vmem>>, vector<1x160x128xbf16>
    %271 = vector.shape_cast %270 : vector<1x160x128xbf16> to vector<160x128xbf16>
    %cst_214 = arith.constant dense<0.000000e+00> : vector<1x128xf32>
    %272 = tpu.matmul %269, %271, %cst_214 {dimension_numbers = #tpu.dot_dimension_numbers<[1], [0], [0], [1], [0, 0, 1, 1], [], []>} : vector<1x160xbf16>, vector<160x128xbf16>, vector<1x128xf32> -> vector<1x128xf32>
    %273 = arith.addf %267, %272 : vector<1x128xf32>
    %274 = vector.extract_strided_slice %194 {offsets = [13, 0], sizes = [1, 160], strides = [1, 1]} : vector<20x160xf32> to vector<1x160xf32>
    %275 = arith.truncf %274 : vector<1x160xf32> to vector<1x160xbf16>
    %c13_215 = arith.constant 13 : index
    %c0_216 = arith.constant 0 : index
    %c0_217 = arith.constant 0 : index
    %276 = vector.load %arg6[%c13_215, %c0_216, %c0_217] : memref<20x160x128xbf16, #tpu.memory_space<vmem>>, vector<1x160x128xbf16>
    %277 = vector.shape_cast %276 : vector<1x160x128xbf16> to vector<160x128xbf16>
    %cst_218 = arith.constant dense<0.000000e+00> : vector<1x128xf32>
    %278 = tpu.matmul %275, %277, %cst_218 {dimension_numbers = #tpu.dot_dimension_numbers<[1], [0], [0], [1], [0, 0, 1, 1], [], []>} : vector<1x160xbf16>, vector<160x128xbf16>, vector<1x128xf32> -> vector<1x128xf32>
    %279 = arith.addf %273, %278 : vector<1x128xf32>
    %280 = vector.extract_strided_slice %194 {offsets = [14, 0], sizes = [1, 160], strides = [1, 1]} : vector<20x160xf32> to vector<1x160xf32>
    %281 = arith.truncf %280 : vector<1x160xf32> to vector<1x160xbf16>
    %c14_219 = arith.constant 14 : index
    %c0_220 = arith.constant 0 : index
    %c0_221 = arith.constant 0 : index
    %282 = vector.load %arg6[%c14_219, %c0_220, %c0_221] : memref<20x160x128xbf16, #tpu.memory_space<vmem>>, vector<1x160x128xbf16>
    %283 = vector.shape_cast %282 : vector<1x160x128xbf16> to vector<160x128xbf16>
    %cst_222 = arith.constant dense<0.000000e+00> : vector<1x128xf32>
    %284 = tpu.matmul %281, %283, %cst_222 {dimension_numbers = #tpu.dot_dimension_numbers<[1], [0], [0], [1], [0, 0, 1, 1], [], []>} : vector<1x160xbf16>, vector<160x128xbf16>, vector<1x128xf32> -> vector<1x128xf32>
    %285 = arith.addf %279, %284 : vector<1x128xf32>
    %286 = vector.extract_strided_slice %194 {offsets = [15, 0], sizes = [1, 160], strides = [1, 1]} : vector<20x160xf32> to vector<1x160xf32>
    %287 = arith.truncf %286 : vector<1x160xf32> to vector<1x160xbf16>
    %c15 = arith.constant 15 : index
    %c0_223 = arith.constant 0 : index
    %c0_224 = arith.constant 0 : index
    %288 = vector.load %arg6[%c15, %c0_223, %c0_224] : memref<20x160x128xbf16, #tpu.memory_space<vmem>>, vector<1x160x128xbf16>
    %289 = vector.shape_cast %288 : vector<1x160x128xbf16> to vector<160x128xbf16>
    %cst_225 = arith.constant dense<0.000000e+00> : vector<1x128xf32>
    %290 = tpu.matmul %287, %289, %cst_225 {dimension_numbers = #tpu.dot_dimension_numbers<[1], [0], [0], [1], [0, 0, 1, 1], [], []>} : vector<1x160xbf16>, vector<160x128xbf16>, vector<1x128xf32> -> vector<1x128xf32>
    %291 = arith.addf %285, %290 : vector<1x128xf32>
    %292 = vector.extract_strided_slice %194 {offsets = [16, 0], sizes = [1, 160], strides = [1, 1]} : vector<20x160xf32> to vector<1x160xf32>
    %293 = arith.truncf %292 : vector<1x160xf32> to vector<1x160xbf16>
    %c16 = arith.constant 16 : index
    %c0_226 = arith.constant 0 : index
    %c0_227 = arith.constant 0 : index
    %294 = vector.load %arg6[%c16, %c0_226, %c0_227] : memref<20x160x128xbf16, #tpu.memory_space<vmem>>, vector<1x160x128xbf16>
    %295 = vector.shape_cast %294 : vector<1x160x128xbf16> to vector<160x128xbf16>
    %cst_228 = arith.constant dense<0.000000e+00> : vector<1x128xf32>
    %296 = tpu.matmul %293, %295, %cst_228 {dimension_numbers = #tpu.dot_dimension_numbers<[1], [0], [0], [1], [0, 0, 1, 1], [], []>} : vector<1x160xbf16>, vector<160x128xbf16>, vector<1x128xf32> -> vector<1x128xf32>
    %297 = arith.addf %291, %296 : vector<1x128xf32>
    %298 = vector.extract_strided_slice %194 {offsets = [17, 0], sizes = [1, 160], strides = [1, 1]} : vector<20x160xf32> to vector<1x160xf32>
    %299 = arith.truncf %298 : vector<1x160xf32> to vector<1x160xbf16>
    %c17 = arith.constant 17 : index
    %c0_229 = arith.constant 0 : index
    %c0_230 = arith.constant 0 : index
    %300 = vector.load %arg6[%c17, %c0_229, %c0_230] : memref<20x160x128xbf16, #tpu.memory_space<vmem>>, vector<1x160x128xbf16>
    %301 = vector.shape_cast %300 : vector<1x160x128xbf16> to vector<160x128xbf16>
    %cst_231 = arith.constant dense<0.000000e+00> : vector<1x128xf32>
    %302 = tpu.matmul %299, %301, %cst_231 {dimension_numbers = #tpu.dot_dimension_numbers<[1], [0], [0], [1], [0, 0, 1, 1], [], []>} : vector<1x160xbf16>, vector<160x128xbf16>, vector<1x128xf32> -> vector<1x128xf32>
    %303 = arith.addf %297, %302 : vector<1x128xf32>
    %304 = vector.extract_strided_slice %194 {offsets = [18, 0], sizes = [1, 160], strides = [1, 1]} : vector<20x160xf32> to vector<1x160xf32>
    %305 = arith.truncf %304 : vector<1x160xf32> to vector<1x160xbf16>
    %c18 = arith.constant 18 : index
    %c0_232 = arith.constant 0 : index
    %c0_233 = arith.constant 0 : index
    %306 = vector.load %arg6[%c18, %c0_232, %c0_233] : memref<20x160x128xbf16, #tpu.memory_space<vmem>>, vector<1x160x128xbf16>
    %307 = vector.shape_cast %306 : vector<1x160x128xbf16> to vector<160x128xbf16>
    %cst_234 = arith.constant dense<0.000000e+00> : vector<1x128xf32>
    %308 = tpu.matmul %305, %307, %cst_234 {dimension_numbers = #tpu.dot_dimension_numbers<[1], [0], [0], [1], [0, 0, 1, 1], [], []>} : vector<1x160xbf16>, vector<160x128xbf16>, vector<1x128xf32> -> vector<1x128xf32>
    %309 = arith.addf %303, %308 : vector<1x128xf32>
    %310 = vector.extract_strided_slice %194 {offsets = [19, 0], sizes = [1, 160], strides = [1, 1]} : vector<20x160xf32> to vector<1x160xf32>
    %311 = arith.truncf %310 : vector<1x160xf32> to vector<1x160xbf16>
    %c19 = arith.constant 19 : index
    %c0_235 = arith.constant 0 : index
    %c0_236 = arith.constant 0 : index
    %312 = vector.load %arg6[%c19, %c0_235, %c0_236] : memref<20x160x128xbf16, #tpu.memory_space<vmem>>, vector<1x160x128xbf16>
    %313 = vector.shape_cast %312 : vector<1x160x128xbf16> to vector<160x128xbf16>
    %cst_237 = arith.constant dense<0.000000e+00> : vector<1x128xf32>
    %314 = tpu.matmul %311, %313, %cst_237 {dimension_numbers = #tpu.dot_dimension_numbers<[1], [0], [0], [1], [0, 0, 1, 1], [], []>} : vector<1x160xbf16>, vector<160x128xbf16>, vector<1x128xf32> -> vector<1x128xf32>
    %315 = arith.addf %309, %314 : vector<1x128xf32>
    %c0_238 = arith.constant 0 : index
    %c0_239 = arith.constant 0 : index
    %316 = vector.load %arg7[%c0_238, %c0_239] : memref<1x128xf32, #tpu.memory_space<vmem>>, vector<1x128xf32>
    %317 = arith.addf %315, %316 : vector<1x128xf32>
    %cst_240 = arith.constant 0.000000e+00 : f32
    %318 = vector.broadcast %cst_240 : f32 to vector<1x128xf32>
    %319 = arith.cmpf oge, %317, %318 : vector<1x128xf32>
    %cst_241 = arith.constant 0.00999999977 : f32
    %320 = vector.broadcast %cst_241 : f32 to vector<1x128xf32>
    %321 = arith.mulf %320, %317 : vector<1x128xf32>
    %322 = arith.select %319, %317, %321 : vector<1x128xi1>, vector<1x128xf32>
    %323 = arith.truncf %322 : vector<1x128xf32> to vector<1x128xbf16>
    %c0_242 = arith.constant 0 : index
    %c0_243 = arith.constant 0 : index
    %324 = vector.load %arg8[%c0_242, %c0_243] : memref<128x128xbf16, #tpu.memory_space<vmem>>, vector<128x128xbf16>
    %cst_244 = arith.constant dense<0.000000e+00> : vector<1x128xf32>
    %325 = tpu.matmul %323, %324, %cst_244 {dimension_numbers = #tpu.dot_dimension_numbers<[1], [0], [0], [1], [0, 0, 1, 1], [], []>} : vector<1x128xbf16>, vector<128x128xbf16>, vector<1x128xf32> -> vector<1x128xf32>
    %c0_245 = arith.constant 0 : index
    %c0_246 = arith.constant 0 : index
    %326 = vector.load %arg9[%c0_245, %c0_246] : memref<1x128xf32, #tpu.memory_space<vmem>>, vector<1x128xf32>
    %327 = arith.addf %325, %326 : vector<1x128xf32>
    %cst_247 = arith.constant 0.000000e+00 : f32
    %328 = vector.broadcast %cst_247 : f32 to vector<1x128xf32>
    %329 = arith.cmpf oge, %327, %328 : vector<1x128xf32>
    %cst_248 = arith.constant 0.00999999977 : f32
    %330 = vector.broadcast %cst_248 : f32 to vector<1x128xf32>
    %331 = arith.mulf %330, %327 : vector<1x128xf32>
    %332 = arith.select %329, %327, %331 : vector<1x128xi1>, vector<1x128xf32>
    %333 = arith.truncf %332 : vector<1x128xf32> to vector<1x128xbf16>
    %c0_249 = arith.constant 0 : index
    %c0_250 = arith.constant 0 : index
    %334 = vector.load %arg10[%c0_249, %c0_250] : memref<128x2xbf16, #tpu.memory_space<vmem>>, vector<128x2xbf16>
    %cst_251 = arith.constant dense<0.000000e+00> : vector<1x2xf32>
    %335 = tpu.matmul %333, %334, %cst_251 {dimension_numbers = #tpu.dot_dimension_numbers<[1], [0], [0], [1], [0, 0, 1, 1], [], []>} : vector<1x128xbf16>, vector<128x2xbf16>, vector<1x2xf32> -> vector<1x2xf32>
    %c0_252 = arith.constant 0 : index
    %c0_253 = arith.constant 0 : index
    %336 = vector.load %arg11[%c0_252, %c0_253] : memref<1x2xf32, #tpu.memory_space<vmem>>, vector<1x2xf32>
    %337 = arith.addf %335, %336 : vector<1x2xf32>
    %c0_254 = arith.constant 0 : index
    %c0_255 = arith.constant 0 : index
    %c0_256 = arith.constant 0 : index
    %338 = vector.load %arg12[%c0_254, %c0_255, %c0_256] : memref<1x1x2xf32, #tpu.memory_space<vmem>>, vector<1x1x2xf32>
    %339 = vector.shape_cast %338 : vector<1x1x2xf32> to vector<1x2xf32>
    %340 = vector.shape_cast %337 : vector<1x2xf32> to vector<1x1x2xf32>
    tpu.vector_store %arg12[%c0_254, %c0_255, %c0_256], %340 {strides = array<i32>} : memref<1x1x2xf32, #tpu.memory_space<vmem>>, vector<1x1x2xf32>,
    return
  }
  func.func @transform_0(%arg0: i32) -> (i32, i32, i32, i32) {
    %c1_i32 = arith.constant 1 : i32
    %c0_i32 = arith.constant 0 : i32
    %c0_i32_0 = arith.constant 0 : i32
    %c0_i32_1 = arith.constant 0 : i32
    return %arg0, %c1_i32, %c0_i32, %c0_i32_0 : i32, i32, i32, i32
  }
  func.func @transform_1(%arg0: i32) -> (i32, i32, i32) {
    %c0_i32 = arith.constant 0 : i32
    %c0_i32_0 = arith.constant 0 : i32
    %c0_i32_1 = arith.constant 0 : i32
    %c0_i32_2 = arith.constant 0 : i32
    return %c0_i32, %c0_i32_0, %c0_i32_1 : i32, i32, i32
  }
  func.func @transform_2(%arg0: i32) -> (i32, i32) {
    %c0_i32 = arith.constant 0 : i32
    %c0_i32_0 = arith.constant 0 : i32
    %c0_i32_1 = arith.constant 0 : i32
    return %c0_i32, %c0_i32_0 : i32, i32
  }
  func.func @transform_3(%arg0: i32) -> (i32, i32, i32) {
    %c0_i32 = arith.constant 0 : i32
    %c0_i32_0 = arith.constant 0 : i32
    %c0_i32_1 = arith.constant 0 : i32
    %c0_i32_2 = arith.constant 0 : i32
    return %c0_i32, %c0_i32_0, %c0_i32_1 : i32, i32, i32
  }
  func.func @transform_4(%arg0: i32) -> (i32, i32, i32) {
    %c0_i32 = arith.constant 0 : i32
    %c0_i32_0 = arith.constant 0 : i32
    %c0_i32_1 = arith.constant 0 : i32
    %c0_i32_2 = arith.constant 0 : i32
    return %c0_i32, %c0_i32_0, %c0_i32_1 : i32, i32, i32
  }
  func.func @transform_5(%arg0: i32) -> (i32, i32, i32) {
    %c0_i32 = arith.constant 0 : i32
    %c0_i32_0 = arith.constant 0 : i32
    %c0_i32_1 = arith.constant 0 : i32
    %c0_i32_2 = arith.constant 0 : i32
    return %c0_i32, %c0_i32_0, %c0_i32_1 : i32, i32, i32
  }
  func.func @transform_6(%arg0: i32) -> (i32, i32) {
    %c0_i32 = arith.constant 0 : i32
    %c0_i32_0 = arith.constant 0 : i32
    %c0_i32_1 = arith.constant 0 : i32
    return %c0_i32, %c0_i32_0 : i32, i32
  }
  func.func @transform_7(%arg0: i32) -> (i32, i32) {
    %c0_i32 = arith.constant 0 : i32
    %c0_i32_0 = arith.constant 0 : i32
    %c0_i32_1 = arith.constant 0 : i32
    return %c0_i32, %c0_i32_0 : i32, i32
  }
  func.func @transform_8(%arg0: i32) -> (i32, i32) {
    %c0_i32 = arith.constant 0 : i32
    %c0_i32_0 = arith.constant 0 : i32
    %c0_i32_1 = arith.constant 0 : i32
    return %c0_i32, %c0_i32_0 : i32, i32
  }
  func.func @transform_9(%arg0: i32) -> (i32, i32) {
    %c0_i32 = arith.constant 0 : i32
    %c0_i32_0 = arith.constant 0 : i32
    %c0_i32_1 = arith.constant 0 : i32
    return %c0_i32, %c0_i32_0 : i32, i32
  }
  func.func @transform_10(%arg0: i32) -> (i32, i32) {
    %c0_i32 = arith.constant 0 : i32
    %c0_i32_0 = arith.constant 0 : i32
    %c0_i32_1 = arith.constant 0 : i32
    return %c0_i32, %c0_i32_0 : i32, i32
  }
  func.func @transform_11(%arg0: i32) -> (i32, i32, i32) {
    %c0_i32 = arith.constant 0 : i32
    %c0_i32_0 = arith.constant 0 : i32
    %c0_i32_1 = arith.constant 0 : i32
    return %arg0, %c0_i32, %c0_i32_0 : i32, i32, i32
  }
}

</mosaic_0001>

<bundles_post_ra>
// kernel: tpu_custom_call.1
= control target key start
LH: loop header
LB: loop body
LE: loop exit
PB: predicated region body
PF: predicated region fallthrough
CT: control target
= control target key end

     0   :  { %s11518_s0 = inlined_call_operand.vmem [shape: f32[2,3,22,20], index: 0, kind: input, shape index: {}]   ;;  %s11519_s1 = inlined_call_operand.hbm [shape: bf16[5,20,160], index: 1, kind: input, shape index: {}]   ;;  %s11520_s2 = inlined_call_operand.hbm [shape: f32[1,160], index: 2, kind: input, shape index: {}]   ;;  %s11521_s3 = inlined_call_operand.hbm [shape: bf16[15,160,160], index: 3, kind: input, shape index: {}]   ;;  %s11522_s4 = inlined_call_operand.hbm [shape: f32[5,1,160], index: 4, kind: input, shape index: {}]   ;;  %s11523_s5 = inlined_call_operand.hbm [shape: bf16[20,160,128], index: 5, kind: input, shape index: {}]   ;;  %s11524_s6 = inlined_call_operand.hbm [shape: f32[1,128], index: 6, kind: input, shape index: {}]   ;;  %s11525_s7 = inlined_call_operand.hbm [shape: bf16[128,128], index: 7, kind: input, shape index: {}]   ;;  %s11526_s8 = inlined_call_operand.hbm [shape: f32[1,128], index: 8, kind: input, shape index: {}]   ;;  %s11527_s9 = inlined_call_operand.vmem [shape: bf16[128,2], index: 9, kind: input, shape index: {}]   ;;  %s11528_s10 = inlined_call_operand.hbm [shape: f32[1,2], index: 10, kind: input, shape index: {}]   ;;  %s11529_s11 = inlined_call_operand.hbm [shape: f32[2,1,2], index: 11, kind: output, shape index: {}]  }
   0x1   :  { %11535 = sst [smem:[#allocation31_spill]] %s11519_s1 }
   0x2   :  { %11536 = sst [smem:[#allocation32_spill]] %s11520_s2 }
   0x3   :  { %11537 = sst [smem:[#allocation33_spill]] %s11521_s3 }
   0x4   :  { %11538 = sst [smem:[#allocation34_spill]] %s11522_s4 }
   0x5   :  { %16 = vsyncpa [#allocation5], 0 }
   0x6   :  { %17 = vsyncpa [#allocation8], 0 }
   0x7   :  { %18 = vsyncpa [#allocation11], 0 }
   0x8   :  { %19 = vsyncpa [#allocation14], 0 }
   0x9   :  { %20 = vsyncpa [#allocation17], 0 }
   0xa   :  { %21 = vsyncpa [#allocation6], 0 }
   0xb   :  { %23 = vsyncpa [#allocation6 + $0x1], 0  ;;  %s10577_s17 = smov 0   ;;  %s10579_s18 = smov 0  }
   0xc   :  { %s10581_s19 = smov 0   ;;  %s10583_s20 = smov 0  }
   0xd LB: > { %11539 = sst [smem:[#allocation26_spill]] %s10487_s17  ;;  %s10598_s21 = sadd.s32 4294967295, %s10499_s20   ;;  %s10499_s20 = sphi %s10583_s20, %s11554_s20   ;;  %s10495_s19 = sphi %s10581_s19, %s11556_s19   ;;  %s10491_s18 = sphi %s10579_s18, %s11558_s18   ;;  %s10487_s17 = sphi %s10577_s17, %s11557_s17  }
   0xe   : > { %11540 = sst [smem:[#allocation27_spill]] %s10495_s19  ;;  %s7247_s22 = sadd.s32 4294967294, %s10499_s20  }
   0xf   : > { %s10602_s23 = sadd.s32 1, %s10499_s20   ;;  %s272_s24 = sadd.s32 1, %s10495_s19 }
  0x10   : > { %11541 = sst [smem:[#allocation28_spill]] %s10602_s23  ;;  %s269_s25 = ssub.s32 %s10499_s20, %s10602_s23 }
  0x11   : > { %p282_p0 = scmp.ne.s32.totalorder %s10495_s19, %s10491_s18  ;;  %p270_p1 = scmp.eq.s32.totalorder %s269_s25, 0 }
  0x12   : > { %p283_p2 = scmp.eq.s32.totalorder %s10598_s21, 1  ;;  %p288_p3 = scmp.ne.s32.totalorder %s10491_s18, %s10487_s17 }
  0x13   : > { %p289_p4 = scmp.eq.s32.totalorder %s7247_s22, 1  ;;  %p7248_p7 = scmp.ge.s32.totalorder %s10499_s20, 1 }
  0x14   : > { %s10613_s26 = scalar_select %p270_p1, %s10495_s19, %s272_s24  }
  0x15   : > { %p10615_p5 = por %p283_p2, %p282_p0  ;;  %p10619_p6 = por %p289_p4, %p288_p3 }
  0x16   : > { %11542 = sst [smem:[#allocation29_spill]] %s10613_s26  ;;  %p296_p8 = scmp.lt.s32.totalorder %s10499_s20, 3 }
  0x17   : > { %s11544_s28 = scalar_select %p10619_p6, 1, 0 }
  0x18   : > { %p10080_p9 = scmp.eq.s32.totalorder %s10598_s21, 0  ;;  %p10626_p10 = pnand %p7248_p7, %p296_p8 }
  0x19   : > { %11545 = sst [smem:[#allocation30_spill]] %s11544_s28  ;;  %s10501_s14 = smov [#allocation7]  }
  0x1a   : > { %s11547_s2 = sld [smem:[#allocation32_spill]]  ;;  %p10048_p11 = pneg %p10626_p10 }
  0x1b   : > { %s324_s15 = sshll.u32 %s10501_s14, 4  ;;  %s11548_s4 = sld [smem:[#allocation34_spill]]  ;;  %s325_s15 = int_to_ptr.vmem [resolvable:$true] %s324_s15 }
  0x1c   : > { %p10640_p12 = pnand %p10080_p9, %p10048_p11  ;;  %s10502_s30 = smov [#allocation10]  }
  0x1d   : > { %s349_s12 = sshll.u32 %s10502_s30, 4  ;;  %s10503_s14 = smov 32   ;;  %s350_s12 = int_to_ptr.vmem [resolvable:$true] %s349_s12 }
  0x1e   : > { %s10505_s26 = smov [#allocation13]   ;;  %s402_s30 = sshll.u32 %s11526_s8, 4  ;;  %s403_s30 = int_to_ptr.hbm [resolvable:$true] %s402_s30 }
  0x1f   : > { %s378_s19 = sshll.u32 %s10505_s26, 4  ;;  %s11550_s1 = sld [smem:[#allocation31_spill]]  ;;  %s379_s19 = int_to_ptr.vmem [resolvable:$true] %s378_s19 }
  0x20   : > { %s322_s13 = sshll.u32 %s11547_s2, 4  ;;  %s10504_s2 = smov 2   ;;  %s323_s13 = int_to_ptr.hbm [resolvable:$true] %s322_s13 }
  0x21   : > { %s347_s24 = sshll.u32 %s11548_s4, 4  ;;  %s376_s4 = sshll.u32 %s11524_s6, 4  ;;  %s348_s24 = int_to_ptr.hbm [resolvable:$true] %s347_s24  ;;  %s377_s4 = int_to_ptr.hbm [resolvable:$true] %s376_s4 }
  0x22   : > { %10054 = dma.hbm_to_vmem [thread:$0]  (!%p10640_p12), %s323_s13, 32, %s325_s15, [#allocation8]  }
  0x23   : > { %10060 = dma.hbm_to_vmem [thread:$0]  (!%p10640_p12), %s348_s24, 160, %s350_s12, [#allocation11], %s10503_s14, %s10503_s14, %s10504_s2  }
  0x24   : > { %10066 = dma.hbm_to_vmem [thread:$0]  (!%p10640_p12), %s377_s4, 16, %s379_s19, [#allocation14]  }
  0x25   : > { %s10506_s13 = smov [#allocation16]   ;;  %s307_s24 = sshll.u32 %s11550_s1, 4  ;;  %s308_s24 = int_to_ptr.hbm [resolvable:$true] %s307_s24 }
  0x26   : > { %s404_s15 = sshll.u32 %s10506_s13, 4  ;;  %s10507_s26 = smov [#allocation4]   ;;  %s405_s15 = int_to_ptr.vmem [resolvable:$true] %s404_s15 }
  0x27   : > { %10072 = dma.hbm_to_vmem [thread:$0]  (!%p10640_p12), %s403_s30, 16, %s405_s15, [#allocation17]  }
  0x28   : > { %s309_s12 = sshll.u32 %s10507_s26, 4  ;;  %s11551_s3 = sld [smem:[#allocation33_spill]]  ;;  %s310_s12 = int_to_ptr.vmem [resolvable:$true] %s309_s12 }
  0x29   : > { %s10508_s4 = smov 128   ;;  %s10509_s19 = smov 8  }
  0x2a   : > { %10051 = dma.hbm_to_vmem [thread:$0]  (!%p10640_p12), %s308_s24, 1920, %s310_s12, [#allocation5], %s10508_s4, %s10508_s4, %s10509_s19  }
  0x2b   : > { %s10510_s17 = smov [#allocation9]   ;;  %s361_s2 = sshll.u32 %s11523_s5, 4  ;;  %s362_s2 = int_to_ptr.hbm [resolvable:$true] %s361_s2 }
  0x2c   : > { %s335_s16 = sshll.u32 %s10510_s17, 4  ;;  %s10511_s30 = smov [#allocation12]   ;;  %s336_s16 = int_to_ptr.vmem [resolvable:$true] %s335_s16 }
  0x2d   : > { %s363_s15 = sshll.u32 %s10511_s30, 4  ;;  %s387_s24 = sshll.u32 %s11525_s7, 4  ;;  %s364_s15 = int_to_ptr.vmem [resolvable:$true] %s363_s15  ;;  %s388_s24 = int_to_ptr.hbm [resolvable:$true] %s387_s24 }
  0x2e   : > { %s333_s14 = sshll.u32 %s11551_s3, 4  ;;  %s10512_s12 = smov 64   ;;  %s334_s14 = int_to_ptr.hbm [resolvable:$true] %s333_s14 }
  0x2f   : > { %10057 = dma.hbm_to_vmem [thread:$0]  (!%p10640_p12), %s334_s14, 38400, %s336_s16, [#allocation8], %s10508_s4, %s10508_s4, %s10509_s19  }
  0x30   : > { %s10513_s28 = smov 4   ;;  %s10514_s17 = smov [#allocation15]  }
  0x31   : > { %10063 = dma.hbm_to_vmem [thread:$0]  (!%p10640_p12), %s362_s2, 25600, %s364_s15, [#allocation11], %s10512_s12, %s10512_s12, %s10513_s28  }
  0x32   : > { %s389_s22 = sshll.u32 %s10514_s17, 4  ;;  %s417_s3 = sshll.u32 %s11528_s10, 4  ;;  %s390_s22 = int_to_ptr.vmem [resolvable:$true] %s389_s22  ;;  %s418_s3 = int_to_ptr.hbm [resolvable:$true] %s417_s3 }
  0x33   : > { %10069 = dma.hbm_to_vmem [thread:$0]  (!%p10640_p12), %s388_s24, 1024, %s390_s22, [#allocation14], %s10512_s12, %s10512_s12, %s10513_s28  }
  0x34   : > { %s10515_s14 = smov [#allocation18]   ;;  %441 = sbr.rel (%p10626_p10) target bundleno = 2085 (0x825), region = 64 }
  0x35   : > { %s419_s4 = sshll.u32 %s10515_s14, 4  ;;  %s420_s4 = int_to_ptr.vmem [resolvable:$true] %s419_s4 }
  0x36   : > { %10075 = dma.hbm_to_vmem [thread:$0]  (!%p10640_p12), %s418_s3, 16, %s420_s4, [#allocation17]  }
  0x39   : > { %10462 = dma.done.wait (%p10080_p9), [#allocation5], 1920  }
  0x3a   : > { %10464 = vsyncadd (%p10080_p9), [#allocation5], 4294965376 }
  0x3b   : > { %10466 = dma.done.wait (%p10080_p9), [#allocation8], 38432  }
  0x3c   : > { %10468 = vsyncadd (%p10080_p9), [#allocation8], 4294928864 }
  0x3d   : > { %10470 = dma.done.wait (%p10080_p9), [#allocation11], 25760  }
  0x3e   : > { %10472 = vsyncadd (%p10080_p9), [#allocation11], 4294941536 }
  0x3f   : > { %10474 = dma.done.wait (%p10080_p9), [#allocation14], 1040  }
  0x40   : > { %10476 = vsyncadd (%p10080_p9), [#allocation14], 4294966256 }
  0x41   : > { %10478 = dma.done.wait (%p10080_p9), [#allocation17], 32  }
  0x42   : > { %10480 = vsyncadd (%p10080_p9), [#allocation17], 4294967264  ;;  %p522_p13 = scmp.lt.s32.totalorder %s10598_s21, 1  ;;  %vm541_vm0 = vcmask 162816   ;;  %v10516_v0 = vmov 0.0   ;;  %vm587_vm1 = vcmask 1041408   ;;  %s7094_s16 = scalar_lea.hbm %s11529_s11, %s10598_s21 }
  0x43   : > { %542 = vst.msk [vmem:[#allocation2] sm:$0xff] %vm541_vm0, %v10516_v0  ;;  %v565_v1 = vld [vmem:[#allocation4 + $0x28] sm:$0x33]  ;;  %v556_v2 = vld [vmem:[#allocation4 + $0x10] sm:$0x33]  ;;  %vm547_vm2 = vcmask 160768  }
  0x44   : > { %s523_s1 = scalar_select %p522_p13, %s10598_s21, 1  ;;  %543 = vst.msk [vmem:[#allocation2 + $0x8] sm:$0xff] %vm541_vm0, %v10516_v0  ;;  %v573_v3 = vunpack.c.l.b16 %v565_v1  ;;  %v574_v4 = vunpack.c.h.b16 %v565_v1  ;;  %v637_v5 = vunpack.c.l.b16 %v556_v2  ;;  %v7278_v6 = vld [vmem:[#allocation4 + $0x18] sm:$0xf]  ;;  %v9485_v7 = vld [vmem:[#allocation4 + $0x1c] sm:$0xf0]  ;;  %v638_v8 = vunpack.c.h.b16 %v556_v2 }
  0x45   : > { %544 = vst.msk [vmem:[#allocation2 + $0x10] sm:$0xff] %vm541_vm0, %v10516_v0  ;;  %v9484_v9 = vld [vmem:[#allocation4 + $0x1c] sm:$0xf]  ;;  %v7280_v10 = vld [vmem:[#allocation4 + $0x20] sm:$0xf0]  ;;  %v7279_v25 = vor.u32 %v9485_v7, %v7278_v6  ;;  %vm958_vm6 = vcmask 261120  }
  0x46   : > { %s7269_s3 = smul.u32 72, %s523_s1  ;;  %957 = vst [vmem:[#allocation3] sm:$0xff] %v10516_v0  ;;  %v7290_v11 = vld [vmem:[#allocation4] sm:$0xf]  ;;  %v577_v13 = vpack.c.b16 %v573_v3, %v573_v3  ;;  %v578_v14 = vpack.c.b16 %v574_v4, %v574_v4  ;;  %v641_v15 = vpack.c.b16 %v637_v5, %v637_v5  ;;  %v9483_v19 = vld [vmem:[#allocation4 + $0x4] sm:$0xf0]  ;;  %v642_v20 = vpack.c.b16 %v638_v8, %v638_v8 }
  0x47   : > { %962 = vst [vmem:[#allocation3 + $0x20] sm:$0x3f] %v10516_v0  ;;  %v701_v18 = vld [vmem:[#allocation4 + $0x40] sm:$0x33]  ;;  %v7283_v29 = vor.u32 %v9484_v9, %v7280_v10  ;;  %v7291_v30 = vor.u32 %v9483_v19, %v7290_v11  ;;  %v779_v32 = vld [vmem:[#allocation4 + $0x58] sm:$0x33] }
  0x48   : > { %s7138_s19 = scalar_lea.vmem %s11518_s0, %s7269_s3  ;;  %v589_v21 = vsel %vm587_vm1, %v577_v13, 0  ;;  %v592_v22 = vsel %vm587_vm1, %v578_v14, 0  ;;  %v652_v23 = vsel %vm587_vm1, %v641_v15, 0  ;;  %v709_v28 = vunpack.c.l.b16 %v701_v18  ;;  %v9482_v34 = vld [vmem:[#allocation4 + $0x4] sm:$0xf]  ;;  %959 = vst.msk [vmem:[#allocation3 + $0x8] sm:$0xff] %vm958_vm6, %v10516_v0 }
  0x49   : > { %v7270_v12 = vld [vmem:[%s7138_s19 + $0x18] sm:$0xff]  ;;  %v7271_v16 = vld [vmem:[%s7138_s19 + $0x20] sm:$0xff]  ;;  %v7272_v17 = vld [vmem:[%s7138_s19 + $0x28] sm:$0x3f]  ;;  %600 = vmatpush.bf16.msra.mxu0 %v589_v21  ;;  %10008 = vmatpush.bf16.msra.mxu3 %v589_v21  ;;  %v710_v31 = vunpack.c.h.b16 %v701_v18  ;;  %v787_v36 = vunpack.c.l.b16 %v779_v32  ;;  %v655_v37 = vsel %vm587_vm1, %v642_v20, 0  ;;  %v788_v55 = vunpack.c.h.b16 %v779_v32  ;;  %961 = vst.msk [vmem:[#allocation3 + $0x18] sm:$0xff] %vm958_vm6, %v10516_v0 }
  0x4a   : > { %vm532_vm3 = vcmp.ne.f32.partialorder %v7270_v12, 0.0  ;;  %vm533_vm4 = vcmp.ne.f32.partialorder %v7271_v16, 0.0  ;;  %vm534_vm5 = vcmp.ne.f32.partialorder %v7272_v17, 0.0  ;;  %618 = vmatpush.bf16.msra.mxu1 %v592_v22  ;;  %663 = vmatpush.bf16.msra.mxu2 %v652_v23  ;;  %v713_v33 = vpack.c.b16 %v709_v28, %v709_v28  ;;  %v7292_v35 = vld [vmem:[#allocation4 + $0x8] sm:$0xf0]  ;;  %s520_s29 = sand.u32 1, %s10491_s18  }
  0x4b   : > { %v7273_v24 = vsel %vm532_vm3, 1.0, %v10516_v0  ;;  %v7274_v26 = vsel %vm533_vm4, 1.0, %v10516_v0  ;;  %v7275_v27 = vsel %vm534_vm5, 1.0, %v10516_v0  ;;  %v714_v38 = vpack.c.b16 %v710_v31, %v710_v31  ;;  %v7302_v39 = vld [vmem:[#allocation4 + $0x30] sm:$0xf]  ;;  %s521_s2 = scalar_lea.vmem [#allocation19], %s520_s29 }
  0x4c   : > { %545 = vst.msk [vmem:[#allocation2 + $0x1] sm:$0xff] %vm541_vm0, %v7273_v24  ;;  %v9487_v40 = vld [vmem:[#allocation4 + $0x34] sm:$0xf0]  ;;  %v724_v41 = vsel %vm587_vm1, %v713_v33, 0  ;;  %v791_v42 = vpack.c.b16 %v787_v36, %v787_v36  ;;  %v9486_v44 = vld [vmem:[#allocation4 + $0x34] sm:$0xf]  ;;  %v7295_v46 = vor.u32 %v9482_v34, %v7292_v35  ;;  %v792_v62 = vpack.c.b16 %v788_v55, %v788_v55 }
  0x4d   : > { %546 = vst.msk [vmem:[#allocation2 + $0x9] sm:$0xff] %vm541_vm0, %v7274_v26  ;;  %601 = vmatpush.bf16.msra.mxu0 %v7279_v25  ;;  %10009 = vmatpush.bf16.msra.mxu3 %v7279_v25  ;;  %v727_v43 = vsel %vm587_vm1, %v714_v38, 0  ;;  %v7304_v45 = vld [vmem:[#allocation4 + $0x38] sm:$0xf0]  ;;  %v7303_v47 = vor.u32 %v9487_v40, %v7302_v39  ;;  %v7314_v49 = vld [vmem:[#allocation4 + $0x48] sm:$0xf] }
  0x4e   : > { %548 = vst.msk [vmem:[#allocation2 + $0x11] sm:$0x3f] %vm547_vm2, %v7275_v27  ;;  %619 = vmatpush.bf16.msra.mxu1 %v7283_v29  ;;  %664 = vmatpush.bf16.msra.mxu2 %v7291_v30  ;;  %v802_v48 = vsel %vm587_vm1, %v791_v42, 0  ;;  %v9489_v50 = vld [vmem:[#allocation4 + $0x4c] sm:$0xf0]  ;;  %v7307_v59 = vor.u32 %v9486_v44, %v7304_v45  ;;  %v805_v5 = vsel %vm587_vm1, %v792_v62, 0 }
  0x4f   : > { %v7315_v60 = vor.u32 %v9489_v50, %v7314_v49  ;;  %v857_v63 = vld [vmem:[#allocation4 + $0x70] sm:$0x33]  ;;  %v9488_v1 = vld [vmem:[#allocation4 + $0x4c] sm:$0xf]  ;;  %v7326_v9 = vld [vmem:[#allocation4 + $0x60] sm:$0xf] }
  0x50   : > { %v7316_v2 = vld [vmem:[#allocation4 + $0x50] sm:$0xf0]  ;;  %v865_v3 = vunpack.c.l.b16 %v857_v63  ;;  %v866_v4 = vunpack.c.h.b16 %v857_v63  ;;  %v9491_v10 = vld [vmem:[#allocation4 + $0x64] sm:$0xf0]  ;;  %v9490_v19 = vld [vmem:[#allocation4 + $0x64] sm:$0xf] }
  0x51   : > { %681 = vmatpush.bf16.msrb.mxu3 %v655_v37  ;;  %735 = vmatpush.bf16.msrb.mxu0 %v724_v41  ;;  %v7319_v8 = vor.u32 %v9488_v1, %v7316_v2  ;;  %v7327_v13 = vor.u32 %v9491_v10, %v7326_v9  ;;  %v7328_v20 = vld [vmem:[#allocation4 + $0x68] sm:$0xf0]  ;;  %v9527_v49 = vld [vmem:[#allocation9 + $0x114] sm:$0xf0]  ;;  %v9525_v55 = vld [vmem:[#allocation9 + $0x104] sm:$0xf0] }
  0x52   : > { %753 = vmatpush.bf16.msrb.mxu1 %v727_v43  ;;  %813 = vmatpush.bf16.msrb.mxu2 %v802_v48  ;;  %v869_v6 = vpack.c.b16 %v865_v3, %v865_v3  ;;  %v870_v7 = vpack.c.b16 %v866_v4, %v866_v4  ;;  %v7331_v21 = vor.u32 %v9490_v19, %v7328_v20  ;;  %v7394_v48 = vld [vmem:[#allocation9 + $0x110] sm:$0xf]  ;;  %v9526_v50 = vld [vmem:[#allocation9 + $0x114] sm:$0xf]  ;;  %v9523_v2 = vld [vmem:[#allocation9 + $0xf4] sm:$0xf0] }
  0x53   : > { %v557_v51 = vld [vmem:[#allocation2 + $0x1] sm:$0xff]  ;;  %v7378_v1 = vld [vmem:[#allocation9 + $0xf0] sm:$0xf]  ;;  %v9522_v3 = vld [vmem:[#allocation9 + $0xf4] sm:$0xf]  ;;  %vm963_vm8 = vcmask 259072  }
  0x54   : > { %v549_v52 = vld [vmem:[#allocation2] sm:$0xff]  ;;  %v558_v53 = vld [vmem:[#allocation2 + $0x9] sm:$0xff]  ;;  %v880_v11 = vsel %vm587_vm1, %v869_v6, 0  ;;  %v883_v12 = vsel %vm587_vm1, %v870_v7, 0  ;;  %v7379_v4 = vor.u32 %v9523_v2, %v7378_v1  ;;  %v9519_v19 = vld [vmem:[#allocation9 + $0xd4] sm:$0xf0] }
  0x55   : > { %v550_v54 = vld [vmem:[#allocation2 + $0x8] sm:$0xff]  ;;  %v560_v56 = vpack.c.bf16 %v558_v53, %v557_v51  ;;  %v559_v57 = vld [vmem:[#allocation2 + $0x11] sm:$0xf]  ;;  %682 = vmatpush.bf16.msrb.mxu3 %v7295_v46  ;;  %736 = vmatpush.bf16.msrb.mxu0 %v7303_v47  ;;  %v7395_v51 = vor.u32 %v9527_v49, %v7394_v48  ;;  %v7370_v7 = vld [vmem:[#allocation9 + $0xe0] sm:$0xf]  ;;  %vm971_vm10 = vcmask 1040384  }
  0x56   : > { %v552_v58 = vpack.c.bf16 %v550_v54, %v549_v52  ;;  %v561_v61 = vpack.c.bf16 %v559_v57, %v559_v57  ;;  %754 = vmatpush.bf16.msrb.mxu1 %v7307_v59  ;;  %814 = vmatpush.bf16.msrb.mxu2 %v7315_v60  ;;  %v693_v14 = vld [vmem:[#allocation2 + $0x2] sm:$0xff]  ;;  %v694_v15 = vld [vmem:[#allocation2 + $0xa] sm:$0xff]  ;;  %v695_v22 = vld [vmem:[#allocation2 + $0x12] sm:$0xf]  ;;  %964 = vst.msk [vmem:[#allocation3 + $0x28] sm:$0x3f] %vm963_vm8, %v10516_v0 }
  0x57   : > { %7284 = vmatmul.msk.bf16.vlgmr.msra.gmra.mxu0 %vm541_vm0, %v560_v56  ;;  %7286 = vmatmul.msk.bf16.vlgmr.msra.gmra.mxu1 %vm541_vm0, %v560_v56  ;;  %v551_v16 = vld [vmem:[#allocation2 + $0x10] sm:$0xf]  ;;  %v696_v17 = vpack.c.bf16 %v694_v15, %v693_v14  ;;  %v771_v23 = vld [vmem:[#allocation2 + $0x3] sm:$0xff]  ;;  %v697_v25 = vpack.c.bf16 %v695_v22, %v695_v22  ;;  %v851_v32 = vld [vmem:[#allocation2 + $0x14] sm:$0xf]  ;;  %vm989_vm13 = vcmask 261121  }
  0x58   : > { %7285 = vmatmul.msk.bf16.vlgmr.msra.gmra.mxu3 %vm541_vm0, %v561_v61  ;;  %7296 = vmatmul.msk.bf16.vlgmr.msra.gmra.mxu2 %vm541_vm0, %v552_v58  ;;  %v553_v18 = vpack.c.bf16 %v551_v16, %v551_v16  ;;  %v772_v24 = vld [vmem:[#allocation2 + $0xb] sm:$0xff]  ;;  %v773_v29 = vld [vmem:[#allocation2 + $0x13] sm:$0xf]  ;;  %v853_v33 = vpack.c.bf16 %v851_v32, %v851_v32  ;;  %v7396_v52 = vld [vmem:[#allocation9 + $0x118] sm:$0xf0]  ;;  %vm994_vm1 = vcmask 258048  }
  0x59   : > { %831 = vmatpush.bf16.msra.mxu3 %v805_v5  ;;  %891 = vmatpush.bf16.msra.mxu0 %v880_v11  ;;  %v774_v26 = vpack.c.bf16 %v772_v24, %v771_v23  ;;  %v849_v27 = vld [vmem:[#allocation2 + $0x4] sm:$0xff]  ;;  %v850_v28 = vld [vmem:[#allocation2 + $0xc] sm:$0xff]  ;;  %v775_v31 = vpack.c.bf16 %v773_v29, %v773_v29  ;;  %v7399_v53 = vor.u32 %v9526_v50, %v7396_v52  ;;  %v7380_v5 = vld [vmem:[#allocation9 + $0xf8] sm:$0xf0]  ;;  %vm1477_vm2 = vcmask 1046528   ;;  %s7096_s30 = sshll.u32 %s521_s2, 4  ;;  %s7097_s30 = int_to_ptr.vmem [resolvable:$true] %s7096_s30 }
  0x5a   : > { %909 = vmatpush.bf16.msra.mxu1 %v883_v12  ;;  %v852_v30 = vpack.c.bf16 %v850_v28, %v849_v27  ;;  %1194 = vmatpush.bf16.msra.mxu2 %v7395_v51  ;;  %v7386_v54 = vld [vmem:[#allocation9 + $0x100] sm:$0xf]  ;;  %v9524_v56 = vld [vmem:[#allocation9 + $0x104] sm:$0xf]  ;;  %v7383_v6 = vor.u32 %v9522_v3, %v7380_v5  ;;  %v7372_v11 = vld [vmem:[#allocation9 + $0xe8] sm:$0xf0] }
  0x5b   : > { %v7387_v57 = vor.u32 %v9525_v55, %v7386_v54  ;;  %v9520_v9 = vld [vmem:[#allocation9 + $0xe4] sm:$0xf]  ;;  %v7364_v22 = vld [vmem:[#allocation9 + $0xd8] sm:$0xf0]  ;;  %v9517_v27 = vld [vmem:[#allocation9 + $0xc4] sm:$0xf0] }
  0x5c   : > { %v7375_v14 = vor.u32 %v9520_v9, %v7372_v11  ;;  %v10786_v24 = vld [vmem:[#allocation7] sm:$0x3]  ;;  %v9516_v28 = vld [vmem:[#allocation9 + $0xc4] sm:$0xf]  ;;  %v9515_v49 = vld [vmem:[#allocation9 + $0xb4] sm:$0xf0] }
  0x5d   : > { %832 = vmatpush.bf16.msra.mxu3 %v7319_v8  ;;  %892 = vmatpush.bf16.msra.mxu0 %v7327_v13  ;;  %v9521_v8 = vld [vmem:[#allocation9 + $0xe4] sm:$0xf0]  ;;  %v9514_v50 = vld [vmem:[#allocation9 + $0xb4] sm:$0xf]  ;;  %v9512_v1 = vld [vmem:[#allocation9 + $0xa4] sm:$0xf] }
  0x5e   : > { %910 = vmatpush.bf16.msra.mxu1 %v7331_v21  ;;  %1195 = vmatpush.bf16.msra.mxu2 %v7387_v57  ;;  %v7371_v10 = vor.u32 %v9521_v8, %v7370_v7  ;;  %v9518_v21 = vld [vmem:[#allocation9 + $0xd4] sm:$0xf]  ;;  %v7340_v2 = vld [vmem:[#allocation9 + $0xa8] sm:$0xf0]  ;;  %v7478_v9 = vld [vmem:[#allocation9 + $0x70] sm:$0xf] }
  0x5f   : > { %v7367_v23 = vor.u32 %v9518_v21, %v7364_v22  ;;  %v7343_v5 = vor.u32 %v9512_v1, %v7340_v2  ;;  %v9531_v0 = vld [vmem:[#allocation9 + $0x134] sm:$0xf0]  ;;  %v7454_v1 = vld [vmem:[#allocation9 + $0x40] sm:$0xf]  ;;  %v9501_v2 = vld [vmem:[#allocation9 + $0x44] sm:$0xf0] }
  0x60   : > { %s7098_s15 = sshll.u32 %s7094_s16, 4  ;;  %s7086_s26 = scalar_lea.sflag [#allocation6], %s520_s29  ;;  %s7099_s15 = int_to_ptr.hbm [resolvable:$true] %s7098_s15 }
  0x61   : > { %s10431_s23 = sshra.s32 %s7099_s15, 4  ;;  %s10437_s28 = scalar_lea.hbm %s11529_s11, 2  ;;  %s10432_s23 = int_to_ptr.hbm [resolvable:$true] %s10431_s23 }
  0x62   : > { %1196 = vmatpush.bf16.msra.mxu2 %v7379_v4  ;;  %s10433_s24 = scalar_lea.hbm %s10432_s23, 1  ;;  %p10438_p3 = scmp.lt.s32.totalorder %s10432_s23, %s11529_s11 }
  0x63   : > { %p10434_p0 = scmp.ne.s32.totalorder %s10432_s23, %s10433_s24  ;;  %p10439_p4 = scmp.lt.s32.totalorder %s10437_s28, %s10433_s24 }
  0x65   : > { %p10435_p1 = pnand %p10434_p0, %p10615_p5  ;;  %p10440_p7 = por %p10439_p4, %p10438_p3 }
  0x66   : > { %1197 = vmatpush.bf16.msra.mxu2 %v7371_v10  ;;  %v9507_v10 = vld [vmem:[#allocation9 + $0x74] sm:$0xf0] }
  0x67   : > { %7287 = vmatmul.msk.bf16.gmra.mxu1 %vm541_vm0, %v561_v61  ;;  %7308 = vmatmul.msk.bf16.vlgmr.msrb.gmra.mxu0 %vm541_vm0, %v696_v17  ;;  %p10436_p2 = pneg %p10435_p1 }
  0x68   : > { %7297 = vmatmul.msk.bf16.gmra.mxu2 %vm541_vm0, %v553_v18  ;;  %7298 = vmatmul.msk.bf16.vlgmr.msrb.gmra.mxu3 %vm541_vm0, %v552_v58  ;;  %v7388_v58 = vld [vmem:[#allocation9 + $0x108] sm:$0xf0] }
  0x69   : > { %1230 = vmatpush.bf16.msrb.mxu0 %v7399_v53  ;;  %v7391_v61 = vor.u32 %v9524_v56, %v7388_v58  ;;  %v7348_v53 = vld [vmem:[#allocation9 + $0xb8] sm:$0xf0]  ;;  %v7338_v58 = vld [vmem:[#allocation9 + $0xa0] sm:$0xf]  ;;  %p10441_p8 = pnand %p10440_p7, %p10436_p2 }
  0x6a   : > { %v7351_v55 = vor.u32 %v9514_v50, %v7348_v53  ;;  %v9529_v53 = vld [vmem:[#allocation9 + $0x124] sm:$0xf0] }
  0x6d   : > { %1231 = vmatpush.bf16.msrb.mxu0 %v7391_v61  ;;  %v9513_v61 = vld [vmem:[#allocation9 + $0xa4] sm:$0xf0] }
  0x71   : > { %1232 = vmatpush.bf16.msrb.mxu0 %v7383_v6 }
  0x75   : > { %1233 = vmatpush.bf16.msrb.mxu0 %v7375_v14  ;;  %v7479_v14 = vor.u32 %v9507_v10, %v7478_v9  ;;  %v7456_v9 = vld [vmem:[#allocation9 + $0x48] sm:$0xf0] }
  0x77   : > { %7309 = vmatmul.msk.bf16.gmra.mxu0 %vm541_vm0, %v697_v25  ;;  %7310 = vmatmul.msk.bf16.vlgmr.msrb.gmra.mxu1 %vm541_vm0, %v696_v17 }
  0x78   : > { %7299 = vmatmul.msk.bf16.gmra.mxu3 %vm541_vm0, %v553_v18  ;;  %7320 = vmatmul.msk.bf16.vlgmr.msrb.gmra.mxu2 %vm541_vm0, %v774_v26  ;;  %v7362_v18 = vld [vmem:[#allocation9 + $0xd0] sm:$0xf] }
  0x79   : > { %v7363_v20 = vor.u32 %v9519_v19, %v7362_v18  ;;  %1234 = vmatpush.bf16.msrb.mxu0 %v7367_v23  ;;  %v7410_v18 = vld [vmem:[#allocation9 + $0x130] sm:$0xf]  ;;  %v9530_v19 = vld [vmem:[#allocation9 + $0x134] sm:$0xf]  ;;  %v7412_v23 = vld [vmem:[#allocation9 + $0x138] sm:$0xf0] }
  0x7a   : > { %v7411_v22 = vor.u32 %v9531_v0, %v7410_v18 }
  0x7b   : > { %1198 = vmatpush.bf16.msra.mxu2 %v7363_v20 }
  0x7c   : > { %1218 = vmatpush.bf16.msrb.mxu3 %v7411_v22  ;;  %v9499_v22 = vld [vmem:[#allocation9 + $0x34] sm:$0xf0] }
  0x87   : > { %7311 = vmatmul.msk.bf16.gmra.mxu1 %vm541_vm0, %v697_v25  ;;  %7332 = vmatmul.msk.bf16.vlgmr.msra.gmra.mxu0 %vm541_vm0, %v852_v30 }
  0x88   : > { %7321 = vmatmul.msk.bf16.gmra.mxu2 %vm541_vm0, %v775_v31  ;;  %7322 = vmatmul.msk.bf16.vlgmr.msra.gmra.mxu3 %vm541_vm0, %v774_v26  ;;  %v7354_v26 = vld [vmem:[#allocation9 + $0xc0] sm:$0xf] }
  0x89   : > { %v7355_v29 = vor.u32 %v9517_v27, %v7354_v26  ;;  %v9505_v26 = vld [vmem:[#allocation9 + $0x64] sm:$0xf0] }
  0x8b   : > { %1199 = vmatpush.bf16.msra.mxu2 %v7355_v29  ;;  %v7472_v29 = vld [vmem:[#allocation9 + $0x68] sm:$0xf0] }
  0x97   : > { %7333 = vmatmul.msk.bf16.gmra.mxu0 %vm541_vm0, %v853_v33  ;;  %7334 = vmatmul.msk.bf16.vlgmr.msra.gmra.mxu1 %vm541_vm0, %v852_v30  ;;  %v7356_v30 = vld [vmem:[#allocation9 + $0xc8] sm:$0xf0] }
  0x98   : > { %7323 = vmatmul.msk.bf16.gmra.mxu3 %vm541_vm0, %v775_v31 }
  0xa7   : > { %7335 = vmatmul.msk.bf16.gmra.mxu1 %vm541_vm0, %v853_v33  ;;  %vm1055_vm0 = vsmask.f32 7424 }
  0xd4   : > { %v603_v34 = vpop.f32.mrf.mxu0  ;;  %v10754_v35 = vpop.f32.mrf.mxu1 }
  0xdb   : > { %v10756_v36 = vpop.f32.mrf.mxu3  ;;  %v666_v37 = vpop.f32.mrf.mxu2 }
  0xdc   : > { %v10758_v38 = vpop.f32.mrf.mxu0  ;;  %v10760_v39 = vpop.f32.mrf.mxu1  ;;  %v667_v17 = vadd.f32 %v666_v37, %v603_v34  ;;  %v10789_v34 = vperm.slane %v10786_v24, 0  ;;  %v7359_v37 = vor.u32 %v9516_v28, %v7356_v30  ;;  %v9504_v28 = vld [vmem:[#allocation9 + $0x64] sm:$0xf]  ;;  %v7462_v30 = vld [vmem:[#allocation9 + $0x50] sm:$0xf] }
  0xde   : > { %1235 = vmatpush.bf16.msrb.mxu0 %v7359_v37  ;;  %v7475_v37 = vor.u32 %v9504_v28, %v7472_v29  ;;  %v9496_v29 = vld [vmem:[#allocation9 + $0x24] sm:$0xf] }
  0xe2   : > { %1236 = vmatpush.bf16.msrb.mxu0 %v7351_v55 }
  0xe3   : > { %v610_v40 = vpop.f32.mrf.mxu3  ;;  %v10762_v41 = vpop.f32.mrf.mxu2 }
  0xe4   : > { %v10764_v42 = vpop.f32.mrf.mxu1  ;;  %v738_v43 = vpop.f32.mrf.mxu0  ;;  %v669_v51 = vadd.f32 %v10762_v41, %v10758_v38  ;;  %v7339_v41 = vor.u32 %v9513_v61, %v7338_v58  ;;  %v7404_v58 = vld [vmem:[#allocation9 + $0x128] sm:$0xf0] }
  0xe5   : > { %v765_v25 = vadd.f32 %v738_v43, %v667_v17  ;;  %v7346_v43 = vld [vmem:[#allocation9 + $0xb0] sm:$0xf] }
  0xe6   : > { %v7347_v52 = vor.u32 %v9515_v49, %v7346_v43  ;;  %1237 = vmatpush.bf16.msrb.mxu0 %v7343_v5 }
  0xe8   : > { %1200 = vmatpush.bf16.msra.mxu2 %v7347_v52  ;;  %v7402_v52 = vld [vmem:[#allocation9 + $0x120] sm:$0xf] }
  0xeb   : > { %v10766_v44 = vpop.f32.mrf.mxu2  ;;  %v10768_v45 = vpop.f32.mrf.mxu3 }
  0xec   : > { %v628_v46 = vpop.f32.mrf.mxu1  ;;  %v10770_v47 = vpop.f32.mrf.mxu0  ;;  %1201 = vmatpush.bf16.msra.mxu2 %v7339_v41  ;;  %v672_v11 = vadd.f32 %v10766_v44, %v10756_v36  ;;  %v7480_v36 = vld [vmem:[#allocation9 + $0x78] sm:$0xf0]  ;;  %v7470_v44 = vld [vmem:[#allocation9 + $0x60] sm:$0xf] }
  0xed   : > { %v767_v56 = vadd.f32 %v10770_v47, %v669_v51  ;;  %v7471_v27 = vor.u32 %v9505_v26, %v7470_v44  ;;  %v7464_v51 = vld [vmem:[#allocation9 + $0x58] sm:$0xf0]  ;;  %v7438_v26 = vld [vmem:[#allocation9 + $0x20] sm:$0xf] }
  0xf0   : > { %1372 = vmatpush.bf16.msrb.mxu2 %v7479_v14 }
  0xf3   : > { %v673_v59 = vpop.f32.mrf.mxu2  ;;  %v10772_v60 = vpop.f32.mrf.mxu3 }
  0xf4   : > { %v10774_v62 = vpop.f32.mrf.mxu0  ;;  %v10776_v63 = vpop.f32.mrf.mxu1  ;;  %1373 = vmatpush.bf16.msrb.mxu2 %v7471_v27  ;;  %v9497_v27 = vld [vmem:[#allocation9 + $0x24] sm:$0xf0] }
  0xf5   : > { %v769_v20 = vadd.f32 %v10774_v62, %v672_v11  ;;  %v7439_v28 = vor.u32 %v9497_v27, %v7438_v26  ;;  %v9543_v26 = vld [vmem:[#allocation9 + $0x194] sm:$0xf0] }
  0xfb   : > { %v10778_v12 = vpop.f32.mrf.mxu3  ;;  %v816_v13 = vpop.f32.mrf.mxu2 }
  0xfc   : > { %v745_v15 = vpop.f32.mrf.mxu0  ;;  %v10780_v16 = vpop.f32.mrf.mxu1  ;;  %v843_v31 = vadd.f32 %v816_v13, %v765_v25  ;;  %v685_v13 = vadd.f32 %v10768_v45, %v10754_v35  ;;  %v7415_v45 = vor.u32 %v9530_v19, %v7412_v23  ;;  %v9498_v23 = vld [vmem:[#allocation9 + $0x34] sm:$0xf] }
  0xfd   : > { %v9506_v15 = vld [vmem:[#allocation9 + $0x74] sm:$0xf] }
  0xfe   : > { %v766_v21 = vadd.f32 %v10776_v63, %v685_v13  ;;  %v7483_v25 = vor.u32 %v9506_v15, %v7480_v36  ;;  %v10811_v63 = vperm.slane %v10786_v24, 1  ;;  %1254 = vmatpush.bf16.msrb.mxu1 %v7415_v45  ;;  %v9528_v24 = vld [vmem:[#allocation9 + $0x124] sm:$0xf]  ;;  %v690_v36 = vadd.f32 %v10778_v12, %v10764_v42  ;;  %v7430_v42 = vld [vmem:[#allocation9 + $0x10] sm:$0xf] }
  0xff   : > { %v7407_v61 = vor.u32 %v9528_v24, %v7404_v58 }
 0x100   : > { %1408 = vmatpush.bf16.msra.mxu0 %v7483_v25 }
 0x102   : > { %1255 = vmatpush.bf16.msrb.mxu1 %v7407_v61 }
 0x103   : > { %v691_v32 = vpop.f32.mrf.mxu3  ;;  %v818_v33 = vpop.f32.mrf.mxu2 }
 0x104   : > { %v10791_v40 = vpop.f32.mrf.mxu1  ;;  %v894_v46 = vpop.f32.mrf.mxu0  ;;  %v845_v59 = vadd.f32 %v818_v33, %v767_v56  ;;  %1409 = vmatpush.bf16.msra.mxu0 %v7475_v37 }
 0x105   : > { %v921_v48 = vadd.f32 %v894_v46, %v843_v31  ;;  %v9503_v46 = vld [vmem:[#allocation9 + $0x54] sm:$0xf0]  ;;  %v770_v12 = vadd.f32 %v10791_v40, %v690_v36  ;;  %v7422_v40 = vld [vmem:[#allocation9] sm:$0xf] }
 0x106   : > { %v7463_v50 = vor.u32 %v9503_v46, %v7462_v30  ;;  %v7440_v30 = vld [vmem:[#allocation9 + $0x28] sm:$0xf0]  ;;  %v7554_v36 = vld [vmem:[#allocation9 + $0x1a0] sm:$0xf] }
 0x107   : > { %v933_v54 = vadd.f32 %v10789_v34, %v921_v48  ;;  %v9502_v48 = vld [vmem:[#allocation9 + $0x54] sm:$0xf] }
 0x108   : > { %v7467_v41 = vor.u32 %v9502_v48, %v7464_v51  ;;  %1374 = vmatpush.bf16.msrb.mxu2 %v7463_v50 }
 0x109   : > { %vm939_vm7 = vcmp.ge.f32.partialorder %v933_v54, 0.0  ;;  %v945_v57 = vmul.f32 0.01, %v933_v54 }
 0x10a   : > { %1410 = vmatpush.bf16.msra.mxu0 %v7467_v41  ;;  %v7424_v41 = vld [vmem:[#allocation9 + $0x8] sm:$0xf0] }
 0x10b   : > { %v10797_v3 = vsel %vm939_vm7, %v933_v54, %v945_v57  ;;  %v821_v4 = vpop.f32.mrf.mxu2  ;;  %v834_v38 = vpop.f32.mrf.mxu3  ;;  %v7403_v57 = vor.u32 %v9529_v53, %v7402_v52  ;;  %v9494_v53 = vld [vmem:[#allocation9 + $0x14] sm:$0xf] }
 0x10c   : > { %v972_v6 = vrot.slane %v10797_v3, 7  ;;  %v763_v7 = vpop.f32.mrf.mxu1  ;;  %v896_v47 = vpop.f32.mrf.mxu0  ;;  %v847_v31 = vadd.f32 %v821_v4, %v769_v20  ;;  %v844_v32 = vadd.f32 %v834_v38, %v766_v21  ;;  %v7446_v21 = vld [vmem:[#allocation9 + $0x30] sm:$0xf] }
 0x10d   : > { %v923_v8 = vadd.f32 %v896_v47, %v845_v59  ;;  %v687_v59 = vadd.f32 %v10772_v60, %v10760_v39  ;;  %1219 = vmatpush.bf16.msrb.mxu3 %v7403_v57  ;;  %v7455_v47 = vor.u32 %v9501_v2, %v7454_v1  ;;  %v7447_v3 = vor.u32 %v9499_v22, %v7446_v21  ;;  %v9493_v57 = vld [vmem:[#allocation9 + $0x4] sm:$0xf0]  ;;  %v9546_v22 = vld [vmem:[#allocation9 + $0x1b4] sm:$0xf] }
 0x10e   : > { %988 = vst [vmem:[#allocation3] sm:$0xfe] %v972_v6 }
 0x10f   : > { %v935_v17 = vadd.f32 %v10789_v34, %v923_v8  ;;  %v768_v5 = vadd.f32 %v10780_v16, %v687_v59  ;;  %v9500_v8 = vld [vmem:[#allocation9 + $0x44] sm:$0xf]  ;;  %1375 = vmatpush.bf16.msrb.mxu2 %v7455_v47 }
 0x110   : > { %v7459_v14 = vor.u32 %v9500_v8, %v7456_v9 }
 0x111   : > { %vm941_vm9 = vcmp.ge.f32.partialorder %v935_v17, 0.0  ;;  %v947_v35 = vmul.f32 0.01, %v935_v17 }
 0x112   : > { %1411 = vmatpush.bf16.msra.mxu0 %v7459_v14 }
 0x113   : > { %v836_v62 = vpop.f32.mrf.mxu3  ;;  %v823_v33 = vpop.f32.mrf.mxu2  ;;  %v953_v54 = vsel %vm941_vm9, %v935_v17, %v947_v35  ;;  %1376 = vmatpush.bf16.msrb.mxu2 %v7447_v3  ;;  %v9545_v3 = vld [vmem:[#allocation9 + $0x1a4] sm:$0xf0] }
 0x114   : > { %v899_v43 = vpop.f32.mrf.mxu0  ;;  %v912_v49 = vpop.f32.mrf.mxu1  ;;  %v974_v7 = vrot.slane %v953_v54, 7  ;;  %v7432_v54 = vld [vmem:[#allocation9 + $0x18] sm:$0xf0] }
 0x115   : > { %v925_v55 = vadd.f32 %v899_v43, %v847_v31  ;;  %v922_v56 = vadd.f32 %v912_v49, %v844_v32  ;;  %v1026_v19 = vld [vmem:[#allocation3] sm:$0xfe]  ;;  %v7443_v43 = vor.u32 %v9496_v29, %v7440_v30  ;;  %v7435_v2 = vor.u32 %v9494_v53, %v7432_v54 }
 0x116   : > { %v10822_v16 = vsel %vm971_vm10, %v972_v6, %v974_v7  ;;  %v7448_v6 = vld [vmem:[#allocation9 + $0x38] sm:$0xf0]  ;;  %v9495_v32 = vld [vmem:[#allocation9 + $0x14] sm:$0xf0]  ;;  %v9542_v29 = vld [vmem:[#allocation9 + $0x194] sm:$0xf] }
 0x117   : > { %v937_v4 = vadd.f32 %v10789_v34, %v925_v55  ;;  %v934_v38 = vadd.f32 %v10811_v63, %v922_v56  ;;  %v846_v34 = vadd.f32 %v836_v62, %v768_v5  ;;  %v1030_v45 = vpack.c.bf16 %v10822_v16, %v1026_v19  ;;  %v7494_v62 = vld [vmem:[#allocation9 + $0x90] sm:$0xf]  ;;  %v9511_v49 = vld [vmem:[#allocation9 + $0x94] sm:$0xf0]  ;;  %1377 = vmatpush.bf16.msrb.mxu2 %v7439_v28  ;;  %v7496_v19 = vld [vmem:[#allocation9 + $0x98] sm:$0xf0] }
 0x118   : > { %v7451_v25 = vor.u32 %v9498_v23, %v7448_v6  ;;  %v7431_v52 = vor.u32 %v9495_v32, %v7430_v42  ;;  %v7495_v55 = vor.u32 %v9511_v49, %v7494_v62  ;;  %v7564_v23 = vld [vmem:[#allocation9 + $0x1b8] sm:$0xf0]  ;;  %v9544_v6 = vld [vmem:[#allocation9 + $0x1a4] sm:$0xf]  ;;  %v7486_v42 = vld [vmem:[#allocation9 + $0x80] sm:$0xf] }
 0x119   : > { %vm943_vm11 = vcmp.ge.f32.partialorder %v937_v4, 0.0  ;;  %v949_v39 = vmul.f32 0.01, %v937_v4  ;;  %vm940_vm12 = vcmp.ge.f32.partialorder %v934_v38, 0.0  ;;  %v946_v60 = vmul.f32 0.01, %v934_v38 }
 0x11a   : > { %v1059_v48 = vshll.u32 %v1030_v45, 16  ;;  %1412 = vmatpush.bf16.msra.mxu0 %v7451_v25  ;;  %1396 = vmatpush.bf16.msra.mxu3 %v7495_v55  ;;  %v7546_v25 = vld [vmem:[#allocation9 + $0x190] sm:$0xf]  ;;  %v7548_v30 = vld [vmem:[#allocation9 + $0x198] sm:$0xf0] }
 0x11b   : > { %v955_v10 = vsel %vm943_vm11, %v937_v4, %v949_v39  ;;  %v952_v11 = vsel %vm940_vm12, %v934_v38, %v946_v60  ;;  %v839_v13 = vpop.f32.mrf.mxu3  ;;  %1378 = vmatpush.bf16.msrb.mxu2 %v7431_v52  ;;  %v7423_v4 = vor.u32 %v9493_v57, %v7422_v40  ;;  %v9492_v38 = vld [vmem:[#allocation9 + $0x4] sm:$0xf]  ;;  %v7547_v32 = vor.u32 %v9543_v26, %v7546_v25  ;;  %v7580_v25 = vld [vmem:[#allocation9 + $0x1d8] sm:$0xf0]  ;;  %v7570_v26 = vld [vmem:[#allocation9 + $0x1c0] sm:$0xf] }
 0x11c   : > { %v978_v15 = vrot.slane %v955_v10, 7  ;;  %v973_v17 = vrot.slane %v952_v11, 7  ;;  %v914_v18 = vpop.f32.mrf.mxu1  ;;  %v901_v0 = vpop.f32.mrf.mxu0  ;;  %v848_v33 = vadd.f32 %v839_v13, %v770_v12  ;;  %v1061_v1 = vrot.slane %v1059_v48, 1  ;;  %v9509_v12 = vld [vmem:[#allocation9 + $0x84] sm:$0xf0] }
 0x11d   : > { %v924_v20 = vadd.f32 %v914_v18, %v846_v34  ;;  %v9510_v0 = vld [vmem:[#allocation9 + $0x94] sm:$0xf]  ;;  %v7487_v62 = vor.u32 %v9509_v12, %v7486_v42  ;;  %v7538_v48 = vld [vmem:[#allocation9 + $0x180] sm:$0xf]  ;;  %v9540_v55 = vld [vmem:[#allocation9 + $0x184] sm:$0xf] }
 0x11e   : > { %v979_v44 = vsel %vm971_vm10, %v974_v7, %v978_v15  ;;  %990 = vst.msk [vmem:[#allocation3 + $0x8] sm:$0xfe] %vm989_vm13, %v973_v17  ;;  %1413 = vmatpush.bf16.msra.mxu0 %v7443_v43  ;;  %v1057_v7 = vshrl.u32 %v1030_v45, 16  ;;  %v7562_v15 = vld [vmem:[#allocation9 + $0x1b0] sm:$0xf]  ;;  %v7499_v21 = vor.u32 %v9510_v0, %v7496_v19 }
 0x11f   : > { %993 = vst [vmem:[#allocation3 + $0x20] sm:$0x1f] %v979_v44  ;;  %v936_v35 = vadd.f32 %v10811_v63, %v924_v20  ;;  %1379 = vmatpush.bf16.msrb.mxu2 %v7423_v4  ;;  %v7567_v44 = vor.u32 %v9546_v22, %v7564_v23  ;;  %v7556_v45 = vld [vmem:[#allocation9 + $0x1a8] sm:$0xf0]  ;;  %v9541_v43 = vld [vmem:[#allocation9 + $0x184] sm:$0xf0]  ;;  %1397 = vmatpush.bf16.msra.mxu3 %v7487_v62 }
 0x120   : > { %v1062_v9 = vor.u32 %v1061_v1, %v1057_v7  ;;  %1432 = vmatpush.bf16.msra.mxu1 %v7499_v21  ;;  %v7559_v28 = vor.u32 %v9544_v6, %v7556_v45  ;;  %v7539_v54 = vor.u32 %v9541_v43, %v7538_v48  ;;  %v9539_v4 = vld [vmem:[#allocation9 + $0x174] sm:$0xf0]  ;;  %v9537_v7 = vld [vmem:[#allocation9 + $0x164] sm:$0xf0]  ;;  %v7506_v0 = vld [vmem:[#allocation9 + $0x140] sm:$0xf] }
 0x121   : > { %vm942_vm14 = vcmp.ge.f32.partialorder %v936_v35, 0.0  ;;  %v948_v31 = vmul.f32 0.01, %v936_v35  ;;  %v9533_v19 = vld [vmem:[#allocation9 + $0x144] sm:$0xf0]  ;;  %v996_v21 = vld [vmem:[#allocation3] sm:$0xff] }
 0x122   : > { %1414 = vmatpush.bf16.msra.mxu0 %v7435_v2  ;;  %v7530_v2 = vld [vmem:[#allocation9 + $0x170] sm:$0xf]  ;;  %v7507_v22 = vor.u32 %v9533_v19, %v7506_v0  ;;  %v9532_v23 = vld [vmem:[#allocation9 + $0x144] sm:$0xf]  ;;  %v1002_v6 = vpack.c.bf16 %v10822_v16, %v996_v21  ;;  %v9550_v45 = vld [vmem:[#allocation9 + $0x1d4] sm:$0xf] }
 0x123   : > { %v954_v37 = vsel %vm942_vm14, %v936_v35, %v948_v31  ;;  %v841_v46 = vpop.f32.mrf.mxu3  ;;  %v7555_v35 = vor.u32 %v9545_v3, %v7554_v36  ;;  %v9508_v31 = vld [vmem:[#allocation9 + $0x84] sm:$0xf]  ;;  %v7508_v36 = vld [vmem:[#allocation9 + $0x148] sm:$0xf0] }
 0x124   : > { %v976_v50 = vrot.slane %v954_v37, 7  ;;  %v917_v51 = vpop.f32.mrf.mxu1 }
 0x125   : > { %v926_v56 = vadd.f32 %v917_v51, %v848_v33  ;;  %v1027_v11 = vld [vmem:[#allocation3 + $0x8] sm:$0xfe]  ;;  %v7488_v33 = vld [vmem:[#allocation9 + $0x88] sm:$0xf0]  ;;  %v7551_v51 = vor.u32 %v9542_v29, %v7548_v30 }
 0x126   : > { %v977_v24 = vsel %vm971_vm10, %v973_v17, %v976_v50  ;;  %v1028_v58 = vld [vmem:[#allocation3 + $0x20] sm:$0x1f]  ;;  %v7491_v46 = vor.u32 %v9508_v31, %v7488_v33  ;;  %v9548_v29 = vld [vmem:[#allocation9 + $0x1c4] sm:$0xf]  ;;  %v7572_v30 = vld [vmem:[#allocation9 + $0x1c8] sm:$0xf0] }
 0x127   : > { %992 = vst.msk [vmem:[#allocation3 + $0x18] sm:$0xff] %vm958_vm6, %v977_v24  ;;  %v938_v59 = vadd.f32 %v10811_v63, %v926_v56  ;;  %v10834_v61 = vpack.c.bf16 %v1028_v58, %v1028_v58  ;;  %v7427_v63 = vor.u32 %v9492_v38, %v7424_v41  ;;  %v9547_v17 = vld [vmem:[#allocation9 + $0x1b4] sm:$0xf0]  ;;  %v7540_v56 = vld [vmem:[#allocation9 + $0x188] sm:$0xf0]  ;;  %v7531_v41 = vor.u32 %v9539_v4, %v7530_v2 }
 0x128   : > { %v7563_v20 = vor.u32 %v9547_v17, %v7562_v15  ;;  %1433 = vmatpush.bf16.msra.mxu1 %v7491_v46  ;;  %v9538_v38 = vld [vmem:[#allocation9 + $0x174] sm:$0xf]  ;;  %v7575_v12 = vor.u32 %v9548_v29, %v7572_v30  ;;  %v1444_v46 = vld [vmem:[#allocation3] sm:$0xfc]  ;;  %v7638_v29 = vld [vmem:[#allocation9 + $0x2e0] sm:$0xf] }
 0x129   : > { %vm944_vm15 = vcmp.ge.f32.partialorder %v938_v59, 0.0  ;;  %v950_v5 = vmul.f32 0.01, %v938_v59  ;;  %v1064_v47 = vshll.u32 %v10834_v61, 16  ;;  %1415 = vmatpush.bf16.msra.mxu0 %v7427_v63  ;;  %v1080_v40 = vshrl.u32 %v10834_v61, 16 }
 0x12a   : > { %v7532_v61 = vld [vmem:[#allocation9 + $0x178] sm:$0xf0]  ;;  %v7514_v63 = vld [vmem:[#allocation9 + $0x150] sm:$0xf]  ;;  %v9534_v17 = vld [vmem:[#allocation9 + $0x154] sm:$0xf]  ;;  %v1448_v43 = vpack.c.bf16 %v10822_v16, %v1444_v46 }
 0x12b   : > { %v956_v8 = vsel %vm944_vm15, %v938_v59, %v950_v5  ;;  %v10837_v39 = vrot.slane %v1064_v47, 1  ;;  %v7543_v59 = vor.u32 %v9540_v55, %v7540_v56  ;;  %v7522_v5 = vld [vmem:[#allocation9 + $0x160] sm:$0xf]  ;;  %v7535_v47 = vor.u32 %v9538_v38, %v7532_v61  ;;  %v1000_v31 = vld [vmem:[#allocation3 + $0x20] sm:$0xf] }
 0x12c   : > { %v980_v60 = vrot.slane %v956_v8, 7  ;;  %v919_v34 = vpop.f32.mrf.mxu1  ;;  %v7523_v8 = vor.u32 %v9537_v7, %v7522_v5  ;;  %v1004_v62 = vpack.c.bf16 %v1000_v31, %v1000_v31  ;;  %v1445_v56 = vld [vmem:[#allocation3 + $0x8] sm:$0xfc]  ;;  %v9585_v30 = vld [vmem:[#allocation9 + $0x2e4] sm:$0xf0] }
 0x12d   : > { %v1067_v10 = vsel %vm1055_vm0, %v1062_v9, %v10837_v39  ;;  %v1082_v58 = vor.u32 %v1080_v40, %v10837_v39  ;;  %v9536_v9 = vld [vmem:[#allocation9 + $0x164] sm:$0xf]  ;;  %v7524_v39 = vld [vmem:[#allocation9 + $0x168] sm:$0xf0]  ;;  %v7578_v34 = vld [vmem:[#allocation9 + $0x1d0] sm:$0xf] }
 0x12e   : > { %v981_v13 = vsel %vm971_vm10, %v976_v50, %v980_v60  ;;  %1202 = vmatmul.bf16.vlgmr.msra.gmra.mxu2 %v1067_v10  ;;  %1238 = vmatmul.bf16.vlgmr.msrb.gmra.mxu0 %v1067_v10  ;;  %v10842_v14 = vld [vmem:[#allocation3 + $0x18] sm:$0xff]  ;;  %v9535_v60 = vld [vmem:[#allocation9 + $0x154] sm:$0xf0] }
 0x12f   : > { %995 = vst.msk [vmem:[#allocation3 + $0x28] sm:$0x1f] %vm994_vm1, %v981_v13  ;;  %v1031_v18 = vpack.c.bf16 %v10842_v14, %v1027_v11  ;;  %1592 = vmatpush.bf16.msra.mxu2 %v7563_v20  ;;  %1628 = vmatpush.bf16.msrb.mxu0 %v7567_v44  ;;  %v9551_v10 = vld [vmem:[#allocation9 + $0x1d4] sm:$0xf0]  ;;  %v7527_v13 = vor.u32 %v9536_v9, %v7524_v39  ;;  %v7640_v31 = vld [vmem:[#allocation9 + $0x2e8] sm:$0xf0] }
 0x130   : > { %v7579_v11 = vor.u32 %v9551_v10, %v7578_v34  ;;  %v7515_v15 = vor.u32 %v9535_v60, %v7514_v63  ;;  %v1449_v40 = vpack.c.bf16 %v10842_v14, %v1445_v56  ;;  %v9582_v46 = vld [vmem:[#allocation9 + $0x2d4] sm:$0xf] }
 0x131   : > { %v1071_v27 = vshll.u32 %v1031_v18, 16  ;;  %v1069_v52 = vshrl.u32 %v1031_v18, 16  ;;  %v7516_v18 = vld [vmem:[#allocation9 + $0x158] sm:$0xf0] }
 0x132   : > { %v7519_v20 = vor.u32 %v9534_v17, %v7516_v18  ;;  %v1481_v16 = vrot.slane %v1449_v40, 1  ;;  %v7622_v40 = vld [vmem:[#allocation9 + $0x2c0] sm:$0xf] }
 0x133   : > { %1593 = vmatpush.bf16.msra.mxu2 %v7555_v35  ;;  %v1073_v50 = vrot.slane %v1071_v27, 1  ;;  %1629 = vmatpush.bf16.msrb.mxu0 %v7559_v28  ;;  %v7511_v35 = vor.u32 %v9532_v23, %v7508_v36  ;;  %v7583_v27 = vor.u32 %v9550_v45, %v7580_v25  ;;  %v9549_v28 = vld [vmem:[#allocation9 + $0x1c4] sm:$0xf0]  ;;  %v7646_v36 = vld [vmem:[#allocation9 + $0x2f0] sm:$0xf] }
 0x134   : > { %v7571_v42 = vor.u32 %v9549_v28, %v7570_v26  ;;  %v7648_v25 = vld [vmem:[#allocation9 + $0x2f8] sm:$0xf0] }
 0x135   : > { %v1074_v57 = vor.u32 %v1073_v50, %v1069_v52 }
 0x136   : > { %v1029_v37 = vld [vmem:[#allocation3 + $0x28] sm:$0x1f] }
 0x137   : > { %v1033_v49 = vpack.c.bf16 %v1029_v37, %v1029_v37  ;;  %1594 = vmatpush.bf16.msra.mxu2 %v7547_v32  ;;  %1630 = vmatpush.bf16.msrb.mxu0 %v7551_v51  ;;  %v997_v32 = vld [vmem:[#allocation3 + $0x8] sm:$0xff]  ;;  %v1446_v37 = vld [vmem:[#allocation3 + $0x20] sm:$0x3f]  ;;  %v1478_v51 = vrot.slane %v1448_v43, 1 }
 0x138   : > { %v1003_v33 = vpack.c.bf16 %v10842_v14, %v997_v32  ;;  %v1450_v48 = vpack.c.bf16 %v1446_v37, %v1446_v37  ;;  %v9583_v37 = vld [vmem:[#allocation9 + $0x2d4] sm:$0xf0] }
 0x139   : > { %v1076_v53 = vshll.u32 %v1033_v49, 16  ;;  %v1083_v44 = vshrl.u32 %v1033_v49, 16  ;;  %v1001_v49 = vld [vmem:[#allocation3 + $0x28] sm:$0xf] }
 0x13a   : > { %v1479_v50 = vrot.slane %v1450_v48, 1  ;;  %v1005_v52 = vpack.c.bf16 %v1001_v49, %v1001_v49 }
 0x13b   : > { %v1078_v24 = vrot.slane %v1076_v53, 1  ;;  %1595 = vmatpush.bf16.msra.mxu2 %v7539_v54  ;;  %1631 = vmatpush.bf16.msrb.mxu0 %v7543_v59  ;;  %v1447_v54 = vld [vmem:[#allocation3 + $0x28] sm:$0x3f] }
 0x13c   : > { %v1480_v53 = vsel %vm1477_vm2, %v1478_v51, %v1479_v50  ;;  %v1451_v55 = vpack.c.bf16 %v1447_v54, %v1447_v54 }
 0x13d   : > { %v1079_v1 = vsel %vm1055_vm0, %v1074_v57, %v1078_v24  ;;  %v1085_v3 = vor.u32 %v1083_v44, %v1078_v24  ;;  %v9587_v44 = vld [vmem:[#allocation9 + $0x2f4] sm:$0xf0] }
 0x13e   : > { %1207 = vmatmul.bf16.gmra.mxu2 %v1082_v58  ;;  %7416 = vmatmul.msk.bf16.vlgmr.msrb.gmra.mxu3 %vm958_vm6, %v1079_v1  ;;  %v1482_v57 = vrot.slane %v1451_v55, 1  ;;  %v7647_v45 = vor.u32 %v9587_v44, %v7646_v36  ;;  %v7664_v44 = vld [vmem:[#allocation9 + $0x318] sm:$0xf0] }
 0x13f   : > { %1243 = vmatmul.bf16.gmra.mxu0 %v1082_v58  ;;  %7418 = vmatmul.msk.bf16.vlgmr.msrb.gmra.mxu1 %vm958_vm6, %v1079_v1 }
 0x140   : > { %1596 = vmatpush.bf16.msra.mxu2 %v7531_v41  ;;  %1632 = vmatpush.bf16.msrb.mxu0 %v7535_v47  ;;  %v1483_v24 = vsel %vm1477_vm2, %v1481_v16, %v1482_v57  ;;  %v9580_v16 = vld [vmem:[#allocation9 + $0x2c4] sm:$0xf] }
 0x141   : > { %1616 = vmatpush.bf16.msrb.mxu3 %v7579_v11  ;;  %1652 = vmatpush.bf16.msrb.mxu1 %v7583_v27 }
 0x144   : > { %1597 = vmatpush.bf16.msra.mxu2 %v7523_v8  ;;  %1633 = vmatpush.bf16.msrb.mxu0 %v7527_v13 }
 0x145   : > { %1617 = vmatpush.bf16.msrb.mxu3 %v7571_v42  ;;  %1653 = vmatpush.bf16.msrb.mxu1 %v7575_v12  ;;  %v9584_v42 = vld [vmem:[#allocation9 + $0x2e4] sm:$0xf]  ;;  %v7639_v12 = vor.u32 %v9585_v30, %v7638_v29  ;;  %v9578_v29 = vld [vmem:[#allocation9 + $0x2b4] sm:$0xf] }
 0x146   : > { %v7643_v32 = vor.u32 %v9584_v42, %v7640_v31 }
 0x148   : > { %1598 = vmatpush.bf16.msra.mxu2 %v7515_v15  ;;  %1634 = vmatpush.bf16.msrb.mxu0 %v7519_v20 }
 0x14c   : > { %1599 = vmatpush.bf16.msra.mxu2 %v7507_v22  ;;  %1635 = vmatpush.bf16.msrb.mxu0 %v7511_v35 }
 0x14e   : > { %7417 = vmatmul.msk.bf16.gmra.mxu3 %vm958_vm6, %v1085_v3  ;;  %1380 = vmatmul.bf16.vlgmr.msrb.gmra.mxu2 %v1002_v6 }
 0x14f   : > { %7419 = vmatmul.msk.bf16.gmra.mxu1 %vm958_vm6, %v1085_v3  ;;  %1416 = vmatmul.bf16.vlgmr.msra.gmra.mxu0 %v1002_v6  ;;  %v9586_v3 = vld [vmem:[#allocation9 + $0x2f4] sm:$0xf] }
 0x150   : > { %v7651_v26 = vor.u32 %v9586_v3, %v7648_v25  ;;  %1926 = vmatpush.bf16.msrb.mxu2 %v7647_v45  ;;  %v7614_v3 = vld [vmem:[#allocation9 + $0x2b0] sm:$0xf]  ;;  %v9579_v45 = vld [vmem:[#allocation9 + $0x2b4] sm:$0xf0] }
 0x152   : > { %1962 = vmatpush.bf16.msra.mxu0 %v7651_v26 }
 0x154   : > { %1927 = vmatpush.bf16.msrb.mxu2 %v7639_v12 }
 0x156   : > { %1963 = vmatpush.bf16.msra.mxu0 %v7643_v32  ;;  %v9577_v32 = vld [vmem:[#allocation9 + $0x2a4] sm:$0xf0] }
 0x15e   : > { %1385 = vmatmul.bf16.gmra.mxu2 %v1004_v62  ;;  %7500 = vmatmul.msk.bf16.vlgmr.msra.gmra.mxu3 %vm958_vm6, %v1003_v33 }
 0x15f   : > { %1421 = vmatmul.bf16.gmra.mxu0 %v1004_v62  ;;  %7502 = vmatmul.msk.bf16.vlgmr.msra.gmra.mxu1 %vm958_vm6, %v1003_v33  ;;  %v7630_v33 = vld [vmem:[#allocation9 + $0x2d0] sm:$0xf] }
 0x160   : > { %v7631_v49 = vor.u32 %v9583_v37, %v7630_v33  ;;  %v7608_v33 = vld [vmem:[#allocation9 + $0x2a8] sm:$0xf0]  ;;  %v7654_v37 = vld [vmem:[#allocation9 + $0x300] sm:$0xf] }
 0x162   : > { %1928 = vmatpush.bf16.msrb.mxu2 %v7631_v49 }
 0x16e   : > { %7501 = vmatmul.msk.bf16.gmra.mxu3 %vm958_vm6, %v1005_v52  ;;  %1600 = vmatmul.bf16.vlgmr.msra.gmra.mxu2 %v1480_v53 }
 0x16f   : > { %7503 = vmatmul.msk.bf16.gmra.mxu1 %vm958_vm6, %v1005_v52  ;;  %1636 = vmatmul.bf16.vlgmr.msrb.gmra.mxu0 %v1480_v53  ;;  %v1670_v52 = vld [vmem:[#allocation10] sm:$0x3] }
 0x17e   : > { %1605 = vmatmul.bf16.gmra.mxu2 %v1479_v50  ;;  %7584 = vmatmul.msk.bf16.vlgmr.msrb.gmra.mxu3 %vm958_vm6, %v1483_v24 }
 0x17f   : > { %1641 = vmatmul.bf16.gmra.mxu0 %v1479_v50  ;;  %7586 = vmatmul.msk.bf16.vlgmr.msrb.gmra.mxu1 %vm958_vm6, %v1483_v24  ;;  %v7632_v50 = vld [vmem:[#allocation9 + $0x2d8] sm:$0xf0] }
 0x180   : > { %v7635_v53 = vor.u32 %v9582_v46, %v7632_v50  ;;  %v9589_v46 = vld [vmem:[#allocation9 + $0x304] sm:$0xf0] }
 0x182   : > { %1964 = vmatpush.bf16.msra.mxu0 %v7635_v53 }
 0x18e   : > { %7585 = vmatmul.msk.bf16.gmra.mxu3 %vm958_vm6, %v1482_v57 }
 0x18f   : > { %7587 = vmatmul.msk.bf16.gmra.mxu1 %vm958_vm6, %v1482_v57  ;;  %v9581_v57 = vld [vmem:[#allocation9 + $0x2c4] sm:$0xf0] }
 0x1ab   : > { %v1239_v58 = vpop.f32.mrf.mxu0 }
 0x1b1   : > { %v10867_v59 = vpop.f32.mrf.mxu2 }
 0x1b3   : > { %v10869_v1 = vpop.f32.mrf.mxu0 }
 0x1b9   : > { %v10871_v14 = vpop.f32.mrf.mxu2 }
 0x1bc   : > { %v10873_v2 = vpop.f32.mrf.mxu0  ;;  %v1257_v4 = vpop.f32.mrf.mxu1 }
 0x1bd   : > { %v1258_v62 = vadd.f32 %v1257_v4, %v1239_v58  ;;  %v10915_v58 = vperm.slane %v1670_v52, 1  ;;  %v10917_v4 = vperm.slane %v1670_v52, 0  ;;  %v7656_v52 = vld [vmem:[#allocation9 + $0x308] sm:$0xf0] }
 0x1c1   : > { %v10875_v38 = vpop.f32.mrf.mxu2  ;;  %v10877_v41 = vpop.f32.mrf.mxu3 }
 0x1c4   : > { %v1246_v61 = vpop.f32.mrf.mxu0  ;;  %v10879_v5 = vpop.f32.mrf.mxu1 }
 0x1c5   : > { %v7623_v61 = vor.u32 %v9581_v57, %v7622_v40  ;;  %v7598_v57 = vld [vmem:[#allocation9 + $0x290] sm:$0xf] }
 0x1c7   : > { %1929 = vmatpush.bf16.msrb.mxu2 %v7623_v61  ;;  %v9574_v61 = vld [vmem:[#allocation9 + $0x294] sm:$0xf] }
 0x1c9   : > { %v1210_v7 = vpop.f32.mrf.mxu2  ;;  %v10881_v47 = vpop.f32.mrf.mxu3 }
 0x1ca   : > { %v7624_v7 = vld [vmem:[#allocation9 + $0x2c8] sm:$0xf0] }
 0x1cc   : > { %v10883_v8 = vpop.f32.mrf.mxu1  ;;  %v1417_v9 = vpop.f32.mrf.mxu0 }
 0x1cd   : > { %v1418_v51 = vadd.f32 %v1417_v9, %v1258_v62  ;;  %v1222_v9 = vadd.f32 %v10877_v41, %v10867_v59  ;;  %v7616_v59 = vld [vmem:[#allocation9 + $0x2b8] sm:$0xf0]  ;;  %v7606_v41 = vld [vmem:[#allocation9 + $0x2a0] sm:$0xf]  ;;  %v9576_v62 = vld [vmem:[#allocation9 + $0x2a4] sm:$0xf] }
 0x1ce   : > { %v7619_v31 = vor.u32 %v9578_v29, %v7616_v59  ;;  %v7607_v50 = vor.u32 %v9577_v32, %v7606_v41  ;;  %v7611_v40 = vor.u32 %v9576_v62, %v7608_v33  ;;  %v9567_v32 = vld [vmem:[#allocation9 + $0x254] sm:$0xf0] }
 0x1d1   : > { %v10885_v39 = vpop.f32.mrf.mxu3  ;;  %v10887_v63 = vpop.f32.mrf.mxu2 }
 0x1d2   : > { %v1382_v25 = vadd.f32 %v10887_v63, %v1222_v9  ;;  %v1224_v9 = vadd.f32 %v10881_v47, %v10871_v14  ;;  %v1227_v62 = vadd.f32 %v10885_v39, %v10875_v38  ;;  %v9564_v38 = vld [vmem:[#allocation9 + $0x244] sm:$0xf] }
 0x1d4   : > { %v1264_v60 = vpop.f32.mrf.mxu1  ;;  %v10889_v34 = vpop.f32.mrf.mxu0 }
 0x1d5   : > { %v7662_v60 = vld [vmem:[#allocation9 + $0x310] sm:$0xf] }
 0x1d9   : > { %v1228_v10 = vpop.f32.mrf.mxu3  ;;  %v10891_v11 = vpop.f32.mrf.mxu2 }
 0x1da   : > { %v9591_v10 = vld [vmem:[#allocation9 + $0x314] sm:$0xf0] }
 0x1db   : > { %v7663_v36 = vor.u32 %v9591_v10, %v7662_v60 }
 0x1dc   : > { %v10893_v13 = vpop.f32.mrf.mxu0  ;;  %v1435_v15 = vpop.f32.mrf.mxu1 }
 0x1dd   : > { %v1436_v54 = vadd.f32 %v1435_v15, %v1418_v51  ;;  %v7627_v15 = vor.u32 %v9580_v16, %v7624_v7  ;;  %1950 = vmatpush.bf16.msra.mxu3 %v7663_v36  ;;  %v7655_v51 = vor.u32 %v9589_v46, %v7654_v37  ;;  %v7600_v7 = vld [vmem:[#allocation9 + $0x298] sm:$0xf0] }
 0x1de   : > { %v7603_v36 = vor.u32 %v9574_v61, %v7600_v7  ;;  %v7732_v37 = vld [vmem:[#allocation9 + $0x258] sm:$0xf0] }
 0x1df   : > { %1965 = vmatpush.bf16.msra.mxu0 %v7627_v15  ;;  %v1263_v15 = vadd.f32 %v10883_v8, %v10873_v2 }
 0x1e1   : > { %v10895_v17 = vpop.f32.mrf.mxu2  ;;  %v10897_v18 = vpop.f32.mrf.mxu3  ;;  %1951 = vmatpush.bf16.msra.mxu3 %v7655_v51  ;;  %v1423_v2 = vadd.f32 %v10893_v13, %v1263_v15 }
 0x1e3   : > { %1966 = vmatpush.bf16.msra.mxu0 %v7619_v31 }
 0x1e4   : > { %v1424_v0 = vpop.f32.mrf.mxu0  ;;  %v10899_v19 = vpop.f32.mrf.mxu1 }
 0x1e5   : > { %v9590_v0 = vld [vmem:[#allocation9 + $0x314] sm:$0xf] }
 0x1e6   : > { %v7667_v26 = vor.u32 %v9590_v0, %v7664_v44 }
 0x1e7   : > { %1967 = vmatpush.bf16.msra.mxu0 %v7611_v40 }
 0x1e8   : > { %1986 = vmatpush.bf16.msra.mxu1 %v7667_v26  ;;  %v7592_v26 = vld [vmem:[#allocation9 + $0x288] sm:$0xf0] }
 0x1e9   : > { %v1388_v20 = vpop.f32.mrf.mxu2  ;;  %v10901_v21 = vpop.f32.mrf.mxu3 }
 0x1eb   : > { %1968 = vmatpush.bf16.msra.mxu0 %v7603_v36 }
 0x1ec   : > { %v10903_v22 = vpop.f32.mrf.mxu1  ;;  %v1637_v23 = vpop.f32.mrf.mxu0 }
 0x1ed   : > { %v1441_v31 = vadd.f32 %v10903_v22, %v1423_v2 }
 0x1f1   : > { %v10905_v6 = vpop.f32.mrf.mxu3  ;;  %v10907_v35 = vpop.f32.mrf.mxu2 }
 0x1f4   : > { %v1442_v27 = vpop.f32.mrf.mxu1  ;;  %v10909_v28 = vpop.f32.mrf.mxu0 }
 0x1f5   : > { %v7615_v27 = vor.u32 %v9579_v45, %v7614_v3  ;;  %v7590_v3 = vld [vmem:[#allocation9 + $0x280] sm:$0xf]  ;;  %v9573_v45 = vld [vmem:[#allocation9 + $0x284] sm:$0xf0] }
 0x1f6   : > { %v7591_v59 = vor.u32 %v9573_v45, %v7590_v3  ;;  %v7706_v3 = vld [vmem:[#allocation9 + $0x220] sm:$0xf] }
 0x1f7   : > { %1930 = vmatpush.bf16.msrb.mxu2 %v7615_v27 }
 0x1f9   : > { %v1406_v48 = vpop.f32.mrf.mxu3  ;;  %v10911_v43 = vpop.f32.mrf.mxu2 }
 0x1fa   : > { %v9588_v48 = vld [vmem:[#allocation9 + $0x304] sm:$0xf] }
 0x1fb   : > { %1931 = vmatpush.bf16.msrb.mxu2 %v7607_v50  ;;  %v1387_v50 = vadd.f32 %v10895_v17, %v1227_v62  ;;  %v9558_v62 = vld [vmem:[#allocation9 + $0x214] sm:$0xf] }
 0x1fc   : > { %v10913_v55 = vpop.f32.mrf.mxu0  ;;  %v1655_v56 = vpop.f32.mrf.mxu1 }
 0x1fd   : > { %v1656_v24 = vadd.f32 %v1655_v56, %v1637_v23  ;;  %v1260_v23 = vadd.f32 %v10879_v5, %v10869_v1  ;;  %v1400_v5 = vadd.f32 %v10897_v18, %v1382_v25  ;;  %v9575_v18 = vld [vmem:[#allocation9 + $0x294] sm:$0xf0]  ;;  %v1405_v40 = vadd.f32 %v10905_v6, %v1387_v50  ;;  %v9569_v50 = vld [vmem:[#allocation9 + $0x264] sm:$0xf0] }
 0x1ff   : > { %v1665_v20 = vadd.f32 %v1656_v24, %v1436_v54  ;;  %v1420_v1 = vadd.f32 %v10889_v34, %v1260_v23  ;;  %v7659_v34 = vor.u32 %v9588_v48, %v7656_v52  ;;  %v9572_v23 = vld [vmem:[#allocation9 + $0x284] sm:$0xf]  ;;  %v7722_v48 = vld [vmem:[#allocation9 + $0x240] sm:$0xf] }
 0x201   : > { %v1677_v30 = vadd.f32 %v10915_v58, %v1665_v20  ;;  %v10925_v42 = vpop.f32.mrf.mxu2  ;;  %v1619_v12 = vpop.f32.mrf.mxu3  ;;  %1987 = vmatpush.bf16.msra.mxu1 %v7659_v34  ;;  %v7599_v20 = vor.u32 %v9575_v18, %v7598_v57  ;;  %v9563_v57 = vld [vmem:[#allocation9 + $0x234] sm:$0xf0]  ;;  %v9562_v18 = vld [vmem:[#allocation9 + $0x234] sm:$0xf] }
 0x202   : > { %v1620_v63 = vadd.f32 %v1619_v12, %v10907_v35  ;;  %v1438_v35 = vadd.f32 %v10899_v19, %v1420_v1  ;;  %v1384_v19 = vadd.f32 %v10891_v11, %v1224_v9  ;;  %v7595_v12 = vor.u32 %v9572_v23, %v7592_v26 }
 0x203   : > { %vm1683_vm3 = vcmp.ge.f32.partialorder %v1677_v30, 0.0  ;;  %v1689_v49 = vmul.f32 0.01, %v1677_v30  ;;  %1932 = vmatpush.bf16.msrb.mxu2 %v7599_v20 }
 0x204   : > { %v1664_v53 = vadd.f32 %v1620_v63, %v1400_v5  ;;  %v1644_v54 = vpop.f32.mrf.mxu0  ;;  %v1657_v56 = vpop.f32.mrf.mxu1  ;;  %v1402_v8 = vadd.f32 %v10901_v21, %v1384_v19  ;;  %v9566_v63 = vld [vmem:[#allocation9 + $0x254] sm:$0xf]  ;;  %1969 = vmatpush.bf16.msra.mxu0 %v7595_v12 }
 0x205   : > { %v1695_v16 = vsel %vm1683_vm3, %v1677_v30, %v1689_v49  ;;  %v1658_v24 = vadd.f32 %v1657_v56, %v10909_v28  ;;  %v7735_v22 = vor.u32 %v9566_v63, %v7732_v37  ;;  %v9565_v49 = vld [vmem:[#allocation9 + $0x244] sm:$0xf0]  ;;  %v7724_v54 = vld [vmem:[#allocation9 + $0x248] sm:$0xf0]  ;;  %v7714_v56 = vld [vmem:[#allocation9 + $0x230] sm:$0xf] }
 0x206   : > { %v1707_v60 = vrot.slane %v1695_v16, 7  ;;  %v1676_v10 = vadd.f32 %v10917_v4, %v1664_v53  ;;  %v7723_v52 = vor.u32 %v9565_v49, %v7722_v48  ;;  %v7727_v34 = vor.u32 %v9564_v38, %v7724_v54  ;;  %v9557_v37 = vld [vmem:[#allocation9 + $0x204] sm:$0xf0]  ;;  %v7692_v48 = vld [vmem:[#allocation9 + $0x208] sm:$0xf0] }
 0x207   : > { %v1667_v0 = vadd.f32 %v1658_v24, %v1438_v35  ;;  %1933 = vmatpush.bf16.msrb.mxu2 %v7591_v59  ;;  %v7716_v35 = vld [vmem:[#allocation9 + $0x238] sm:$0xf0]  ;;  %v7715_v9 = vor.u32 %v9563_v57, %v7714_v56  ;;  %v7708_v59 = vld [vmem:[#allocation9 + $0x228] sm:$0xf0]  ;;  %v7738_v49 = vld [vmem:[#allocation9 + $0x260] sm:$0xf] }
 0x208   : > { %1723 = vst.msk [vmem:[#allocation3 + $0x8] sm:$0xfe] %vm989_vm13, %v1707_v60  ;;  %vm1682_vm4 = vcmp.ge.f32.partialorder %v1676_v10, 0.0  ;;  %v1688_v28 = vmul.f32 0.01, %v1676_v10  ;;  %2140 = vmatpush.bf16.msrb.mxu0 %v7735_v22 }
 0x209   : > { %v1679_v14 = vadd.f32 %v10915_v58, %v1667_v0  ;;  %v1608_v47 = vpop.f32.mrf.mxu2  ;;  %v1621_v44 = vpop.f32.mrf.mxu3  ;;  %v9568_v38 = vld [vmem:[#allocation9 + $0x264] sm:$0xf]  ;;  %v9554_v57 = vld [vmem:[#allocation9 + $0x1f4] sm:$0xf] }
 0x20a   : > { %v10942_v25 = vsel %vm1682_vm4, %v1676_v10, %v1688_v28  ;;  %v1622_v11 = vadd.f32 %v1621_v44, %v10911_v43  ;;  %v7730_v43 = vld [vmem:[#allocation9 + $0x250] sm:$0xf]  ;;  %v9571_v44 = vld [vmem:[#allocation9 + $0x274] sm:$0xf0] }
 0x20b   : > { %v1706_v27 = vrot.slane %v10942_v25, 7  ;;  %vm1685_vm5 = vcmp.ge.f32.partialorder %v1679_v14, 0.0  ;;  %v1691_v29 = vmul.f32 0.01, %v1679_v14  ;;  %v7731_v5 = vor.u32 %v9567_v32, %v7730_v43  ;;  %v9559_v43 = vld [vmem:[#allocation9 + $0x214] sm:$0xf0] }
 0x20c   : > { %v1666_v41 = vadd.f32 %v1622_v11, %v1402_v8  ;;  %v1660_v30 = vpop.f32.mrf.mxu1  ;;  %2141 = vmatpush.bf16.msrb.mxu0 %v7727_v34  ;;  %v9560_v11 = vld [vmem:[#allocation9 + $0x224] sm:$0xf]  ;;  %v9555_v34 = vld [vmem:[#allocation9 + $0x1f4] sm:$0xf0] }
 0x20d   : > { %1722 = vst [vmem:[#allocation3] sm:$0xfe] %v1706_v27  ;;  %v1697_v13 = vsel %vm1685_vm5, %v1679_v14, %v1691_v29  ;;  %v1661_v21 = vadd.f32 %v1660_v30, %v10913_v55  ;;  %2104 = vmatpush.bf16.msra.mxu2 %v7731_v5  ;;  %v7746_v14 = vld [vmem:[#allocation9 + $0x270] sm:$0xf]  ;;  %v7711_v12 = vor.u32 %v9560_v11, %v7708_v59  ;;  %v7806_v11 = vld [vmem:[#allocation9 + $0x380] sm:$0xf] }
 0x20e   : > { %v1710_v33 = vrot.slane %v1697_v13, 7  ;;  %v1678_v1 = vadd.f32 %v10917_v4, %v1666_v41  ;;  %v7747_v26 = vor.u32 %v9571_v44, %v7746_v14  ;;  %v7748_v13 = vld [vmem:[#allocation9 + $0x278] sm:$0xf0]  ;;  %v9604_v59 = vld [vmem:[#allocation9 + $0x384] sm:$0xf] }
 0x20f   : > { %v1669_v46 = vadd.f32 %v1661_v21, %v1441_v31  ;;  %v1760_v19 = vld [vmem:[#allocation3 + $0x8] sm:$0xfe]  ;;  %v9570_v31 = vld [vmem:[#allocation9 + $0x274] sm:$0xf] }
 0x210   : > { %v1711_v55 = vsel %vm971_vm10, %v1707_v60, %v1710_v33  ;;  %v1690_v51 = vmul.f32 0.01, %v1678_v1  ;;  %vm1684_vm7 = vcmp.ge.f32.partialorder %v1678_v1, 0.0  ;;  %v7719_v60 = vor.u32 %v9562_v18, %v7716_v35  ;;  %2128 = vmatpush.bf16.msrb.mxu3 %v7747_v26  ;;  %v7684_v18 = vld [vmem:[#allocation9 + $0x1f8] sm:$0xf0] }
 0x211   : > { %1725 = vst.msk [vmem:[#allocation3 + $0x18] sm:$0xff] %vm958_vm6, %v1711_v55  ;;  %v1681_v39 = vadd.f32 %v10915_v58, %v1669_v46  ;;  %v1624_v53 = vpop.f32.mrf.mxu3  ;;  %2105 = vmatpush.bf16.msra.mxu2 %v7723_v52  ;;  %v7751_v25 = vor.u32 %v9570_v31, %v7748_v13  ;;  %v9556_v46 = vld [vmem:[#allocation9 + $0x204] sm:$0xf]  ;;  %v7739_v52 = vor.u32 %v9569_v50, %v7738_v49  ;;  %v9605_v26 = vld [vmem:[#allocation9 + $0x384] sm:$0xf0] }
 0x212   : > { %v1625_v17 = vadd.f32 %v1624_v53, %v10925_v42  ;;  %v1696_v24 = vsel %vm1684_vm7, %v1678_v1, %v1690_v51  ;;  %2142 = vmatpush.bf16.msrb.mxu0 %v7719_v60  ;;  %v7690_v1 = vld [vmem:[#allocation9 + $0x200] sm:$0xf]  ;;  %v7695_v56 = vor.u32 %v9556_v46, %v7692_v48  ;;  %v7687_v60 = vor.u32 %v9554_v57, %v7684_v18  ;;  %v7798_v31 = vld [vmem:[#allocation9 + $0x370] sm:$0xf]  ;;  %v9603_v13 = vld [vmem:[#allocation9 + $0x374] sm:$0xf0] }
 0x213   : > { %vm1687_vm8 = vcmp.ge.f32.partialorder %v1681_v39, 0.0  ;;  %v1693_v16 = vmul.f32 0.01, %v1681_v39  ;;  %v1708_v6 = vrot.slane %v1696_v24, 7  ;;  %2164 = vmatpush.bf16.msrb.mxu1 %v7751_v25  ;;  %v7691_v51 = vor.u32 %v9557_v37, %v7690_v1  ;;  %v7800_v25 = vld [vmem:[#allocation9 + $0x378] sm:$0xf0] }
 0x214   : > { %v1668_v61 = vadd.f32 %v1625_v17, %v1405_v40  ;;  %v1662_v7 = vpop.f32.mrf.mxu1  ;;  %v1759_v8 = vld [vmem:[#allocation3] sm:$0xfe]  ;;  %v7682_v17 = vld [vmem:[#allocation9 + $0x1f0] sm:$0xf]  ;;  %2129 = vmatpush.bf16.msrb.mxu3 %v7739_v52  ;;  %v9601_v46 = vld [vmem:[#allocation9 + $0x364] sm:$0xf0] }
 0x215   : > { %v1699_v58 = vsel %vm1687_vm8, %v1681_v39, %v1693_v16  ;;  %2106 = vmatpush.bf16.msra.mxu2 %v7715_v9  ;;  %v10968_v45 = vsel %vm971_vm10, %v1706_v27, %v1708_v6  ;;  %v7698_v27 = vld [vmem:[#allocation9 + $0x210] sm:$0xf]  ;;  %v7740_v39 = vld [vmem:[#allocation9 + $0x268] sm:$0xf0]  ;;  %v7683_v9 = vor.u32 %v9555_v34, %v7682_v17  ;;  %v9600_v48 = vld [vmem:[#allocation9 + $0x364] sm:$0xf] }
 0x216   : > { %v1714_v10 = vrot.slane %v1699_v58, 7  ;;  %v1680_v15 = vadd.f32 %v10917_v4, %v1668_v61  ;;  %v9561_v4 = vld [vmem:[#allocation9 + $0x224] sm:$0xf0]  ;;  %v1763_v21 = vpack.c.bf16 %v10968_v45, %v1759_v8  ;;  %2143 = vmatpush.bf16.msrb.mxu0 %v7711_v12  ;;  %v7699_v32 = vor.u32 %v9559_v43, %v7698_v27  ;;  %v7816_v8 = vld [vmem:[#allocation9 + $0x398] sm:$0xf0] }
 0x217   : > { %v7707_v29 = vor.u32 %v9561_v4, %v7706_v3  ;;  %v7743_v40 = vor.u32 %v9568_v38, %v7740_v39  ;;  %v7814_v3 = vld [vmem:[#allocation9 + $0x390] sm:$0xf]  ;;  %v9607_v4 = vld [vmem:[#allocation9 + $0x394] sm:$0xf0]  ;;  %v7799_v43 = vor.u32 %v9603_v13, %v7798_v31  ;;  %v7832_v52 = vld [vmem:[#allocation9 + $0x3b8] sm:$0xf0] }
 0x218   : > { %v1715_v42 = vsel %vm971_vm10, %v1710_v33, %v1714_v10  ;;  %vm1686_vm9 = vcmp.ge.f32.partialorder %v1680_v15, 0.0  ;;  %v1692_v0 = vmul.f32 0.01, %v1680_v15  ;;  %v10961_v20 = vld [vmem:[#allocation3 + $0x18] sm:$0xff]  ;;  %v7700_v33 = vld [vmem:[#allocation9 + $0x218] sm:$0xf0] }
 0x219   : > { %1727 = vst.msk [vmem:[#allocation3 + $0x28] sm:$0x1f] %vm994_vm1, %v1715_v42  ;;  %v1626_v28 = vpop.f32.mrf.mxu3  ;;  %v1764_v36 = vpack.c.bf16 %v10961_v20, %v1760_v19  ;;  %2107 = vmatpush.bf16.msra.mxu2 %v7707_v29  ;;  %v7703_v63 = vor.u32 %v9558_v62, %v7700_v33  ;;  %v1791_v55 = vshll.u32 %v1763_v21, 16  ;;  %2165 = vmatpush.bf16.msrb.mxu1 %v7743_v40  ;;  %v1789_v10 = vshrl.u32 %v1763_v21, 16  ;;  %v9553_v42 = vld [vmem:[#allocation9 + $0x1e4] sm:$0xf0] }
 0x21a   : > { %v1698_v47 = vsel %vm1686_vm9, %v1680_v15, %v1692_v0  ;;  %v9552_v0 = vld [vmem:[#allocation9 + $0x1e4] sm:$0xf]  ;;  %v7676_v19 = vld [vmem:[#allocation9 + $0x1e8] sm:$0xf0]  ;;  %v9602_v21 = vld [vmem:[#allocation9 + $0x374] sm:$0xf] }
 0x21b   : > { %v1712_v23 = vrot.slane %v1698_v47, 7  ;;  %v1803_v2 = vshll.u32 %v1764_v36, 16  ;;  %v1801_v53 = vshrl.u32 %v1764_v36, 16  ;;  %2144 = vmatpush.bf16.msrb.mxu0 %v7703_v63  ;;  %v1793_v7 = vrot.slane %v1791_v55, 1  ;;  %v7830_v1 = vld [vmem:[#allocation9 + $0x3b0] sm:$0xf] }
 0x21c   : > { %v7679_v47 = vor.u32 %v9552_v0, %v7676_v19  ;;  %v7790_v63 = vld [vmem:[#allocation9 + $0x360] sm:$0xf]  ;;  %v7782_v38 = vld [vmem:[#allocation9 + $0x350] sm:$0xf]  ;;  %v9597_v57 = vld [vmem:[#allocation9 + $0x344] sm:$0xf0] }
 0x21d   : > { %v1713_v41 = vsel %vm971_vm10, %v1708_v6, %v1712_v23  ;;  %v1805_v30 = vrot.slane %v1803_v2, 1  ;;  %2108 = vmatpush.bf16.msra.mxu2 %v7699_v32  ;;  %v7674_v6 = vld [vmem:[#allocation9 + $0x1e0] sm:$0xf]  ;;  %v1794_v28 = vor.u32 %v1793_v7, %v1789_v10  ;;  %v9606_v23 = vld [vmem:[#allocation9 + $0x394] sm:$0xf]  ;;  %v7815_v2 = vor.u32 %v9607_v4, %v7814_v3 }
 0x21e   : > { %1726 = vst [vmem:[#allocation3 + $0x20] sm:$0x1f] %v1713_v41  ;;  %v7675_v14 = vor.u32 %v9553_v42, %v7674_v6  ;;  %v7819_v29 = vor.u32 %v9606_v23, %v7816_v8  ;;  %v7808_v41 = vld [vmem:[#allocation9 + $0x388] sm:$0xf0]  ;;  %v7803_v32 = vor.u32 %v9602_v21, %v7800_v25  ;;  %v7791_v49 = vor.u32 %v9601_v46, %v7790_v63  ;;  %v7774_v34 = vld [vmem:[#allocation9 + $0x340] sm:$0xf] }
 0x21f   : > { %v1806_v35 = vor.u32 %v1805_v30, %v1801_v53  ;;  %2145 = vmatpush.bf16.msrb.mxu0 %v7695_v56  ;;  %v7807_v30 = vor.u32 %v9605_v26, %v7806_v11  ;;  %v7811_v12 = vor.u32 %v9604_v59, %v7808_v41  ;;  %v9599_v53 = vld [vmem:[#allocation9 + $0x354] sm:$0xf0]  ;;  %v7784_v56 = vld [vmem:[#allocation9 + $0x358] sm:$0xf0]  ;;  %v9596_v18 = vld [vmem:[#allocation9 + $0x344] sm:$0xf] }
 0x220   : > { %v1762_v5 = vld [vmem:[#allocation3 + $0x28] sm:$0x1f]  ;;  %v7783_v40 = vor.u32 %v9599_v53, %v7782_v38  ;;  %v9608_v7 = vld [vmem:[#allocation9 + $0x3a4] sm:$0xf]  ;;  %v9595_v6 = vld [vmem:[#allocation9 + $0x334] sm:$0xf0] }
 0x221   : > { %v10972_v22 = vpack.c.bf16 %v1762_v5, %v1762_v5  ;;  %2109 = vmatpush.bf16.msra.mxu2 %v7691_v51  ;;  %v9611_v5 = vld [vmem:[#allocation9 + $0x3b4] sm:$0xf0]  ;;  %v9610_v51 = vld [vmem:[#allocation9 + $0x3b4] sm:$0xf]  ;;  %v7768_v0 = vld [vmem:[#allocation9 + $0x338] sm:$0xf0] }
 0x222   : > { %v7831_v37 = vor.u32 %v9611_v5, %v7830_v1  ;;  %v7835_v39 = vor.u32 %v9610_v51, %v7832_v52  ;;  %v9594_v42 = vld [vmem:[#allocation9 + $0x334] sm:$0xf]  ;;  %v1729_v19 = vld [vmem:[#allocation3 + $0x8] sm:$0xff]  ;;  %v9593_v3 = vld [vmem:[#allocation9 + $0x324] sm:$0xf0] }
 0x223   : > { %v1808_v54 = vshll.u32 %v10972_v22, 16  ;;  %2146 = vmatpush.bf16.msrb.mxu0 %v7687_v60  ;;  %v1815_v27 = vshrl.u32 %v10972_v22, 16  ;;  %v7792_v22 = vld [vmem:[#allocation9 + $0x368] sm:$0xf0]  ;;  %v9592_v4 = vld [vmem:[#allocation9 + $0x324] sm:$0xf] }
 0x224   : > { %v7795_v50 = vor.u32 %v9600_v48, %v7792_v22  ;;  %v7760_v23 = vld [vmem:[#allocation9 + $0x328] sm:$0xf0]  ;;  %v1733_v26 = vld [vmem:[#allocation3 + $0x28] sm:$0xf] }
 0x225   : > { %v1810_v16 = vrot.slane %v1808_v54, 1  ;;  %v1761_v24 = vld [vmem:[#allocation3 + $0x20] sm:$0x1f]  ;;  %2110 = vmatpush.bf16.msra.mxu2 %v7683_v9  ;;  %v7824_v9 = vld [vmem:[#allocation9 + $0x3a8] sm:$0xf0]  ;;  %v7763_v8 = vor.u32 %v9592_v4, %v7760_v23 }
 0x226   : > { %v10975_v61 = vpack.c.bf16 %v1761_v24, %v1761_v24  ;;  %v9598_v54 = vld [vmem:[#allocation9 + $0x354] sm:$0xf]  ;;  %v9609_v24 = vld [vmem:[#allocation9 + $0x3a4] sm:$0xf0]  ;;  %v7827_v10 = vor.u32 %v9608_v7, %v7824_v9  ;;  %v2177_v31 = vld [vmem:[#allocation3 + $0x8] sm:$0xfc] }
 0x227   : > { %v1811_v58 = vsel %vm1055_vm0, %v1806_v35, %v1810_v16  ;;  %2147 = vmatpush.bf16.msrb.mxu0 %v7679_v47  ;;  %v1817_v62 = vor.u32 %v1815_v27, %v1810_v16  ;;  %v7787_v17 = vor.u32 %v9598_v54, %v7784_v56  ;;  %v7776_v35 = vld [vmem:[#allocation9 + $0x348] sm:$0xf0]  ;;  %v7822_v16 = vld [vmem:[#allocation9 + $0x3a0] sm:$0xf]  ;;  %v1728_v47 = vld [vmem:[#allocation3] sm:$0xff]  ;;  %v2181_v13 = vpack.c.bf16 %v10961_v20, %v2177_v31 }
 0x228   : > { %7668 = vmatmul.msk.bf16.vlgmr.msra.gmra.mxu3 %vm958_vm6, %v1811_v58  ;;  %7670 = vmatmul.msk.bf16.vlgmr.msra.gmra.mxu1 %vm958_vm6, %v1811_v58  ;;  %v1796_v15 = vshll.u32 %v10975_v61, 16  ;;  %v1812_v33 = vshrl.u32 %v10975_v61, 16  ;;  %v7823_v61 = vor.u32 %v9609_v24, %v7822_v16  ;;  %v7775_v58 = vor.u32 %v9597_v57, %v7774_v34  ;;  %v1732_v59 = vld [vmem:[#allocation3 + $0x20] sm:$0xf]  ;;  %v7892_v4 = vld [vmem:[#allocation9 + $0x4c8] sm:$0xf0] }
 0x229   : > { %2111 = vmatpush.bf16.msra.mxu2 %v7675_v14  ;;  %2347 = vmatpush.bf16.msra.mxu3 %v7831_v37  ;;  %v7779_v60 = vor.u32 %v9596_v18, %v7776_v35  ;;  %v7771_v14 = vor.u32 %v9594_v42, %v7768_v0  ;;  %v1734_v11 = vpack.c.bf16 %v10968_v45, %v1728_v47  ;;  %v2178_v21 = vld [vmem:[#allocation3 + $0x20] sm:$0x3f]  ;;  %v7900_v0 = vld [vmem:[#allocation9 + $0x4d8] sm:$0xf0]  ;;  %v9645_v47 = vld [vmem:[#allocation9 + $0x4c4] sm:$0xf0] }
 0x22a   : > { %v1798_v36 = vrot.slane %v1796_v15, 1  ;;  %2383 = vmatpush.bf16.msra.mxu1 %v7835_v39  ;;  %v7766_v15 = vld [vmem:[#allocation9 + $0x330] sm:$0xf]  ;;  %v1736_v41 = vpack.c.bf16 %v1732_v59, %v1732_v59  ;;  %v2176_v27 = vld [vmem:[#allocation3] sm:$0xfc] }
 0x22b   : > { %v9643_v59 = vld [vmem:[#allocation9 + $0x4b4] sm:$0xf0]  ;;  %v7884_v31 = vld [vmem:[#allocation9 + $0x4b8] sm:$0xf0] }
 0x22c   : > { %v1799_v44 = vsel %vm1055_vm0, %v1794_v28, %v1798_v36  ;;  %v1814_v55 = vor.u32 %v1812_v33, %v1798_v36  ;;  %v1735_v28 = vpack.c.bf16 %v10961_v20, %v1729_v19  ;;  %v7767_v36 = vor.u32 %v9595_v6, %v7766_v15  ;;  %v9646_v15 = vld [vmem:[#allocation9 + $0x4d4] sm:$0xf] }
 0x22d   : > { %1934 = vmatmul.bf16.vlgmr.msrb.gmra.mxu2 %v1799_v44  ;;  %1970 = vmatmul.bf16.vlgmr.msra.gmra.mxu0 %v1799_v44  ;;  %v7758_v44 = vld [vmem:[#allocation9 + $0x320] sm:$0xf]  ;;  %v7903_v19 = vor.u32 %v9646_v15, %v7900_v0  ;;  %v9639_v15 = vld [vmem:[#allocation9 + $0x494] sm:$0xf0] }
 0x22e   : > { %2323 = vmatpush.bf16.msrb.mxu2 %v7815_v2  ;;  %2359 = vmatpush.bf16.msra.mxu0 %v7819_v29  ;;  %v7759_v2 = vor.u32 %v9593_v3, %v7758_v44  ;;  %v1737_v29 = vpack.c.bf16 %v1733_v26, %v1733_v26  ;;  %v9644_v44 = vld [vmem:[#allocation9 + $0x4c4] sm:$0xf] }
 0x22f   : > { %2348 = vmatpush.bf16.msra.mxu3 %v7823_v61  ;;  %2384 = vmatpush.bf16.msra.mxu1 %v7827_v10  ;;  %v9647_v10 = vld [vmem:[#allocation9 + $0x4d4] sm:$0xf0] }
 0x232   : > { %2324 = vmatpush.bf16.msrb.mxu2 %v7807_v30  ;;  %2360 = vmatpush.bf16.msra.mxu0 %v7811_v12  ;;  %v2179_v30 = vld [vmem:[#allocation3 + $0x28] sm:$0x3f] }
 0x233   : > { %v2183_v12 = vpack.c.bf16 %v2179_v30, %v2179_v30 }
 0x235   : > { %v2213_v25 = vrot.slane %v2183_v12, 1 }
 0x236   : > { %2325 = vmatpush.bf16.msrb.mxu2 %v7799_v43  ;;  %2361 = vmatpush.bf16.msra.mxu0 %v7803_v32  ;;  %v2182_v43 = vpack.c.bf16 %v2178_v21, %v2178_v21  ;;  %v2212_v32 = vrot.slane %v2181_v13, 1 }
 0x238   : > { %7669 = vmatmul.msk.bf16.gmra.mxu3 %vm958_vm6, %v1817_v62  ;;  %7671 = vmatmul.msk.bf16.gmra.mxu1 %vm958_vm6, %v1817_v62  ;;  %v2180_v62 = vpack.c.bf16 %v10968_v45, %v2176_v27  ;;  %v2214_v33 = vsel %vm1477_vm2, %v2212_v32, %v2213_v25  ;;  %v2210_v1 = vrot.slane %v2182_v43, 1 }
 0x23a   : > { %2326 = vmatpush.bf16.msrb.mxu2 %v7791_v49  ;;  %2362 = vmatpush.bf16.msra.mxu0 %v7795_v50  ;;  %v2209_v5 = vrot.slane %v2180_v62, 1 }
 0x23c   : > { %v2211_v63 = vsel %vm1477_vm2, %v2209_v5, %v2210_v1  ;;  %v9640_v5 = vld [vmem:[#allocation9 + $0x4a4] sm:$0xf] }
 0x23d   : > { %1939 = vmatmul.bf16.gmra.mxu2 %v1814_v55  ;;  %1975 = vmatmul.bf16.gmra.mxu0 %v1814_v55 }
 0x23e   : > { %2327 = vmatpush.bf16.msrb.mxu2 %v7783_v40  ;;  %2363 = vmatpush.bf16.msra.mxu0 %v7787_v17 }
 0x242   : > { %2328 = vmatpush.bf16.msrb.mxu2 %v7775_v58  ;;  %2364 = vmatpush.bf16.msra.mxu0 %v7779_v60  ;;  %v7898_v60 = vld [vmem:[#allocation9 + $0x4d0] sm:$0xf] }
 0x243   : > { %v7899_v42 = vor.u32 %v9647_v10, %v7898_v60  ;;  %v7916_v60 = vld [vmem:[#allocation9 + $0x4f8] sm:$0xf0]  ;;  %v7866_v10 = vld [vmem:[#allocation9 + $0x490] sm:$0xf] }
 0x246   : > { %2329 = vmatpush.bf16.msrb.mxu2 %v7767_v36  ;;  %2365 = vmatpush.bf16.msra.mxu0 %v7771_v14  ;;  %v7890_v14 = vld [vmem:[#allocation9 + $0x4c0] sm:$0xf] }
 0x247   : > { %v7891_v3 = vor.u32 %v9645_v47, %v7890_v14  ;;  %v9637_v47 = vld [vmem:[#allocation9 + $0x484] sm:$0xf0] }
 0x248   : > { %7752 = vmatmul.msk.bf16.vlgmr.msrb.gmra.mxu3 %vm958_vm6, %v1735_v28  ;;  %7754 = vmatmul.msk.bf16.vlgmr.msrb.gmra.mxu1 %vm958_vm6, %v1735_v28 }
 0x24a   : > { %2330 = vmatpush.bf16.msrb.mxu2 %v7759_v2  ;;  %2366 = vmatpush.bf16.msra.mxu0 %v7763_v8  ;;  %v7895_v8 = vor.u32 %v9644_v44, %v7892_v4  ;;  %v7860_v44 = vld [vmem:[#allocation9 + $0x488] sm:$0xf0] }
 0x24d   : > { %2112 = vmatmul.bf16.vlgmr.msra.gmra.mxu2 %v1734_v11  ;;  %2148 = vmatmul.bf16.vlgmr.msrb.gmra.mxu0 %v1734_v11  ;;  %v2402_v11 = vld [vmem:[#allocation10 + $0x2] sm:$0x3] }
 0x24e   : > { %2658 = vmatpush.bf16.msra.mxu2 %v7899_v42  ;;  %2694 = vmatpush.bf16.msrb.mxu0 %v7903_v19  ;;  %v11032_v27 = vperm.slane %v2402_v11, 1  ;;  %v7858_v19 = vld [vmem:[#allocation9 + $0x480] sm:$0xf] }
 0x252   : > { %2659 = vmatpush.bf16.msra.mxu2 %v7891_v3  ;;  %2695 = vmatpush.bf16.msrb.mxu0 %v7895_v8 }
 0x258   : > { %7753 = vmatmul.msk.bf16.gmra.mxu3 %vm958_vm6, %v1737_v29  ;;  %7755 = vmatmul.msk.bf16.gmra.mxu1 %vm958_vm6, %v1737_v29  ;;  %v7882_v29 = vld [vmem:[#allocation9 + $0x4b0] sm:$0xf] }
 0x259   : > { %v7883_v12 = vor.u32 %v9643_v59, %v7882_v29 }
 0x25b   : > { %2660 = vmatpush.bf16.msra.mxu2 %v7883_v12  ;;  %v7908_v12 = vld [vmem:[#allocation9 + $0x4e8] sm:$0xf0] }
 0x25d   : > { %2117 = vmatmul.bf16.gmra.mxu2 %v1736_v41  ;;  %2153 = vmatmul.bf16.gmra.mxu0 %v1736_v41  ;;  %v9642_v41 = vld [vmem:[#allocation9 + $0x4b4] sm:$0xf] }
 0x25e   : > { %v7887_v13 = vor.u32 %v9642_v41, %v7884_v31  ;;  %v9649_v41 = vld [vmem:[#allocation9 + $0x4e4] sm:$0xf0] }
 0x260   : > { %2696 = vmatpush.bf16.msrb.mxu0 %v7887_v13 }
 0x268   : > { %7836 = vmatmul.msk.bf16.vlgmr.msra.gmra.mxu3 %vm958_vm6, %v2214_v33  ;;  %7838 = vmatmul.msk.bf16.vlgmr.msra.gmra.mxu1 %vm958_vm6, %v2214_v33  ;;  %v7874_v33 = vld [vmem:[#allocation9 + $0x4a0] sm:$0xf] }
 0x26d   : > { %2331 = vmatmul.bf16.vlgmr.msrb.gmra.mxu2 %v2211_v63  ;;  %2367 = vmatmul.bf16.vlgmr.msra.gmra.mxu0 %v2211_v63 }
 0x278   : > { %7837 = vmatmul.msk.bf16.gmra.mxu3 %vm958_vm6, %v2213_v25  ;;  %7839 = vmatmul.msk.bf16.gmra.mxu1 %vm958_vm6, %v2213_v25 }
 0x27d   : > { %2336 = vmatmul.bf16.gmra.mxu2 %v2210_v1  ;;  %2372 = vmatmul.bf16.gmra.mxu0 %v2210_v1  ;;  %v9641_v1 = vld [vmem:[#allocation9 + $0x4a4] sm:$0xf0] }
 0x2a5   : > { %v1989_v20 = vpop.f32.mrf.mxu1 }
 0x2aa   : > { %v1971_v45 = vpop.f32.mrf.mxu0 }
 0x2ab   : > { %v1953_v37 = vpop.f32.mrf.mxu3  ;;  %v1990_v23 = vadd.f32 %v1989_v20, %v1971_v45  ;;  %v7875_v45 = vor.u32 %v9641_v1, %v7874_v33  ;;  %v9634_v33 = vld [vmem:[#allocation9 + $0x474] sm:$0xf]  ;;  %v7852_v1 = vld [vmem:[#allocation9 + $0x478] sm:$0xf0] }
 0x2ad   : > { %v11000_v46 = vpop.f32.mrf.mxu1  ;;  %2661 = vmatpush.bf16.msra.mxu2 %v7875_v45 }
 0x2b0   : > { %v1935_v48 = vpop.f32.mrf.mxu2 }
 0x2b1   : > { %v1954_v21 = vadd.f32 %v1953_v37, %v1935_v48  ;;  %v7914_v37 = vld [vmem:[#allocation9 + $0x4f0] sm:$0xf]  ;;  %v9651_v48 = vld [vmem:[#allocation9 + $0x4f4] sm:$0xf0] }
 0x2b2   : > { %v11002_v22 = vpop.f32.mrf.mxu0 }
 0x2b3   : > { %v11004_v49 = vpop.f32.mrf.mxu3  ;;  %v1992_v63 = vadd.f32 %v11000_v46, %v11002_v22  ;;  %v7867_v46 = vor.u32 %v9639_v15, %v7866_v10  ;;  %v9638_v22 = vld [vmem:[#allocation9 + $0x494] sm:$0xf] }
 0x2b5   : > { %v11006_v50 = vpop.f32.mrf.mxu1  ;;  %2662 = vmatpush.bf16.msra.mxu2 %v7867_v46 }
 0x2b8   : > { %v11008_v55 = vpop.f32.mrf.mxu2 }
 0x2b9   : > { %v1956_v8 = vadd.f32 %v11004_v49, %v11008_v55 }
 0x2ba   : > { %v11010_v51 = vpop.f32.mrf.mxu0 }
 0x2bb   : > { %v11012_v52 = vpop.f32.mrf.mxu3  ;;  %v1995_v49 = vadd.f32 %v11006_v50, %v11010_v51 }
 0x2bd   : > { %v1996_v38 = vpop.f32.mrf.mxu1 }
 0x2be   : > { %v7876_v38 = vld [vmem:[#allocation9 + $0x4a8] sm:$0xf0] }
 0x2c0   : > { %v11014_v39 = vpop.f32.mrf.mxu2 }
 0x2c2   : > { %v1978_v53 = vpop.f32.mrf.mxu0 }
 0x2c3   : > { %v1960_v54 = vpop.f32.mrf.mxu3 }
 0x2c5   : > { %v2167_v56 = vpop.f32.mrf.mxu1 }
 0x2c8   : > { %v1942_v40 = vpop.f32.mrf.mxu2 }
 0x2c9   : > { %v7879_v40 = vor.u32 %v9640_v5, %v7876_v38 }
 0x2ca   : > { %v2149_v17 = vpop.f32.mrf.mxu0 }
 0x2cb   : > { %v11016_v34 = vpop.f32.mrf.mxu3  ;;  %v2150_v26 = vadd.f32 %v2149_v17, %v1990_v23  ;;  %v9650_v17 = vld [vmem:[#allocation9 + $0x4f4] sm:$0xf]  ;;  %2697 = vmatpush.bf16.msrb.mxu0 %v7879_v40  ;;  %v11038_v23 = vperm.slane %v2402_v11, 0  ;;  %v9632_v40 = vld [vmem:[#allocation9 + $0x464] sm:$0xf] }
 0x2cc   : > { %v7919_v0 = vor.u32 %v9650_v17, %v7916_v60  ;;  %v7844_v17 = vld [vmem:[#allocation9 + $0x468] sm:$0xf0]  ;;  %v1959_v60 = vadd.f32 %v11012_v52, %v11014_v39 }
 0x2cd   : > { %v11018_v57 = vpop.f32.mrf.mxu1  ;;  %v2168_v43 = vadd.f32 %v2167_v56, %v2150_v26  ;;  %v7915_v56 = vor.u32 %v9651_v48, %v7914_v37 }
 0x2ce   : > { %2718 = vmatpush.bf16.msrb.mxu1 %v7919_v0 }
 0x2cf   : > { %2682 = vmatpush.bf16.msrb.mxu3 %v7915_v56 }
 0x2d0   : > { %v2113_v18 = vpop.f32.mrf.mxu2 }
 0x2d1   : > { %v2114_v20 = vadd.f32 %v2113_v18, %v1954_v21  ;;  %v7868_v18 = vld [vmem:[#allocation9 + $0x498] sm:$0xf0] }
 0x2d2   : > { %v2151_v35 = vpop.f32.mrf.mxu0  ;;  %v7871_v14 = vor.u32 %v9638_v22, %v7868_v18 }
 0x2d3   : > { %v11020_v16 = vpop.f32.mrf.mxu3 }
 0x2d4   : > { %2698 = vmatpush.bf16.msrb.mxu0 %v7871_v14  ;;  %v7982_v14 = vld [vmem:[#allocation9 + $0x430] sm:$0xf] }
 0x2d5   : > { %v11022_v24 = vpop.f32.mrf.mxu1 }
 0x2d8   : > { %v11024_v61 = vpop.f32.mrf.mxu2 }
 0x2d9   : > { %v2116_v55 = vadd.f32 %v11024_v61, %v1956_v8  ;;  %v7855_v61 = vor.u32 %v9634_v33, %v7852_v1  ;;  %v9625_v8 = vld [vmem:[#allocation9 + $0x424] sm:$0xf0] }
 0x2da   : > { %v11026_v7 = vpop.f32.mrf.mxu0 }
 0x2db   : > { %v11028_v9 = vpop.f32.mrf.mxu3  ;;  %v2155_v45 = vadd.f32 %v11026_v7, %v1995_v49  ;;  %v2134_v37 = vadd.f32 %v11020_v16, %v2116_v55  ;;  %v7968_v55 = vld [vmem:[#allocation9 + $0x418] sm:$0xf0] }
 0x2dd   : > { %v2174_v58 = vpop.f32.mrf.mxu1  ;;  %v2173_v10 = vadd.f32 %v11022_v24, %v2155_v45  ;;  %v9627_v24 = vld [vmem:[#allocation9 + $0x434] sm:$0xf0] }
 0x2de   : > { %v2152_v58 = vadd.f32 %v2151_v35, %v1992_v63  ;;  %v9636_v35 = vld [vmem:[#allocation9 + $0x484] sm:$0xf] }
 0x2df   : > { %v7863_v59 = vor.u32 %v9636_v35, %v7860_v44  ;;  %v9626_v35 = vld [vmem:[#allocation9 + $0x434] sm:$0xf] }
 0x2e0   : > { %v11030_v6 = vpop.f32.mrf.mxu2  ;;  %v2170_v26 = vadd.f32 %v11018_v57, %v2152_v58 }
 0x2e1   : > { %2699 = vmatpush.bf16.msrb.mxu0 %v7863_v59 }
 0x2e2   : > { %v2156_v28 = vpop.f32.mrf.mxu0 }
 0x2e3   : > { %v2138_v36 = vpop.f32.mrf.mxu3  ;;  %v2132_v28 = vadd.f32 %v11016_v34, %v2114_v20  ;;  %v7859_v34 = vor.u32 %v9637_v47, %v7858_v19  ;;  %v7847_v19 = vor.u32 %v9632_v40, %v7844_v17  ;;  %v7958_v17 = vld [vmem:[#allocation9 + $0x400] sm:$0xf] }
 0x2e5   : > { %v2386_v2 = vpop.f32.mrf.mxu1  ;;  %2663 = vmatpush.bf16.msra.mxu2 %v7859_v34  ;;  %2700 = vmatpush.bf16.msrb.mxu0 %v7855_v61  ;;  %v9624_v34 = vld [vmem:[#allocation9 + $0x424] sm:$0xf]  ;;  %v9631_v61 = vld [vmem:[#allocation9 + $0x454] sm:$0xf0] }
 0x2e8   : > { %v2120_v30 = vpop.f32.mrf.mxu2 }
 0x2e9   : > { %v9648_v30 = vld [vmem:[#allocation9 + $0x4e4] sm:$0xf]  ;;  %2701 = vmatpush.bf16.msrb.mxu0 %v7847_v19  ;;  %v8000_v19 = vld [vmem:[#allocation9 + $0x458] sm:$0xf0] }
 0x2ea   : > { %v2368_v25 = vpop.f32.mrf.mxu0 }
 0x2eb   : > { %v2350_v32 = vpop.f32.mrf.mxu3  ;;  %v2387_v62 = vadd.f32 %v2386_v2, %v2368_v25  ;;  %v7906_v2 = vld [vmem:[#allocation9 + $0x4e0] sm:$0xf] }
 0x2ec   : > { %v7907_v11 = vor.u32 %v9649_v41, %v7906_v2  ;;  %v7974_v2 = vld [vmem:[#allocation9 + $0x420] sm:$0xf] }
 0x2ed   : > { %v2396_v53 = vadd.f32 %v2387_v62, %v2168_v43  ;;  %v2388_v54 = vpop.f32.mrf.mxu1  ;;  %v7850_v43 = vld [vmem:[#allocation9 + $0x470] sm:$0xf]  ;;  %v7911_v62 = vor.u32 %v9648_v30, %v7908_v12  ;;  %v7975_v30 = vor.u32 %v9625_v8, %v7974_v2  ;;  %v7976_v12 = vld [vmem:[#allocation9 + $0x428] sm:$0xf0]  ;;  %v9616_v2 = vld [vmem:[#allocation9 + $0x3e4] sm:$0xf] }
 0x2ee   : > { %2683 = vmatpush.bf16.msrb.mxu3 %v7907_v11  ;;  %v9623_v11 = vld [vmem:[#allocation9 + $0x414] sm:$0xf0]  ;;  %v7979_v49 = vor.u32 %v9624_v34, %v7976_v12  ;;  %v7944_v8 = vld [vmem:[#allocation9 + $0x3e8] sm:$0xf0]  ;;  %v9628_v34 = vld [vmem:[#allocation9 + $0x444] sm:$0xf] }
 0x2ef   : > { %v2409_v42 = vadd.f32 %v11032_v27, %v2396_v53  ;;  %2719 = vmatpush.bf16.msrb.mxu1 %v7911_v62  ;;  %v7842_v53 = vld [vmem:[#allocation9 + $0x460] sm:$0xf] }
 0x2f0   : > { %v2332_v36 = vpop.f32.mrf.mxu2 }
 0x2f1   : > { %vm2415_vm11 = vcmp.ge.f32.partialorder %v2409_v42, 0.0  ;;  %v2421_v3 = vmul.f32 0.01, %v2409_v42  ;;  %v2351_v4 = vadd.f32 %v2350_v32, %v2332_v36  ;;  %v9635_v32 = vld [vmem:[#allocation9 + $0x474] sm:$0xf0] }
 0x2f2   : > { %v2370_v29 = vpop.f32.mrf.mxu0  ;;  %v7851_v38 = vor.u32 %v9635_v32, %v7850_v43 }
 0x2f3   : > { %v2427_v31 = vsel %vm2415_vm11, %v2409_v42, %v2421_v3  ;;  %v2395_v13 = vadd.f32 %v2351_v4, %v2132_v28  ;;  %v2352_v21 = vpop.f32.mrf.mxu3  ;;  %v2389_v25 = vadd.f32 %v2388_v54, %v2370_v29  ;;  %v9633_v54 = vld [vmem:[#allocation9 + $0x464] sm:$0xf0]  ;;  %v2119_v28 = vadd.f32 %v11030_v6, %v1959_v60  ;;  %v7984_v4 = vld [vmem:[#allocation9 + $0x438] sm:$0xf0] }
 0x2f4   : > { %v2439_v57 = vrot.slane %v2427_v31, 7  ;;  %2664 = vmatpush.bf16.msra.mxu2 %v7851_v38  ;;  %v7843_v0 = vor.u32 %v9633_v54, %v7842_v53  ;;  %v7983_v3 = vor.u32 %v9627_v24, %v7982_v14  ;;  %v7987_v29 = vor.u32 %v9626_v35, %v7984_v4  ;;  %v7966_v31 = vld [vmem:[#allocation9 + $0x410] sm:$0xf]  ;;  %v9619_v14 = vld [vmem:[#allocation9 + $0x3f4] sm:$0xf0] }
 0x2f5   : > { %v2408_v5 = vadd.f32 %v11038_v23, %v2395_v13  ;;  %v2398_v63 = vadd.f32 %v2389_v25, %v2170_v26  ;;  %v2391_v20 = vpop.f32.mrf.mxu1  ;;  %v2137_v59 = vadd.f32 %v11028_v9, %v2119_v28  ;;  %v7950_v28 = vld [vmem:[#allocation9 + $0x3f0] sm:$0xf]  ;;  %v7952_v24 = vld [vmem:[#allocation9 + $0x3f8] sm:$0xf0]  ;;  %v7942_v35 = vld [vmem:[#allocation9 + $0x3e0] sm:$0xf] }
 0x2f6   : > { %2455 = vst.msk [vmem:[#allocation3 + $0x8] sm:$0xfe] %vm989_vm13, %v2439_v57  ;;  %2872 = vmatpush.bf16.msra.mxu0 %v7987_v29  ;;  %v9617_v4 = vld [vmem:[#allocation9 + $0x3e4] sm:$0xf0] }
 0x2f7   : > { %vm2414_vm12 = vcmp.ge.f32.partialorder %v2408_v5, 0.0  ;;  %v2420_v50 = vmul.f32 0.01, %v2408_v5  ;;  %v2411_v51 = vadd.f32 %v11032_v27, %v2398_v63  ;;  %v7967_v63 = vor.u32 %v9623_v11, %v7966_v31  ;;  %v9629_v29 = vld [vmem:[#allocation9 + $0x444] sm:$0xf0] }
 0x2f8   : > { %v2334_v48 = vpop.f32.mrf.mxu2  ;;  %2665 = vmatpush.bf16.msra.mxu2 %v7843_v0  ;;  %v7992_v31 = vld [vmem:[#allocation9 + $0x448] sm:$0xf0]  ;;  %v9614_v11 = vld [vmem:[#allocation9 + $0x3d4] sm:$0xf] }
 0x2f9   : > { %v2426_v58 = vsel %vm2414_vm12, %v2408_v5, %v2420_v50  ;;  %vm2417_vm14 = vcmp.ge.f32.partialorder %v2411_v51, 0.0  ;;  %v2423_v7 = vmul.f32 0.01, %v2411_v51  ;;  %v2353_v56 = vadd.f32 %v2352_v21, %v2334_v48 }
 0x2fa   : > { %v2438_v15 = vrot.slane %v2426_v58, 7  ;;  %v2373_v42 = vpop.f32.mrf.mxu0  ;;  %2873 = vmatpush.bf16.msra.mxu0 %v7979_v49  ;;  %v9621_v58 = vld [vmem:[#allocation9 + $0x404] sm:$0xf0] }
 0x2fb   : > { %v2429_v46 = vsel %vm2417_vm14, %v2411_v51, %v2423_v7  ;;  %v2397_v22 = vadd.f32 %v2353_v56, %v2134_v37  ;;  %v2355_v18 = vpop.f32.mrf.mxu3  ;;  %v2392_v16 = vadd.f32 %v2391_v20, %v2373_v42  ;;  %v7998_v51 = vld [vmem:[#allocation9 + $0x450] sm:$0xf]  ;;  %v7959_v60 = vor.u32 %v9621_v58, %v7958_v17  ;;  %v9667_v17 = vld [vmem:[#allocation9 + $0x574] sm:$0xf0]  ;;  %v9666_v58 = vld [vmem:[#allocation9 + $0x574] sm:$0xf] }
 0x2fc   : > { %2454 = vst [vmem:[#allocation3] sm:$0xfe] %v2438_v15  ;;  %v2442_v36 = vrot.slane %v2429_v46, 7  ;;  %2836 = vmatpush.bf16.msrb.mxu2 %v7983_v3 }
 0x2fd   : > { %v2410_v47 = vadd.f32 %v11038_v23, %v2397_v22  ;;  %v2400_v52 = vadd.f32 %v2392_v16, %v2173_v10  ;;  %v2393_v39 = vpop.f32.mrf.mxu1  ;;  %v2492_v45 = vld [vmem:[#allocation3 + $0x8] sm:$0xfe]  ;;  %v9630_v16 = vld [vmem:[#allocation9 + $0x454] sm:$0xf] }
 0x2fe   : > { %v2443_v44 = vsel %vm971_vm10, %v2439_v57, %v2442_v36  ;;  %v9620_v10 = vld [vmem:[#allocation9 + $0x404] sm:$0xf]  ;;  %v7951_v39 = vor.u32 %v9619_v14, %v7950_v28 }
 0x2ff   : > { %2457 = vst.msk [vmem:[#allocation3 + $0x18] sm:$0xff] %vm958_vm6, %v2443_v44  ;;  %vm2416_vm15 = vcmp.ge.f32.partialorder %v2410_v47, 0.0  ;;  %v2422_v6 = vmul.f32 0.01, %v2410_v47  ;;  %v2413_v26 = vadd.f32 %v11032_v27, %v2400_v52  ;;  %v9622_v27 = vld [vmem:[#allocation9 + $0x414] sm:$0xf] }
 0x300   : > { %v2337_v41 = vpop.f32.mrf.mxu2  ;;  %2837 = vmatpush.bf16.msrb.mxu2 %v7975_v30  ;;  %v7971_v38 = vor.u32 %v9622_v27, %v7968_v55  ;;  %v7947_v30 = vor.u32 %v9616_v2, %v7944_v8  ;;  %v8044_v2 = vld [vmem:[#allocation9 + $0x548] sm:$0xf0] }
 0x301   : > { %v2428_v13 = vsel %vm2416_vm15, %v2410_v47, %v2422_v6  ;;  %vm2419_vm3 = vcmp.ge.f32.partialorder %v2413_v26, 0.0  ;;  %v2425_v21 = vmul.f32 0.01, %v2413_v26  ;;  %v2356_v25 = vadd.f32 %v2355_v18, %v2337_v41  ;;  %v9618_v47 = vld [vmem:[#allocation9 + $0x3f4] sm:$0xf] }
 0x302   : > { %v2440_v43 = vrot.slane %v2428_v13, 7  ;;  %v2375_v32 = vpop.f32.mrf.mxu0  ;;  %2874 = vmatpush.bf16.msra.mxu0 %v7971_v38  ;;  %v7955_v3 = vor.u32 %v9618_v47, %v7952_v24  ;;  %v7943_v6 = vor.u32 %v9617_v4, %v7942_v35  ;;  %v7934_v13 = vld [vmem:[#allocation9 + $0x3d0] sm:$0xf]  ;;  %v8042_v24 = vld [vmem:[#allocation9 + $0x540] sm:$0xf] }
 0x303   : > { %v2431_v57 = vsel %vm2419_vm3, %v2413_v26, %v2425_v21  ;;  %v2399_v62 = vadd.f32 %v2356_v25, %v2137_v59  ;;  %v2357_v33 = vpop.f32.mrf.mxu3  ;;  %v2491_v5 = vld [vmem:[#allocation3] sm:$0xfe]  ;;  %v7990_v26 = vld [vmem:[#allocation9 + $0x440] sm:$0xf]  ;;  %v7995_v21 = vor.u32 %v9628_v34, %v7992_v31  ;;  %v9660_v4 = vld [vmem:[#allocation9 + $0x544] sm:$0xf] }
 0x304   : > { %v11061_v9 = vsel %vm971_vm10, %v2438_v15, %v2440_v43  ;;  %v2446_v1 = vrot.slane %v2431_v57, 7  ;;  %2838 = vmatpush.bf16.msrb.mxu2 %v7967_v63  ;;  %v7960_v15 = vld [vmem:[#allocation9 + $0x408] sm:$0xf0]  ;;  %v7991_v12 = vor.u32 %v9629_v29, %v7990_v26  ;;  %v9615_v25 = vld [vmem:[#allocation9 + $0x3d4] sm:$0xf0] }
 0x305   : > { %v2412_v20 = vadd.f32 %v11038_v23, %v2399_v62  ;;  %v11070_v48 = vpack.c.bf16 %v11061_v9, %v2491_v5  ;;  %v7999_v23 = vor.u32 %v9631_v61, %v7998_v51  ;;  %v7963_v0 = vor.u32 %v9620_v10, %v7960_v15  ;;  %v7926_v5 = vld [vmem:[#allocation9 + $0x3c0] sm:$0xf]  ;;  %v9613_v63 = vld [vmem:[#allocation9 + $0x3c4] sm:$0xf0]  ;;  %v9664_v15 = vld [vmem:[#allocation9 + $0x564] sm:$0xf] }
 0x306   : > { %v2447_v53 = vsel %vm971_vm10, %v2442_v36, %v2446_v1  ;;  %v11065_v50 = vld [vmem:[#allocation3 + $0x18] sm:$0xff]  ;;  %v8003_v36 = vor.u32 %v9630_v16, %v8000_v19  ;;  %v7935_v55 = vor.u32 %v9615_v25, %v7934_v13  ;;  %v8052_v19 = vld [vmem:[#allocation9 + $0x558] sm:$0xf0]  ;;  %v8026_v25 = vld [vmem:[#allocation9 + $0x520] sm:$0xf] }
 0x307   : > { %2459 = vst.msk [vmem:[#allocation3 + $0x28] sm:$0x1f] %vm994_vm1, %v2447_v53  ;;  %vm2418_vm4 = vcmp.ge.f32.partialorder %v2412_v20, 0.0  ;;  %v2424_v54 = vmul.f32 0.01, %v2412_v20  ;;  %v2496_v37 = vpack.c.bf16 %v11065_v50, %v2492_v45  ;;  %2860 = vmatpush.bf16.msra.mxu3 %v7999_v23  ;;  %v2523_v22 = vshll.u32 %v11070_v48, 16  ;;  %2875 = vmatpush.bf16.msra.mxu0 %v7963_v0 }
 0x308   : > { %v2339_v40 = vpop.f32.mrf.mxu2  ;;  %2839 = vmatpush.bf16.msrb.mxu2 %v7959_v60  ;;  %2896 = vmatpush.bf16.msra.mxu1 %v8003_v36  ;;  %v2521_v45 = vshrl.u32 %v11070_v48, 16  ;;  %v7928_v53 = vld [vmem:[#allocation9 + $0x3c8] sm:$0xf0]  ;;  %v8066_v23 = vld [vmem:[#allocation9 + $0x570] sm:$0xf] }
 0x309   : > { %v2430_v7 = vsel %vm2418_vm4, %v2412_v20, %v2424_v54  ;;  %v2535_v56 = vshll.u32 %v2496_v37, 16  ;;  %v2533_v59 = vshrl.u32 %v2496_v37, 16  ;;  %v2525_v33 = vrot.slane %v2523_v22, 1  ;;  %v9612_v20 = vld [vmem:[#allocation9 + $0x3c4] sm:$0xf] }
 0x30a   : > { %v2444_v42 = vrot.slane %v2430_v7, 7  ;;  %v7927_v54 = vor.u32 %v9613_v63, %v7926_v5  ;;  %v7931_v37 = vor.u32 %v9612_v20, %v7928_v53  ;;  %v8067_v7 = vor.u32 %v9667_v17, %v8066_v23  ;;  %v8068_v48 = vld [vmem:[#allocation9 + $0x578] sm:$0xf0]  ;;  %v9665_v60 = vld [vmem:[#allocation9 + $0x564] sm:$0xf0] }
 0x30b   : > { %v2537_v46 = vrot.slane %v2535_v56, 1  ;;  %2876 = vmatpush.bf16.msra.mxu0 %v7955_v3  ;;  %2861 = vmatpush.bf16.msra.mxu3 %v7991_v12  ;;  %v2526_v51 = vor.u32 %v2525_v33, %v2521_v45  ;;  %v8058_v56 = vld [vmem:[#allocation9 + $0x560] sm:$0xf]  ;;  %v8071_v10 = vor.u32 %v9666_v58, %v8068_v48  ;;  %v8050_v22 = vld [vmem:[#allocation9 + $0x550] sm:$0xf]  ;;  %v2460_v17 = vld [vmem:[#allocation3] sm:$0xff] }
 0x30c   : > { %v2445_v18 = vsel %vm971_vm10, %v2440_v43, %v2444_v42  ;;  %2840 = vmatpush.bf16.msrb.mxu2 %v7951_v39  ;;  %v7936_v43 = vld [vmem:[#allocation9 + $0x3d8] sm:$0xf0]  ;;  %2897 = vmatpush.bf16.msra.mxu1 %v7995_v21  ;;  %v8060_v42 = vld [vmem:[#allocation9 + $0x568] sm:$0xf0]  ;;  %v8059_v0 = vor.u32 %v9665_v60, %v8058_v56  ;;  %v9662_v16 = vld [vmem:[#allocation9 + $0x554] sm:$0xf]  ;;  %v2466_v56 = vpack.c.bf16 %v11061_v9, %v2460_v17 }
 0x30d   : > { %2458 = vst [vmem:[#allocation3 + $0x20] sm:$0x1f] %v2445_v18  ;;  %v2538_v32 = vor.u32 %v2537_v46, %v2533_v59  ;;  %v7939_v1 = vor.u32 %v9614_v11, %v7936_v43  ;;  %v8063_v46 = vor.u32 %v9664_v15, %v8060_v42  ;;  %v9663_v18 = vld [vmem:[#allocation9 + $0x554] sm:$0xf0]  ;;  %v8055_v47 = vor.u32 %v9662_v16, %v8052_v19  ;;  %v9661_v3 = vld [vmem:[#allocation9 + $0x544] sm:$0xf0] }
 0x30e   : > { %v2494_v52 = vld [vmem:[#allocation3 + $0x28] sm:$0x1f]  ;;  %v8051_v36 = vor.u32 %v9663_v18, %v8050_v22  ;;  %v9671_v39 = vld [vmem:[#allocation9 + $0x594] sm:$0xf0]  ;;  %v9670_v29 = vld [vmem:[#allocation9 + $0x594] sm:$0xf] }
 0x30f   : > { %v11074_v44 = vpack.c.bf16 %v2494_v52, %v2494_v52  ;;  %2877 = vmatpush.bf16.msra.mxu0 %v7947_v30  ;;  %v8082_v52 = vld [vmem:[#allocation9 + $0x590] sm:$0xf]  ;;  %v8084_v34 = vld [vmem:[#allocation9 + $0x598] sm:$0xf0]  ;;  %v9659_v30 = vld [vmem:[#allocation9 + $0x534] sm:$0xf0] }
 0x310   : > { %2841 = vmatpush.bf16.msrb.mxu2 %v7943_v6  ;;  %v8083_v35 = vor.u32 %v9671_v39, %v8082_v52  ;;  %v8047_v6 = vor.u32 %v9660_v4, %v8044_v2  ;;  %v8034_v59 = vld [vmem:[#allocation9 + $0x530] sm:$0xf]  ;;  %v9658_v12 = vld [vmem:[#allocation9 + $0x534] sm:$0xf]  ;;  %v8036_v31 = vld [vmem:[#allocation9 + $0x538] sm:$0xf0] }
 0x311   : > { %v2540_v41 = vshll.u32 %v11074_v44, 16  ;;  %v2547_v28 = vshrl.u32 %v11074_v44, 16  ;;  %v8043_v44 = vor.u32 %v9661_v3, %v8042_v24  ;;  %v8035_v13 = vor.u32 %v9659_v30, %v8034_v59  ;;  %v9657_v11 = vld [vmem:[#allocation9 + $0x524] sm:$0xf0]  ;;  %v9656_v43 = vld [vmem:[#allocation9 + $0x524] sm:$0xf] }
 0x312   : > { %v8039_v21 = vor.u32 %v9658_v12, %v8036_v31  ;;  %v8076_v33 = vld [vmem:[#allocation9 + $0x588] sm:$0xf0]  ;;  %v8018_v63 = vld [vmem:[#allocation9 + $0x510] sm:$0xf]  ;;  %v9655_v20 = vld [vmem:[#allocation9 + $0x514] sm:$0xf0] }
 0x313   : > { %v2542_v49 = vrot.slane %v2540_v41, 1  ;;  %2878 = vmatpush.bf16.msra.mxu0 %v7939_v1  ;;  %v8087_v41 = vor.u32 %v9670_v29, %v8084_v34  ;;  %v9654_v45 = vld [vmem:[#allocation9 + $0x514] sm:$0xf]  ;;  %v2461_v53 = vld [vmem:[#allocation3 + $0x8] sm:$0xff]  ;;  %v8012_v58 = vld [vmem:[#allocation9 + $0x508] sm:$0xf0] }
 0x314   : > { %v2493_v27 = vld [vmem:[#allocation3 + $0x20] sm:$0x1f]  ;;  %2842 = vmatpush.bf16.msrb.mxu2 %v7935_v55  ;;  %v8027_v55 = vor.u32 %v9657_v11, %v8026_v25  ;;  %v9652_v23 = vld [vmem:[#allocation9 + $0x504] sm:$0xf]  ;;  %v2465_v60 = vld [vmem:[#allocation3 + $0x28] sm:$0xf] }
 0x315   : > { %v2543_v57 = vsel %vm1055_vm0, %v2538_v32, %v2542_v49  ;;  %v11078_v62 = vpack.c.bf16 %v2493_v27, %v2493_v27  ;;  %v2549_v14 = vor.u32 %v2547_v28, %v2542_v49  ;;  %v8028_v32 = vld [vmem:[#allocation9 + $0x528] sm:$0xf0]  ;;  %v8074_v49 = vld [vmem:[#allocation9 + $0x580] sm:$0xf]  ;;  %v9669_v27 = vld [vmem:[#allocation9 + $0x584] sm:$0xf0]  ;;  %v8015_v48 = vor.u32 %v9652_v23, %v8012_v58 }
 0x316   : > { %7920 = vmatmul.msk.bf16.vlgmr.msrb.gmra.mxu3 %vm958_vm6, %v2543_v57  ;;  %7922 = vmatmul.msk.bf16.vlgmr.msrb.gmra.mxu1 %vm958_vm6, %v2543_v57  ;;  %v8075_v57 = vor.u32 %v9669_v27, %v8074_v49  ;;  %v8031_v1 = vor.u32 %v9656_v43, %v8028_v32  ;;  %v2464_v15 = vld [vmem:[#allocation3 + $0x20] sm:$0xf]  ;;  %v2909_v22 = vld [vmem:[#allocation3 + $0x8] sm:$0xfc] }
 0x317   : > { %v2528_v38 = vshll.u32 %v11078_v62, 16  ;;  %2879 = vmatpush.bf16.msra.mxu0 %v7931_v37  ;;  %v2544_v8 = vshrl.u32 %v11078_v62, 16  ;;  %3079 = vmatpush.bf16.msrb.mxu3 %v8083_v35  ;;  %v9668_v62 = vld [vmem:[#allocation9 + $0x584] sm:$0xf]  ;;  %v8010_v37 = vld [vmem:[#allocation9 + $0x500] sm:$0xf]  ;;  %v2468_v42 = vpack.c.bf16 %v2464_v15, %v2464_v15  ;;  %v2913_v18 = vpack.c.bf16 %v11065_v50, %v2909_v22 }
 0x318   : > { %2843 = vmatpush.bf16.msrb.mxu2 %v7927_v54  ;;  %3115 = vmatpush.bf16.msrb.mxu1 %v8087_v41  ;;  %v8079_v5 = vor.u32 %v9668_v62, %v8076_v33  ;;  %v2910_v16 = vld [vmem:[#allocation3 + $0x20] sm:$0x3f]  ;;  %v9704_v23 = vld [vmem:[#allocation9 + $0x6a4] sm:$0xf]  ;;  %v8134_v15 = vld [vmem:[#allocation9 + $0x690] sm:$0xf] }
 0x319   : > { %v2530_v61 = vrot.slane %v2528_v38, 1  ;;  %v8020_v38 = vld [vmem:[#allocation9 + $0x518] sm:$0xf0] }
 0x31a   : > { %v8023_v54 = vor.u32 %v9654_v45, %v8020_v38  ;;  %v2908_v28 = vld [vmem:[#allocation3] sm:$0xfc] }
 0x31b   : > { %v2531_v40 = vsel %vm1055_vm0, %v2526_v51, %v2530_v61  ;;  %v2546_v26 = vor.u32 %v2544_v8, %v2530_v61  ;;  %3080 = vmatpush.bf16.msrb.mxu3 %v8075_v57  ;;  %v2467_v51 = vpack.c.bf16 %v11065_v50, %v2461_v53  ;;  %v8019_v61 = vor.u32 %v9655_v20, %v8018_v63  ;;  %v9707_v63 = vld [vmem:[#allocation9 + $0x6b4] sm:$0xf0]  ;;  %v9706_v20 = vld [vmem:[#allocation9 + $0x6b4] sm:$0xf]  ;;  %v8152_v38 = vld [vmem:[#allocation9 + $0x6b8] sm:$0xf0] }
 0x31c   : > { %2666 = vmatmul.bf16.vlgmr.msra.gmra.mxu2 %v2531_v40  ;;  %2702 = vmatmul.bf16.vlgmr.msrb.gmra.mxu0 %v2531_v40  ;;  %v9653_v40 = vld [vmem:[#allocation9 + $0x504] sm:$0xf0]  ;;  %v2912_v52 = vpack.c.bf16 %v11061_v9, %v2908_v28  ;;  %v8136_v22 = vld [vmem:[#allocation9 + $0x698] sm:$0xf0] }
 0x31d   : > { %3055 = vmatpush.bf16.msra.mxu2 %v8067_v7  ;;  %3091 = vmatpush.bf16.msrb.mxu0 %v8071_v10  ;;  %v8011_v7 = vor.u32 %v9653_v40, %v8010_v37  ;;  %v2469_v10 = vpack.c.bf16 %v2465_v60, %v2465_v60  ;;  %v8142_v37 = vld [vmem:[#allocation9 + $0x6a0] sm:$0xf]  ;;  %v9705_v40 = vld [vmem:[#allocation9 + $0x6a4] sm:$0xf0]  ;;  %v3134_v60 = vld [vmem:[#allocation10 + $0x4] sm:$0x3] }
 0x31e   : > { %3116 = vmatpush.bf16.msrb.mxu1 %v8079_v5  ;;  %v2941_v24 = vrot.slane %v2912_v52, 1  ;;  %v8150_v5 = vld [vmem:[#allocation9 + $0x6b0] sm:$0xf]  ;;  %v8143_v58 = vor.u32 %v9705_v40, %v8142_v37  ;;  %v9696_v37 = vld [vmem:[#allocation9 + $0x664] sm:$0xf] }
 0x31f   : > { %v8151_v45 = vor.u32 %v9707_v63, %v8150_v5  ;;  %v8168_v5 = vld [vmem:[#allocation9 + $0x6d8] sm:$0xf0]  ;;  %v8118_v63 = vld [vmem:[#allocation9 + $0x670] sm:$0xf] }
 0x321   : > { %3056 = vmatpush.bf16.msra.mxu2 %v8059_v0  ;;  %3092 = vmatpush.bf16.msrb.mxu0 %v8063_v46  ;;  %v2911_v0 = vld [vmem:[#allocation3 + $0x28] sm:$0x3f] }
 0x322   : > { %v2915_v46 = vpack.c.bf16 %v2911_v0, %v2911_v0  ;;  %v9702_v0 = vld [vmem:[#allocation9 + $0x694] sm:$0xf] }
 0x323   : > { %v8139_v28 = vor.u32 %v9702_v0, %v8136_v22  ;;  %v9709_v0 = vld [vmem:[#allocation9 + $0x6c4] sm:$0xf0] }
 0x324   : > { %v2945_v19 = vrot.slane %v2915_v46, 1 }
 0x325   : > { %3057 = vmatpush.bf16.msra.mxu2 %v8051_v36  ;;  %3093 = vmatpush.bf16.msrb.mxu0 %v8055_v47  ;;  %v2944_v36 = vrot.slane %v2913_v18, 1 }
 0x326   : > { %7921 = vmatmul.msk.bf16.gmra.mxu3 %vm958_vm6, %v2549_v14  ;;  %7923 = vmatmul.msk.bf16.gmra.mxu1 %vm958_vm6, %v2549_v14  ;;  %v2914_v14 = vpack.c.bf16 %v2910_v16, %v2910_v16 }
 0x327   : > { %v2946_v47 = vsel %vm1477_vm2, %v2944_v36, %v2945_v19 }
 0x328   : > { %v2942_v39 = vrot.slane %v2914_v14, 1 }
 0x329   : > { %3058 = vmatpush.bf16.msra.mxu2 %v8043_v44  ;;  %3094 = vmatpush.bf16.msrb.mxu0 %v8047_v6 }
 0x32a   : > { %v2943_v35 = vsel %vm1477_vm2, %v2941_v24, %v2942_v39 }
 0x32c   : > { %2671 = vmatmul.bf16.gmra.mxu2 %v2546_v26  ;;  %2707 = vmatmul.bf16.gmra.mxu0 %v2546_v26 }
 0x32d   : > { %3059 = vmatpush.bf16.msra.mxu2 %v8035_v13  ;;  %3095 = vmatpush.bf16.msrb.mxu0 %v8039_v21 }
 0x331   : > { %3060 = vmatpush.bf16.msra.mxu2 %v8027_v55  ;;  %3096 = vmatpush.bf16.msrb.mxu0 %v8031_v1 }
 0x335   : > { %3061 = vmatpush.bf16.msra.mxu2 %v8019_v61  ;;  %3097 = vmatpush.bf16.msrb.mxu0 %v8023_v54  ;;  %v8155_v61 = vor.u32 %v9706_v20, %v8152_v38 }
 0x336   : > { %8004 = vmatmul.msk.bf16.vlgmr.msra.gmra.mxu3 %vm958_vm6, %v2467_v51  ;;  %8006 = vmatmul.msk.bf16.vlgmr.msra.gmra.mxu1 %vm958_vm6, %v2467_v51 }
 0x339   : > { %3062 = vmatpush.bf16.msra.mxu2 %v8011_v7  ;;  %3098 = vmatpush.bf16.msrb.mxu0 %v8015_v48  ;;  %v8144_v7 = vld [vmem:[#allocation9 + $0x6a8] sm:$0xf0] }
 0x33a   : > { %v8147_v48 = vor.u32 %v9704_v23, %v8144_v7 }
 0x33c   : > { %2844 = vmatmul.bf16.vlgmr.msrb.gmra.mxu2 %v2466_v56  ;;  %2880 = vmatmul.bf16.vlgmr.msra.gmra.mxu0 %v2466_v56 }
 0x33d   : > { %3390 = vmatpush.bf16.msrb.mxu2 %v8151_v45  ;;  %3426 = vmatpush.bf16.msra.mxu0 %v8155_v61  ;;  %v8120_v45 = vld [vmem:[#allocation9 + $0x678] sm:$0xf0] }
 0x341   : > { %3391 = vmatpush.bf16.msrb.mxu2 %v8143_v58  ;;  %3427 = vmatpush.bf16.msra.mxu0 %v8147_v48  ;;  %v8112_v58 = vld [vmem:[#allocation9 + $0x668] sm:$0xf0] }
 0x345   : > { %3428 = vmatpush.bf16.msra.mxu0 %v8139_v28 }
 0x346   : > { %8005 = vmatmul.msk.bf16.gmra.mxu3 %vm958_vm6, %v2469_v10  ;;  %8007 = vmatmul.msk.bf16.gmra.mxu1 %vm958_vm6, %v2469_v10 }
 0x34c   : > { %2849 = vmatmul.bf16.gmra.mxu2 %v2468_v42  ;;  %2885 = vmatmul.bf16.gmra.mxu0 %v2468_v42  ;;  %v9703_v42 = vld [vmem:[#allocation9 + $0x694] sm:$0xf0] }
 0x34d   : > { %v8135_v46 = vor.u32 %v9703_v42, %v8134_v15  ;;  %v8158_v42 = vld [vmem:[#allocation9 + $0x6c0] sm:$0xf] }
 0x34f   : > { %3392 = vmatpush.bf16.msrb.mxu2 %v8135_v46  ;;  %v9708_v46 = vld [vmem:[#allocation9 + $0x6c4] sm:$0xf] }
 0x356   : > { %8088 = vmatmul.msk.bf16.vlgmr.msrb.gmra.mxu3 %vm958_vm6, %v2946_v47  ;;  %8090 = vmatmul.msk.bf16.vlgmr.msrb.gmra.mxu1 %vm958_vm6, %v2946_v47  ;;  %v11131_v47 = vperm.slane %v3134_v60, 1 }
 0x35c   : > { %3063 = vmatmul.bf16.vlgmr.msra.gmra.mxu2 %v2943_v35  ;;  %3099 = vmatmul.bf16.vlgmr.msrb.gmra.mxu0 %v2943_v35  ;;  %v8126_v35 = vld [vmem:[#allocation9 + $0x680] sm:$0xf] }
 0x366   : > { %8089 = vmatmul.msk.bf16.gmra.mxu3 %vm958_vm6, %v2945_v19  ;;  %8091 = vmatmul.msk.bf16.gmra.mxu1 %vm958_vm6, %v2945_v19 }
 0x36c   : > { %3068 = vmatmul.bf16.gmra.mxu2 %v2942_v39  ;;  %3104 = vmatmul.bf16.gmra.mxu0 %v2942_v39 }
 0x393   : > { %v2721_v50 = vpop.f32.mrf.mxu1 }
 0x399   : > { %v2685_v3 = vpop.f32.mrf.mxu3  ;;  %v2703_v4 = vpop.f32.mrf.mxu0 }
 0x39a   : > { %v2722_v17 = vadd.f32 %v2721_v50, %v2703_v4  ;;  %v9701_v50 = vld [vmem:[#allocation9 + $0x684] sm:$0xf0]  ;;  %v9700_v4 = vld [vmem:[#allocation9 + $0x684] sm:$0xf] }
 0x39b   : > { %v2723_v9 = vpop.f32.mrf.mxu1 }
 0x39f   : > { %v2667_v2 = vpop.f32.mrf.mxu2 }
 0x3a0   : > { %v2686_v18 = vadd.f32 %v2685_v3, %v2667_v2  ;;  %v8128_v3 = vld [vmem:[#allocation9 + $0x688] sm:$0xf0] }
 0x3a1   : > { %v11103_v8 = vpop.f32.mrf.mxu3  ;;  %v2705_v44 = vpop.f32.mrf.mxu0 }
 0x3a2   : > { %v2724_v52 = vadd.f32 %v2723_v9, %v2705_v44  ;;  %v9699_v44 = vld [vmem:[#allocation9 + $0x674] sm:$0xf0] }
 0x3a3   : > { %v11105_v6 = vpop.f32.mrf.mxu1 }
 0x3a7   : > { %v11107_v26 = vpop.f32.mrf.mxu2 }
 0x3a8   : > { %v2688_v7 = vadd.f32 %v11103_v8, %v11107_v26 }
 0x3a9   : > { %v11109_v29 = vpop.f32.mrf.mxu3  ;;  %v11111_v34 = vpop.f32.mrf.mxu0 }
 0x3ab   : > { %v2728_v59 = vpop.f32.mrf.mxu1 }
 0x3af   : > { %v11113_v41 = vpop.f32.mrf.mxu2 }
 0x3b1   : > { %v2692_v30 = vpop.f32.mrf.mxu3  ;;  %v2710_v12 = vpop.f32.mrf.mxu0 }
 0x3b2   : > { %v8166_v30 = vld [vmem:[#allocation9 + $0x6d0] sm:$0xf]  ;;  %v9711_v12 = vld [vmem:[#allocation9 + $0x6d4] sm:$0xf0] }
 0x3b3   : > { %v2899_v31 = vpop.f32.mrf.mxu1 }
 0x3b7   : > { %v2674_v13 = vpop.f32.mrf.mxu2 }
 0x3b8   : > { %v8127_v13 = vor.u32 %v9701_v50, %v8126_v35  ;;  %v8104_v35 = vld [vmem:[#allocation9 + $0x658] sm:$0xf0] }
 0x3b9   : > { %v11115_v21 = vpop.f32.mrf.mxu3  ;;  %v2881_v25 = vpop.f32.mrf.mxu0 }
 0x3ba   : > { %v2882_v56 = vadd.f32 %v2881_v25, %v2722_v17  ;;  %v8167_v25 = vor.u32 %v9711_v12, %v8166_v30  ;;  %3393 = vmatpush.bf16.msrb.mxu2 %v8127_v13  ;;  %v11135_v17 = vperm.slane %v3134_v60, 0  ;;  %v8094_v13 = vld [vmem:[#allocation9 + $0x640] sm:$0xf] }
 0x3bb   : > { %v11117_v11 = vpop.f32.mrf.mxu1 }
 0x3bc   : > { %v2900_v36 = vadd.f32 %v2899_v31, %v2882_v56  ;;  %v9710_v31 = vld [vmem:[#allocation9 + $0x6d4] sm:$0xf]  ;;  %3414 = vmatpush.bf16.msra.mxu3 %v8167_v25 }
 0x3bd   : > { %v8171_v9 = vor.u32 %v9710_v31, %v8168_v5  ;;  %v8096_v31 = vld [vmem:[#allocation9 + $0x648] sm:$0xf0]  ;;  %v2691_v5 = vadd.f32 %v11109_v29, %v11113_v41 }
 0x3bf   : > { %v2845_v43 = vpop.f32.mrf.mxu2  ;;  %3450 = vmatpush.bf16.msra.mxu1 %v8171_v9 }
 0x3c0   : > { %v2846_v39 = vadd.f32 %v2845_v43, %v2686_v18  ;;  %v9698_v43 = vld [vmem:[#allocation9 + $0x674] sm:$0xf] }
 0x3c1   : > { %v11119_v32 = vpop.f32.mrf.mxu3  ;;  %v2883_v49 = vpop.f32.mrf.mxu0  ;;  %v8123_v61 = vor.u32 %v9698_v43, %v8120_v45 }
 0x3c2   : > { %v2884_v2 = vadd.f32 %v2883_v49, %v2724_v52  ;;  %v2864_v38 = vadd.f32 %v11115_v21, %v2846_v39  ;;  %v8110_v49 = vld [vmem:[#allocation9 + $0x660] sm:$0xf]  ;;  %v2727_v21 = vadd.f32 %v11105_v6, %v11111_v34  ;;  %v8115_v6 = vor.u32 %v9696_v37, %v8112_v58  ;;  %v9694_v39 = vld [vmem:[#allocation9 + $0x654] sm:$0xf]  ;;  %v8236_v58 = vld [vmem:[#allocation9 + $0x618] sm:$0xf0] }
 0x3c3   : > { %v11121_v27 = vpop.f32.mrf.mxu1  ;;  %v8107_v12 = vor.u32 %v9694_v39, %v8104_v35  ;;  %v9686_v37 = vld [vmem:[#allocation9 + $0x614] sm:$0xf] }
 0x3c4   : > { %v2902_v48 = vadd.f32 %v11117_v11, %v2884_v2  ;;  %v8102_v11 = vld [vmem:[#allocation9 + $0x650] sm:$0xf]  ;;  %v9692_v2 = vld [vmem:[#allocation9 + $0x644] sm:$0xf] }
 0x3c7   : > { %v11123_v55 = vpop.f32.mrf.mxu2 }
 0x3c8   : > { %v2848_v28 = vadd.f32 %v11123_v55, %v2688_v7  ;;  %v8226_v7 = vld [vmem:[#allocation9 + $0x600] sm:$0xf] }
 0x3c9   : > { %v11125_v57 = vpop.f32.mrf.mxu3  ;;  %v11127_v62 = vpop.f32.mrf.mxu0 }
 0x3cb   : > { %v2906_v33 = vpop.f32.mrf.mxu1 }
 0x3cc   : > { %v8131_v33 = vor.u32 %v9700_v4, %v8128_v3  ;;  %v9693_v3 = vld [vmem:[#allocation9 + $0x644] sm:$0xf0] }
 0x3ce   : > { %3429 = vmatpush.bf16.msra.mxu0 %v8131_v33 }
 0x3cf   : > { %v11129_v1 = vpop.f32.mrf.mxu2 }
 0x3d1   : > { %v2870_v53 = vpop.f32.mrf.mxu3  ;;  %v2888_v51 = vpop.f32.mrf.mxu0 }
 0x3d2   : > { %v8119_v51 = vor.u32 %v9699_v44, %v8118_v63  ;;  %3430 = vmatpush.bf16.msra.mxu0 %v8123_v61 }
 0x3d3   : > { %v3118_v54 = vpop.f32.mrf.mxu1 }
 0x3d4   : > { %3394 = vmatpush.bf16.msrb.mxu2 %v8119_v51 }
 0x3d6   : > { %3431 = vmatpush.bf16.msra.mxu0 %v8115_v6  ;;  %v9682_v6 = vld [vmem:[#allocation9 + $0x5f4] sm:$0xf] }
 0x3d7   : > { %v2852_v10 = vpop.f32.mrf.mxu2 }
 0x3d9   : > { %v3082_v16 = vpop.f32.mrf.mxu3  ;;  %v3100_v19 = vpop.f32.mrf.mxu0 }
 0x3da   : > { %v3119_v14 = vadd.f32 %v3118_v54, %v3100_v19  ;;  %v9697_v54 = vld [vmem:[#allocation9 + $0x664] sm:$0xf0]  ;;  %v8160_v19 = vld [vmem:[#allocation9 + $0x6c8] sm:$0xf0]  ;;  %3432 = vmatpush.bf16.msra.mxu0 %v8107_v12 }
 0x3db   : > { %v3120_v24 = vpop.f32.mrf.mxu1  ;;  %v8111_v15 = vor.u32 %v9697_v54, %v8110_v49  ;;  %v8163_v34 = vor.u32 %v9708_v46, %v8160_v19  ;;  %v8099_v49 = vor.u32 %v9692_v2, %v8096_v31  ;;  %v8234_v54 = vld [vmem:[#allocation9 + $0x610] sm:$0xf]  ;;  %v8228_v46 = vld [vmem:[#allocation9 + $0x608] sm:$0xf0]  ;;  %v9683_v19 = vld [vmem:[#allocation9 + $0x5f4] sm:$0xf0] }
 0x3dc   : > { %v3128_v59 = vadd.f32 %v3119_v14, %v2900_v36  ;;  %v9695_v36 = vld [vmem:[#allocation9 + $0x654] sm:$0xf0] }
 0x3dd   : > { %3451 = vmatpush.bf16.msra.mxu1 %v8163_v34  ;;  %3395 = vmatpush.bf16.msrb.mxu2 %v8111_v15  ;;  %v8103_v4 = vor.u32 %v9695_v36, %v8102_v11  ;;  %v8220_v34 = vld [vmem:[#allocation9 + $0x5f8] sm:$0xf0] }
 0x3de   : > { %v3141_v20 = vadd.f32 %v11131_v47, %v3128_v59  ;;  %v2866_v59 = vadd.f32 %v11119_v32, %v2848_v28  ;;  %3433 = vmatpush.bf16.msra.mxu0 %v8099_v49  ;;  %v9679_v49 = vld [vmem:[#allocation9 + $0x5d4] sm:$0xf0] }
 0x3df   : > { %v3064_v53 = vpop.f32.mrf.mxu2 }
 0x3e0   : > { %vm3147_vm5 = vcmp.ge.f32.partialorder %v3141_v20, 0.0  ;;  %v3153_v40 = vmul.f32 0.01, %v3141_v20  ;;  %v3083_v23 = vadd.f32 %v3082_v16, %v3064_v53  ;;  %v8159_v16 = vor.u32 %v9709_v0, %v8158_v42 }
 0x3e1   : > { %v3084_v56 = vpop.f32.mrf.mxu3  ;;  %v3102_v10 = vpop.f32.mrf.mxu0  ;;  %3396 = vmatpush.bf16.msrb.mxu2 %v8103_v4  ;;  %v2851_v53 = vadd.f32 %v11129_v1, %v2691_v5 }
 0x3e2   : > { %v3159_v22 = vsel %vm3147_vm5, %v3141_v20, %v3153_v40  ;;  %v3127_v18 = vadd.f32 %v3083_v23, %v2864_v38  ;;  %v3121_v60 = vadd.f32 %v3120_v24, %v3102_v10  ;;  %3415 = vmatpush.bf16.msra.mxu3 %v8159_v16  ;;  %v2887_v24 = vadd.f32 %v11127_v62, %v2727_v21  ;;  %v9685_v21 = vld [vmem:[#allocation9 + $0x604] sm:$0xf0]  ;;  %v9684_v10 = vld [vmem:[#allocation9 + $0x604] sm:$0xf] }
 0x3e3   : > { %v3171_v8 = vrot.slane %v3159_v22, 7  ;;  %v3123_v26 = vpop.f32.mrf.mxu1  ;;  %v8095_v38 = vor.u32 %v9693_v3, %v8094_v13  ;;  %v2869_v15 = vadd.f32 %v11125_v57, %v2851_v53  ;;  %v8227_v0 = vor.u32 %v9685_v21, %v8226_v7  ;;  %v8218_v22 = vld [vmem:[#allocation9 + $0x5f0] sm:$0xf]  ;;  %v8252_v53 = vld [vmem:[#allocation9 + $0x638] sm:$0xf0] }
 0x3e4   : > { %v3140_v14 = vadd.f32 %v11135_v17, %v3127_v18  ;;  %v3130_v52 = vadd.f32 %v3121_v60, %v2902_v48  ;;  %v2905_v63 = vadd.f32 %v11121_v27, %v2887_v24  ;;  %v9687_v27 = vld [vmem:[#allocation9 + $0x614] sm:$0xf0]  ;;  %v8219_v39 = vor.u32 %v9683_v19, %v8218_v22  ;;  %v9676_v7 = vld [vmem:[#allocation9 + $0x5c4] sm:$0xf]  ;;  %v8196_v21 = vld [vmem:[#allocation9 + $0x5c8] sm:$0xf0] }
 0x3e5   : > { %3187 = vst.msk [vmem:[#allocation3 + $0x8] sm:$0xfe] %vm989_vm13, %v3171_v8  ;;  %v8235_v23 = vor.u32 %v9687_v27, %v8234_v54  ;;  %3397 = vmatpush.bf16.msrb.mxu2 %v8095_v38  ;;  %v9690_v38 = vld [vmem:[#allocation9 + $0x634] sm:$0xf]  ;;  %v8204_v27 = vld [vmem:[#allocation9 + $0x5d8] sm:$0xf0] }
 0x3e6   : > { %vm3146_vm7 = vcmp.ge.f32.partialorder %v3140_v14, 0.0  ;;  %v3152_v55 = vmul.f32 0.01, %v3140_v14  ;;  %v3143_v50 = vadd.f32 %v11131_v47, %v3130_v52  ;;  %v9678_v54 = vld [vmem:[#allocation9 + $0x5d4] sm:$0xf] }
 0x3e7   : > { %v3066_v30 = vpop.f32.mrf.mxu2  ;;  %v8244_v22 = vld [vmem:[#allocation9 + $0x628] sm:$0xf0]  ;;  %v9674_v19 = vld [vmem:[#allocation9 + $0x5b4] sm:$0xf] }
 0x3e8   : > { %v3158_v25 = vsel %vm3146_vm7, %v3140_v14, %v3152_v55  ;;  %vm3149_vm8 = vcmp.ge.f32.partialorder %v3143_v50, 0.0  ;;  %v3155_v62 = vmul.f32 0.01, %v3143_v50  ;;  %v3085_v33 = vadd.f32 %v3084_v56, %v3066_v30  ;;  %v9691_v30 = vld [vmem:[#allocation9 + $0x634] sm:$0xf0] }
 0x3e9   : > { %v3170_v20 = vrot.slane %v3158_v25, 7  ;;  %v3087_v9 = vpop.f32.mrf.mxu3  ;;  %v3105_v44 = vpop.f32.mrf.mxu0  ;;  %v8239_v56 = vor.u32 %v9686_v37, %v8236_v58  ;;  %3568 = vmatpush.bf16.msra.mxu2 %v8235_v23  ;;  %v8223_v55 = vor.u32 %v9682_v6, %v8220_v34  ;;  %v8210_v25 = vld [vmem:[#allocation9 + $0x5e0] sm:$0xf]  ;;  %v8207_v23 = vor.u32 %v9678_v54, %v8204_v27  ;;  %v9677_v58 = vld [vmem:[#allocation9 + $0x5c4] sm:$0xf0] }
 0x3ea   : > { %v3161_v32 = vsel %vm3149_vm8, %v3143_v50, %v3155_v62  ;;  %v3129_v43 = vadd.f32 %v3085_v33, %v2866_v59  ;;  %v3124_v45 = vadd.f32 %v3123_v26, %v3105_v44  ;;  %v8231_v26 = vor.u32 %v9684_v10, %v8228_v46  ;;  %v8250_v59 = vld [vmem:[#allocation9 + $0x630] sm:$0xf]  ;;  %v9681_v62 = vld [vmem:[#allocation9 + $0x5e4] sm:$0xf0]  ;;  %v8194_v37 = vld [vmem:[#allocation9 + $0x5c0] sm:$0xf] }
 0x3eb   : > { %3186 = vst [vmem:[#allocation3] sm:$0xfe] %v3170_v20  ;;  %v3174_v51 = vrot.slane %v3161_v32, 7  ;;  %v3125_v61 = vpop.f32.mrf.mxu1  ;;  %3604 = vmatpush.bf16.msrb.mxu0 %v8239_v56  ;;  %v8211_v5 = vor.u32 %v9681_v62, %v8210_v25  ;;  %v9689_v56 = vld [vmem:[#allocation9 + $0x624] sm:$0xf0] }
 0x3ec   : > { %v3142_v29 = vadd.f32 %v11135_v17, %v3129_v43  ;;  %v3132_v41 = vadd.f32 %v3124_v45, %v2905_v63  ;;  %v3224_v24 = vld [vmem:[#allocation3 + $0x8] sm:$0xfe]  ;;  %v8255_v61 = vor.u32 %v9690_v38, %v8252_v53  ;;  %v9727_v25 = vld [vmem:[#allocation9 + $0x754] sm:$0xf0]  ;;  %v9726_v62 = vld [vmem:[#allocation9 + $0x754] sm:$0xf] }
 0x3ed   : > { %v3175_v40 = vsel %vm971_vm10, %v3171_v8, %v3174_v51  ;;  %3569 = vmatpush.bf16.msra.mxu2 %v8227_v0  ;;  %v9680_v63 = vld [vmem:[#allocation9 + $0x5e4] sm:$0xf]  ;;  %v8199_v0 = vor.u32 %v9676_v7, %v8196_v21  ;;  %v9722_v38 = vld [vmem:[#allocation9 + $0x734] sm:$0xf]  ;;  %v8304_v53 = vld [vmem:[#allocation9 + $0x738] sm:$0xf0] }
 0x3ee   : > { %3189 = vst.msk [vmem:[#allocation3 + $0x18] sm:$0xff] %vm958_vm6, %v3175_v40  ;;  %vm3148_vm9 = vcmp.ge.f32.partialorder %v3142_v29, 0.0  ;;  %v3154_v1 = vmul.f32 0.01, %v3142_v29  ;;  %v3145_v48 = vadd.f32 %v11131_v47, %v3132_v41  ;;  %3628 = vmatpush.bf16.msrb.mxu1 %v8255_v61  ;;  %v9688_v10 = vld [vmem:[#allocation9 + $0x624] sm:$0xf]  ;;  %v8307_v54 = vor.u32 %v9722_v38, %v8304_v53 }
 0x3ef   : > { %v3069_v42 = vpop.f32.mrf.mxu2  ;;  %3605 = vmatpush.bf16.msrb.mxu0 %v8231_v26  ;;  %v8294_v27 = vld [vmem:[#allocation9 + $0x720] sm:$0xf]  ;;  %v8296_v7 = vld [vmem:[#allocation9 + $0x728] sm:$0xf0] }
 0x3f0   : > { %v3160_v18 = vsel %vm3148_vm9, %v3142_v29, %v3154_v1  ;;  %vm3151_vm11 = vcmp.ge.f32.partialorder %v3145_v48, 0.0  ;;  %v3157_v60 = vmul.f32 0.01, %v3145_v48  ;;  %v3088_v16 = vadd.f32 %v3087_v9, %v3069_v42 }
 0x3f1   : > { %v3172_v28 = vrot.slane %v3160_v18, 7  ;;  %v3089_v8 = vpop.f32.mrf.mxu3  ;;  %v3107_v47 = vpop.f32.mrf.mxu0  ;;  %3570 = vmatpush.bf16.msra.mxu2 %v8219_v39  ;;  %v8195_v1 = vor.u32 %v9677_v58, %v8194_v37  ;;  %v8186_v18 = vld [vmem:[#allocation9 + $0x5b0] sm:$0xf]  ;;  %v9673_v39 = vld [vmem:[#allocation9 + $0x5a4] sm:$0xf0] }
 0x3f2   : > { %v3163_v11 = vsel %vm3151_vm11, %v3145_v48, %v3157_v60  ;;  %v3131_v57 = vadd.f32 %v3088_v16, %v2869_v15  ;;  %v3223_v52 = vld [vmem:[#allocation3] sm:$0xfe]  ;;  %v8242_v48 = vld [vmem:[#allocation9 + $0x620] sm:$0xf]  ;;  %v8247_v60 = vor.u32 %v9688_v10, %v8244_v22  ;;  %v9720_v58 = vld [vmem:[#allocation9 + $0x724] sm:$0xf] }
 0x3f3   : > { %v11158_v36 = vsel %vm971_vm10, %v3170_v20, %v3172_v28  ;;  %v3178_v14 = vrot.slane %v3163_v11, 7  ;;  %3606 = vmatpush.bf16.msrb.mxu0 %v8223_v55  ;;  %v8212_v20 = vld [vmem:[#allocation9 + $0x5e8] sm:$0xf0]  ;;  %v8243_v46 = vor.u32 %v9689_v56, %v8242_v48  ;;  %v9675_v16 = vld [vmem:[#allocation9 + $0x5b4] sm:$0xf0]  ;;  %vm7083_vm11 = vcmask 8192  }
 0x3f4   : > { %v3144_v35 = vadd.f32 %v11135_v17, %v3131_v57  ;;  %v11167_v3 = vpack.c.bf16 %v11158_v36, %v3223_v52  ;;  %v8251_v17 = vor.u32 %v9691_v30, %v8250_v59  ;;  %v8215_v44 = vor.u32 %v9680_v63, %v8212_v20  ;;  %3629 = vmatpush.bf16.msrb.mxu1 %v8247_v60  ;;  %v8178_v52 = vld [vmem:[#allocation9 + $0x5a0] sm:$0xf]  ;;  %v9724_v20 = vld [vmem:[#allocation9 + $0x744] sm:$0xf]  ;;  %v9730_v56 = vld [vmem:[#allocation9 + $0x774] sm:$0xf] }
 0x3f5   : > { %v3179_v50 = vsel %vm971_vm10, %v3174_v51, %v3178_v14  ;;  %v11162_v4 = vld [vmem:[#allocation3 + $0x18] sm:$0xff]  ;;  %3571 = vmatpush.bf16.msra.mxu2 %v8211_v5  ;;  %v8187_v6 = vor.u32 %v9675_v16, %v8186_v18  ;;  %v9725_v5 = vld [vmem:[#allocation9 + $0x744] sm:$0xf0]  ;;  %v8336_v10 = vld [vmem:[#allocation9 + $0x778] sm:$0xf0] }
 0x3f6   : > { %3191 = vst.msk [vmem:[#allocation3 + $0x28] sm:$0x1f] %vm994_vm1, %v3179_v50  ;;  %vm3150_vm12 = vcmp.ge.f32.partialorder %v3144_v35, 0.0  ;;  %v3156_v12 = vmul.f32 0.01, %v3144_v35  ;;  %v3228_v13 = vpack.c.bf16 %v11162_v4, %v3224_v24  ;;  %3592 = vmatpush.bf16.msrb.mxu3 %v8251_v17  ;;  %v3255_v43 = vshll.u32 %v11167_v3, 16 }
 0x3f7   : > { %v3071_v2 = vpop.f32.mrf.mxu2  ;;  %v8202_v51 = vld [vmem:[#allocation9 + $0x5d0] sm:$0xf]  ;;  %3607 = vmatpush.bf16.msrb.mxu0 %v8215_v44  ;;  %v3253_v24 = vshrl.u32 %v11167_v3, 16  ;;  %v8180_v50 = vld [vmem:[#allocation9 + $0x5a8] sm:$0xf0] }
 0x3f8   : > { %v3162_v33 = vsel %vm3150_vm12, %v3144_v35, %v3156_v12  ;;  %v3267_v31 = vshll.u32 %v3228_v13, 16  ;;  %v8203_v41 = vor.u32 %v9679_v49, %v8202_v51  ;;  %v3265_v15 = vshrl.u32 %v3228_v13, 16  ;;  %v9672_v35 = vld [vmem:[#allocation9 + $0x5a4] sm:$0xf]  ;;  %v8318_v17 = vld [vmem:[#allocation9 + $0x750] sm:$0xf] }
 0x3f9   : > { %v3176_v9 = vrot.slane %v3162_v33, 7  ;;  %v3257_v57 = vrot.slane %v3255_v43, 1  ;;  %v8179_v12 = vor.u32 %v9673_v39, %v8178_v52  ;;  %v8183_v13 = vor.u32 %v9672_v35, %v8180_v50  ;;  %v8320_v3 = vld [vmem:[#allocation9 + $0x758] sm:$0xf0]  ;;  %v8302_v43 = vld [vmem:[#allocation9 + $0x730] sm:$0xf] }
 0x3fa   : > { %v3269_v32 = vrot.slane %v3267_v31, 1  ;;  %3572 = vmatpush.bf16.msra.mxu2 %v8203_v41  ;;  %3593 = vmatpush.bf16.msrb.mxu3 %v8243_v46  ;;  %v8319_v33 = vor.u32 %v9727_v25, %v8318_v17  ;;  %v8310_v31 = vld [vmem:[#allocation9 + $0x740] sm:$0xf]  ;;  %v8323_v63 = vor.u32 %v9726_v62, %v8320_v3  ;;  %v9731_v41 = vld [vmem:[#allocation9 + $0x774] sm:$0xf0] }
 0x3fb   : > { %v3177_v45 = vsel %vm971_vm10, %v3172_v28, %v3176_v9  ;;  %3608 = vmatpush.bf16.msrb.mxu0 %v8207_v23  ;;  %v8188_v28 = vld [vmem:[#allocation9 + $0x5b8] sm:$0xf0]  ;;  %v3258_v59 = vor.u32 %v3257_v57, %v3253_v24  ;;  %v8312_v9 = vld [vmem:[#allocation9 + $0x748] sm:$0xf0]  ;;  %v8311_v44 = vor.u32 %v9725_v5, %v8310_v31  ;;  %v9721_v23 = vld [vmem:[#allocation9 + $0x724] sm:$0xf0] }
 0x3fc   : > { %3190 = vst [vmem:[#allocation3 + $0x20] sm:$0x1f] %v3177_v45  ;;  %v3270_v8 = vor.u32 %v3269_v32, %v3265_v15  ;;  %v8191_v14 = vor.u32 %v9674_v19, %v8188_v28  ;;  %v8315_v32 = vor.u32 %v9724_v20, %v8312_v9  ;;  %v9723_v45 = vld [vmem:[#allocation9 + $0x734] sm:$0xf0]  ;;  %v8286_v15 = vld [vmem:[#allocation9 + $0x710] sm:$0xf] }
 0x3fd   : > { %v3226_v29 = vld [vmem:[#allocation3 + $0x28] sm:$0x1f]  ;;  %v8303_v61 = vor.u32 %v9723_v45, %v8302_v43  ;;  %v9718_v46 = vld [vmem:[#allocation9 + $0x714] sm:$0xf]  ;;  %v9717_v19 = vld [vmem:[#allocation9 + $0x704] sm:$0xf0] }
 0x3fe   : > { %v11171_v40 = vpack.c.bf16 %v3226_v29, %v3226_v29  ;;  %3573 = vmatpush.bf16.msra.mxu2 %v8195_v1  ;;  %v8334_v29 = vld [vmem:[#allocation9 + $0x770] sm:$0xf]  ;;  %v8299_v1 = vor.u32 %v9720_v58, %v8296_v7  ;;  %v8288_v22 = vld [vmem:[#allocation9 + $0x718] sm:$0xf0]  ;;  %v8278_v16 = vld [vmem:[#allocation9 + $0x700] sm:$0xf] }
 0x3ff   : > { %3609 = vmatpush.bf16.msrb.mxu0 %v8199_v0  ;;  %v8335_v37 = vor.u32 %v9731_v41, %v8334_v29  ;;  %v9719_v0 = vld [vmem:[#allocation9 + $0x714] sm:$0xf0]  ;;  %v8291_v60 = vor.u32 %v9718_v46, %v8288_v22  ;;  %v9716_v28 = vld [vmem:[#allocation9 + $0x704] sm:$0xf]  ;;  %v8328_v57 = vld [vmem:[#allocation9 + $0x768] sm:$0xf0] }
 0x400   : > { %v3272_v42 = vshll.u32 %v11171_v40, 16  ;;  %v3279_v51 = vshrl.u32 %v11171_v40, 16  ;;  %v8295_v40 = vor.u32 %v9721_v23, %v8294_v27  ;;  %v8287_v18 = vor.u32 %v9719_v0, %v8286_v15  ;;  %v8270_v39 = vld [vmem:[#allocation9 + $0x6f0] sm:$0xf]  ;;  %v9715_v35 = vld [vmem:[#allocation9 + $0x6f4] sm:$0xf0] }
 0x401   : > { %v9714_v24 = vld [vmem:[#allocation9 + $0x6f4] sm:$0xf]  ;;  %v3193_v50 = vld [vmem:[#allocation3 + $0x8] sm:$0xff]  ;;  %v8264_v62 = vld [vmem:[#allocation9 + $0x6e8] sm:$0xf0] }
 0x402   : > { %v3274_v47 = vrot.slane %v3272_v42, 1  ;;  %3574 = vmatpush.bf16.msra.mxu2 %v8187_v6  ;;  %v8339_v42 = vor.u32 %v9730_v56, %v8336_v10  ;;  %v8279_v6 = vor.u32 %v9717_v19, %v8278_v16  ;;  %v9712_v17 = vld [vmem:[#allocation9 + $0x6e4] sm:$0xf]  ;;  %v3192_v25 = vld [vmem:[#allocation3] sm:$0xff]  ;;  %v3197_v5 = vld [vmem:[#allocation3 + $0x28] sm:$0xf] }
 0x403   : > { %v3225_v26 = vld [vmem:[#allocation3 + $0x20] sm:$0x1f]  ;;  %3610 = vmatpush.bf16.msrb.mxu0 %v8191_v14  ;;  %v8267_v3 = vor.u32 %v9712_v17, %v8264_v62  ;;  %v3198_v31 = vpack.c.bf16 %v11158_v36, %v3192_v25  ;;  %v3641_v43 = vld [vmem:[#allocation3 + $0x8] sm:$0xfc] }
 0x404   : > { %v3275_v34 = vsel %vm1055_vm0, %v3270_v8, %v3274_v47  ;;  %v11175_v11 = vpack.c.bf16 %v3225_v26, %v3225_v26  ;;  %v3281_v49 = vor.u32 %v3279_v51, %v3274_v47  ;;  %v8280_v8 = vld [vmem:[#allocation9 + $0x708] sm:$0xf0]  ;;  %v8326_v47 = vld [vmem:[#allocation9 + $0x760] sm:$0xf]  ;;  %v9729_v26 = vld [vmem:[#allocation9 + $0x764] sm:$0xf0]  ;;  %v3645_v45 = vpack.c.bf16 %v11162_v4, %v3641_v43 }
 0x405   : > { %8172 = vmatmul.msk.bf16.vlgmr.msra.gmra.mxu3 %vm958_vm6, %v3275_v34  ;;  %8174 = vmatmul.msk.bf16.vlgmr.msra.gmra.mxu1 %vm958_vm6, %v3275_v34  ;;  %v8327_v34 = vor.u32 %v9729_v26, %v8326_v47  ;;  %v8283_v14 = vor.u32 %v9716_v28, %v8280_v8  ;;  %v3196_v20 = vld [vmem:[#allocation3 + $0x20] sm:$0xf]  ;;  %v9764_v17 = vld [vmem:[#allocation9 + $0x884] sm:$0xf]  ;;  %v8388_v43 = vld [vmem:[#allocation9 + $0x878] sm:$0xf0] }
 0x406   : > { %v3260_v55 = vshll.u32 %v11175_v11, 16  ;;  %3575 = vmatpush.bf16.msra.mxu2 %v8179_v12  ;;  %v3276_v21 = vshrl.u32 %v11175_v11, 16  ;;  %3811 = vmatpush.bf16.msra.mxu3 %v8335_v37  ;;  %v9728_v11 = vld [vmem:[#allocation9 + $0x764] sm:$0xf]  ;;  %v3200_v9 = vpack.c.bf16 %v3196_v20, %v3196_v20  ;;  %v3642_v38 = vld [vmem:[#allocation3 + $0x20] sm:$0x3f] }
 0x407   : > { %3611 = vmatpush.bf16.msrb.mxu0 %v8183_v13  ;;  %3847 = vmatpush.bf16.msra.mxu1 %v8339_v42  ;;  %v8331_v52 = vor.u32 %v9728_v11, %v8328_v57  ;;  %v8262_v13 = vld [vmem:[#allocation9 + $0x6e0] sm:$0xf]  ;;  %v3640_v51 = vld [vmem:[#allocation3] sm:$0xfc]  ;;  %v8386_v20 = vld [vmem:[#allocation9 + $0x870] sm:$0xf] }
 0x408   : > { %v3262_v30 = vrot.slane %v3260_v55, 1  ;;  %v8272_v55 = vld [vmem:[#allocation9 + $0x6f8] sm:$0xf0]  ;;  %v3644_v29 = vpack.c.bf16 %v11158_v36, %v3640_v51 }
 0x409   : > { %v8275_v12 = vor.u32 %v9714_v24, %v8272_v55  ;;  %v8404_v55 = vld [vmem:[#allocation9 + $0x898] sm:$0xf0] }
 0x40a   : > { %v3263_v2 = vsel %vm1055_vm0, %v3258_v59, %v3262_v30  ;;  %v3278_v48 = vor.u32 %v3276_v21, %v3262_v30  ;;  %3812 = vmatpush.bf16.msra.mxu3 %v8327_v34  ;;  %v3199_v59 = vpack.c.bf16 %v11162_v4, %v3193_v50  ;;  %v8271_v30 = vor.u32 %v9715_v35, %v8270_v39  ;;  %v9767_v39 = vld [vmem:[#allocation9 + $0x894] sm:$0xf0]  ;;  %v9766_v35 = vld [vmem:[#allocation9 + $0x894] sm:$0xf] }
 0x40b   : > { %3398 = vmatmul.bf16.vlgmr.msrb.gmra.mxu2 %v3263_v2  ;;  %3434 = vmatmul.bf16.vlgmr.msra.gmra.mxu0 %v3263_v2  ;;  %v9713_v2 = vld [vmem:[#allocation9 + $0x6e4] sm:$0xf0]  ;;  %v3673_v27 = vrot.slane %v3644_v29, 1 }
 0x40c   : > { %3787 = vmatpush.bf16.msrb.mxu2 %v8319_v33  ;;  %3823 = vmatpush.bf16.msra.mxu0 %v8323_v63  ;;  %v8263_v33 = vor.u32 %v9713_v2, %v8262_v13  ;;  %v3201_v63 = vpack.c.bf16 %v3197_v5, %v3197_v5  ;;  %v8394_v13 = vld [vmem:[#allocation9 + $0x880] sm:$0xf]  ;;  %v9765_v2 = vld [vmem:[#allocation9 + $0x884] sm:$0xf0]  ;;  %v3866_v5 = vld [vmem:[#allocation10 + $0x6] sm:$0x3] }
 0x40d   : > { %3848 = vmatpush.bf16.msra.mxu1 %v8331_v52  ;;  %v8402_v52 = vld [vmem:[#allocation9 + $0x890] sm:$0xf]  ;;  %v8395_v62 = vor.u32 %v9765_v2, %v8394_v13  ;;  %v9756_v13 = vld [vmem:[#allocation9 + $0x844] sm:$0xf] }
 0x40e   : > { %v8403_v24 = vor.u32 %v9767_v39, %v8402_v52  ;;  %v9759_v52 = vld [vmem:[#allocation9 + $0x854] sm:$0xf0]  ;;  %v9758_v39 = vld [vmem:[#allocation9 + $0x854] sm:$0xf] }
 0x410   : > { %3788 = vmatpush.bf16.msrb.mxu2 %v8311_v44  ;;  %3824 = vmatpush.bf16.msra.mxu0 %v8315_v32  ;;  %v3643_v44 = vld [vmem:[#allocation3 + $0x28] sm:$0x3f] }
 0x411   : > { %v3647_v32 = vpack.c.bf16 %v3643_v44, %v3643_v44  ;;  %v9762_v44 = vld [vmem:[#allocation9 + $0x874] sm:$0xf] }
 0x412   : > { %v8391_v51 = vor.u32 %v9762_v44, %v8388_v43  ;;  %v9769_v44 = vld [vmem:[#allocation9 + $0x8a4] sm:$0xf0] }
 0x413   : > { %v3677_v53 = vrot.slane %v3647_v32, 1 }
 0x414   : > { %3789 = vmatpush.bf16.msrb.mxu2 %v8303_v61  ;;  %3825 = vmatpush.bf16.msra.mxu0 %v8307_v54  ;;  %v3676_v61 = vrot.slane %v3645_v45, 1 }
 0x415   : > { %8173 = vmatmul.msk.bf16.gmra.mxu3 %vm958_vm6, %v3281_v49  ;;  %8175 = vmatmul.msk.bf16.gmra.mxu1 %vm958_vm6, %v3281_v49  ;;  %v3646_v49 = vpack.c.bf16 %v3642_v38, %v3642_v38 }
 0x416   : > { %v3678_v54 = vsel %vm1477_vm2, %v3676_v61, %v3677_v53 }
 0x417   : > { %v3674_v41 = vrot.slane %v3646_v49, 1 }
 0x418   : > { %3790 = vmatpush.bf16.msrb.mxu2 %v8295_v40  ;;  %3826 = vmatpush.bf16.msra.mxu0 %v8299_v1 }
 0x419   : > { %v3675_v37 = vsel %vm1477_vm2, %v3673_v27, %v3674_v41 }
 0x41b   : > { %3403 = vmatmul.bf16.gmra.mxu2 %v3278_v48  ;;  %3439 = vmatmul.bf16.gmra.mxu0 %v3278_v48 }
 0x41c   : > { %3791 = vmatpush.bf16.msrb.mxu2 %v8287_v18  ;;  %3827 = vmatpush.bf16.msra.mxu0 %v8291_v60 }
 0x420   : > { %3792 = vmatpush.bf16.msrb.mxu2 %v8279_v6  ;;  %3828 = vmatpush.bf16.msra.mxu0 %v8283_v14 }
 0x424   : > { %3793 = vmatpush.bf16.msrb.mxu2 %v8271_v30  ;;  %3829 = vmatpush.bf16.msra.mxu0 %v8275_v12  ;;  %v8407_v30 = vor.u32 %v9766_v35, %v8404_v55 }
 0x425   : > { %8256 = vmatmul.msk.bf16.vlgmr.msrb.gmra.mxu3 %vm958_vm6, %v3199_v59  ;;  %8258 = vmatmul.msk.bf16.vlgmr.msrb.gmra.mxu1 %vm958_vm6, %v3199_v59 }
 0x428   : > { %3794 = vmatpush.bf16.msrb.mxu2 %v8263_v33  ;;  %3830 = vmatpush.bf16.msra.mxu0 %v8267_v3  ;;  %v8396_v33 = vld [vmem:[#allocation9 + $0x888] sm:$0xf0] }
 0x429   : > { %v8399_v3 = vor.u32 %v9764_v17, %v8396_v33 }
 0x42b   : > { %3576 = vmatmul.bf16.vlgmr.msra.gmra.mxu2 %v3198_v31  ;;  %3612 = vmatmul.bf16.vlgmr.msrb.gmra.mxu0 %v3198_v31 }
 0x42c   : > { %4122 = vmatpush.bf16.msra.mxu2 %v8403_v24  ;;  %4158 = vmatpush.bf16.msrb.mxu0 %v8407_v30  ;;  %v9771_v24 = vld [vmem:[#allocation9 + $0x8b4] sm:$0xf0] }
 0x430   : > { %4123 = vmatpush.bf16.msra.mxu2 %v8395_v62  ;;  %4159 = vmatpush.bf16.msrb.mxu0 %v8399_v3  ;;  %v8364_v62 = vld [vmem:[#allocation9 + $0x848] sm:$0xf0] }
 0x434   : > { %4160 = vmatpush.bf16.msrb.mxu0 %v8391_v51 }
 0x435   : > { %8257 = vmatmul.msk.bf16.gmra.mxu3 %vm958_vm6, %v3201_v63  ;;  %8259 = vmatmul.msk.bf16.gmra.mxu1 %vm958_vm6, %v3201_v63 }
 0x43b   : > { %3581 = vmatmul.bf16.gmra.mxu2 %v3200_v9  ;;  %3617 = vmatmul.bf16.gmra.mxu0 %v3200_v9  ;;  %v9763_v9 = vld [vmem:[#allocation9 + $0x874] sm:$0xf0] }
 0x43c   : > { %v8387_v32 = vor.u32 %v9763_v9, %v8386_v20  ;;  %v8410_v9 = vld [vmem:[#allocation9 + $0x8a0] sm:$0xf] }
 0x43e   : > { %4124 = vmatpush.bf16.msra.mxu2 %v8387_v32  ;;  %v9768_v32 = vld [vmem:[#allocation9 + $0x8a4] sm:$0xf] }
 0x445   : > { %8340 = vmatmul.msk.bf16.vlgmr.msra.gmra.mxu3 %vm958_vm6, %v3678_v54  ;;  %8342 = vmatmul.msk.bf16.vlgmr.msra.gmra.mxu1 %vm958_vm6, %v3678_v54  ;;  %v11228_v54 = vperm.slane %v3866_v5, 1 }
 0x44b   : > { %3795 = vmatmul.bf16.vlgmr.msrb.gmra.mxu2 %v3675_v37  ;;  %3831 = vmatmul.bf16.vlgmr.msra.gmra.mxu0 %v3675_v37  ;;  %v8378_v37 = vld [vmem:[#allocation9 + $0x860] sm:$0xf] }
 0x455   : > { %8341 = vmatmul.msk.bf16.gmra.mxu3 %vm958_vm6, %v3677_v53  ;;  %8343 = vmatmul.msk.bf16.gmra.mxu1 %vm958_vm6, %v3677_v53 }
 0x45b   : > { %3800 = vmatmul.bf16.gmra.mxu2 %v3674_v41  ;;  %3836 = vmatmul.bf16.gmra.mxu0 %v3674_v41 }
 0x482   : > { %v3453_v4 = vpop.f32.mrf.mxu1 }
 0x488   : > { %v3417_v23 = vpop.f32.mrf.mxu3  ;;  %v3435_v58 = vpop.f32.mrf.mxu0 }
 0x489   : > { %v3454_v25 = vadd.f32 %v3453_v4, %v3435_v58  ;;  %v9761_v4 = vld [vmem:[#allocation9 + $0x864] sm:$0xf0]  ;;  %v9760_v58 = vld [vmem:[#allocation9 + $0x864] sm:$0xf] }
 0x48a   : > { %v3455_v36 = vpop.f32.mrf.mxu1 }
 0x48e   : > { %v3399_v7 = vpop.f32.mrf.mxu2 }
 0x48f   : > { %v3418_v45 = vadd.f32 %v3417_v23, %v3399_v7  ;;  %v8380_v23 = vld [vmem:[#allocation9 + $0x868] sm:$0xf0] }
 0x490   : > { %v11200_v21 = vpop.f32.mrf.mxu3  ;;  %v3437_v40 = vpop.f32.mrf.mxu0 }
 0x491   : > { %v3456_v29 = vadd.f32 %v3455_v36, %v3437_v40  ;;  %v8372_v40 = vld [vmem:[#allocation9 + $0x858] sm:$0xf0] }
 0x492   : > { %v11202_v1 = vpop.f32.mrf.mxu1 }
 0x496   : > { %v11204_v48 = vpop.f32.mrf.mxu2 }
 0x497   : > { %v3420_v33 = vadd.f32 %v11200_v21, %v11204_v48 }
 0x498   : > { %v11206_v56 = vpop.f32.mrf.mxu3  ;;  %v11208_v10 = vpop.f32.mrf.mxu0 }
 0x49a   : > { %v3460_v15 = vpop.f32.mrf.mxu1 }
 0x49e   : > { %v11210_v42 = vpop.f32.mrf.mxu2 }
 0x4a0   : > { %v3424_v0 = vpop.f32.mrf.mxu3  ;;  %v3442_v46 = vpop.f32.mrf.mxu0 }
 0x4a1   : > { %v9770_v0 = vld [vmem:[#allocation9 + $0x8b4] sm:$0xf]  ;;  %v8420_v46 = vld [vmem:[#allocation9 + $0x8b8] sm:$0xf0] }
 0x4a2   : > { %v3631_v22 = vpop.f32.mrf.mxu1 }
 0x4a6   : > { %v3406_v18 = vpop.f32.mrf.mxu2 }
 0x4a7   : > { %v8379_v18 = vor.u32 %v9761_v4, %v8378_v37  ;;  %v8356_v37 = vld [vmem:[#allocation9 + $0x838] sm:$0xf0] }
 0x4a8   : > { %v11212_v60 = vpop.f32.mrf.mxu3  ;;  %v3613_v16 = vpop.f32.mrf.mxu0 }
 0x4a9   : > { %v3614_v31 = vadd.f32 %v3613_v16, %v3454_v25  ;;  %v8423_v16 = vor.u32 %v9770_v0, %v8420_v46  ;;  %4125 = vmatpush.bf16.msra.mxu2 %v8379_v18  ;;  %v11232_v25 = vperm.slane %v3866_v5, 0  ;;  %v8346_v18 = vld [vmem:[#allocation9 + $0x820] sm:$0xf] }
 0x4aa   : > { %v11214_v19 = vpop.f32.mrf.mxu1 }
 0x4ab   : > { %v3632_v61 = vadd.f32 %v3631_v22, %v3614_v31  ;;  %v8370_v22 = vld [vmem:[#allocation9 + $0x850] sm:$0xf]  ;;  %4182 = vmatpush.bf16.msrb.mxu1 %v8423_v16 }
 0x4ac   : > { %v8371_v36 = vor.u32 %v9759_v52, %v8370_v22  ;;  %v8348_v22 = vld [vmem:[#allocation9 + $0x828] sm:$0xf0]  ;;  %v3423_v52 = vadd.f32 %v11206_v56, %v11210_v42 }
 0x4ae   : > { %v3577_v28 = vpop.f32.mrf.mxu2  ;;  %4126 = vmatpush.bf16.msra.mxu2 %v8371_v36 }
 0x4af   : > { %v3578_v41 = vadd.f32 %v3577_v28, %v3418_v45  ;;  %v8418_v28 = vld [vmem:[#allocation9 + $0x8b0] sm:$0xf] }
 0x4b0   : > { %v11216_v8 = vpop.f32.mrf.mxu3  ;;  %v3615_v47 = vpop.f32.mrf.mxu0  ;;  %v8419_v30 = vor.u32 %v9771_v24, %v8418_v28 }
 0x4b1   : > { %v3616_v7 = vadd.f32 %v3615_v47, %v3456_v29  ;;  %v3596_v55 = vadd.f32 %v11212_v60, %v3578_v41  ;;  %v8362_v47 = vld [vmem:[#allocation9 + $0x840] sm:$0xf]  ;;  %v3459_v60 = vadd.f32 %v11202_v1, %v11208_v10  ;;  %v8367_v1 = vor.u32 %v9756_v13, %v8364_v62  ;;  %v9754_v41 = vld [vmem:[#allocation9 + $0x834] sm:$0xf]  ;;  %v8488_v62 = vld [vmem:[#allocation9 + $0x7f8] sm:$0xf0] }
 0x4b2   : > { %v11218_v26 = vpop.f32.mrf.mxu1  ;;  %4146 = vmatpush.bf16.msrb.mxu3 %v8419_v30  ;;  %v8359_v46 = vor.u32 %v9754_v41, %v8356_v37  ;;  %v9746_v13 = vld [vmem:[#allocation9 + $0x7f4] sm:$0xf] }
 0x4b3   : > { %v3634_v3 = vadd.f32 %v11214_v19, %v3616_v7  ;;  %v8354_v19 = vld [vmem:[#allocation9 + $0x830] sm:$0xf]  ;;  %v9752_v7 = vld [vmem:[#allocation9 + $0x824] sm:$0xf] }
 0x4b6   : > { %v11220_v6 = vpop.f32.mrf.mxu2 }
 0x4b7   : > { %v3580_v21 = vadd.f32 %v11220_v6, %v3420_v33  ;;  %v8478_v33 = vld [vmem:[#allocation9 + $0x7e0] sm:$0xf] }
 0x4b8   : > { %v11222_v34 = vpop.f32.mrf.mxu3  ;;  %v11224_v11 = vpop.f32.mrf.mxu0 }
 0x4b9   : > { %v3619_v4 = vadd.f32 %v11224_v11, %v3459_v60  ;;  %v9745_v60 = vld [vmem:[#allocation9 + $0x7e4] sm:$0xf0] }
 0x4ba   : > { %v3638_v57 = vpop.f32.mrf.mxu1 }
 0x4bb   : > { %v8383_v57 = vor.u32 %v9760_v58, %v8380_v23  ;;  %v9753_v23 = vld [vmem:[#allocation9 + $0x824] sm:$0xf0] }
 0x4bd   : > { %4161 = vmatpush.bf16.msrb.mxu0 %v8383_v57 }
 0x4be   : > { %v11226_v14 = vpop.f32.mrf.mxu2 }
 0x4c0   : > { %v3602_v50 = vpop.f32.mrf.mxu3  ;;  %v3620_v59 = vpop.f32.mrf.mxu0 }
 0x4c1   : > { %v8375_v59 = vor.u32 %v9758_v39, %v8372_v40  ;;  %v3637_v39 = vadd.f32 %v11218_v26, %v3619_v4  ;;  %v9747_v26 = vld [vmem:[#allocation9 + $0x7f4] sm:$0xf0] }
 0x4c2   : > { %v3850_v12 = vpop.f32.mrf.mxu1 }
 0x4c3   : > { %4162 = vmatpush.bf16.msrb.mxu0 %v8375_v59 }
 0x4c6   : > { %v3584_v63 = vpop.f32.mrf.mxu2 }
 0x4c7   : > { %4163 = vmatpush.bf16.msrb.mxu0 %v8367_v1  ;;  %v9742_v1 = vld [vmem:[#allocation9 + $0x7d4] sm:$0xf] }
 0x4c8   : > { %v3814_v38 = vpop.f32.mrf.mxu3  ;;  %v3832_v53 = vpop.f32.mrf.mxu0 }
 0x4c9   : > { %v3851_v49 = vadd.f32 %v3850_v12, %v3832_v53  ;;  %v9757_v12 = vld [vmem:[#allocation9 + $0x844] sm:$0xf0]  ;;  %v8412_v53 = vld [vmem:[#allocation9 + $0x8a8] sm:$0xf0] }
 0x4ca   : > { %v3852_v27 = vpop.f32.mrf.mxu1  ;;  %v8363_v20 = vor.u32 %v9757_v12, %v8362_v47  ;;  %v8415_v10 = vor.u32 %v9768_v32, %v8412_v53  ;;  %v8351_v47 = vor.u32 %v9752_v7, %v8348_v22  ;;  %v8486_v12 = vld [vmem:[#allocation9 + $0x7f0] sm:$0xf]  ;;  %v8480_v32 = vld [vmem:[#allocation9 + $0x7e8] sm:$0xf0]  ;;  %v9743_v53 = vld [vmem:[#allocation9 + $0x7d4] sm:$0xf0] }
 0x4cb   : > { %v3860_v15 = vadd.f32 %v3851_v49, %v3632_v61  ;;  %v9755_v61 = vld [vmem:[#allocation9 + $0x834] sm:$0xf0]  ;;  %4164 = vmatpush.bf16.msrb.mxu0 %v8359_v46 }
 0x4cc   : > { %4183 = vmatpush.bf16.msrb.mxu1 %v8415_v10  ;;  %4127 = vmatpush.bf16.msra.mxu2 %v8363_v20  ;;  %v8355_v58 = vor.u32 %v9755_v61, %v8354_v19  ;;  %v8472_v10 = vld [vmem:[#allocation9 + $0x7d8] sm:$0xf0] }
 0x4cd   : > { %v3873_v35 = vadd.f32 %v11228_v54, %v3860_v15  ;;  %v3598_v15 = vadd.f32 %v11216_v8, %v3580_v21 }
 0x4ce   : > { %v3796_v50 = vpop.f32.mrf.mxu2 }
 0x4cf   : > { %vm3879_vm14 = vcmp.ge.f32.partialorder %v3873_v35, 0.0  ;;  %v3885_v2 = vmul.f32 0.01, %v3873_v35  ;;  %v3815_v17 = vadd.f32 %v3814_v38, %v3796_v50  ;;  %v8411_v38 = vor.u32 %v9769_v44, %v8410_v9  ;;  %4165 = vmatpush.bf16.msrb.mxu0 %v8351_v47  ;;  %v8456_v47 = vld [vmem:[#allocation9 + $0x7b8] sm:$0xf0] }
 0x4d0   : > { %v3816_v31 = vpop.f32.mrf.mxu3  ;;  %v3834_v63 = vpop.f32.mrf.mxu0  ;;  %4128 = vmatpush.bf16.msra.mxu2 %v8355_v58  ;;  %v3583_v50 = vadd.f32 %v11226_v14, %v3423_v52  ;;  %v8479_v44 = vor.u32 %v9745_v60, %v8478_v33  ;;  %v9736_v33 = vld [vmem:[#allocation9 + $0x7a4] sm:$0xf]  ;;  %v8448_v60 = vld [vmem:[#allocation9 + $0x7a8] sm:$0xf0] }
 0x4d1   : > { %v3891_v43 = vsel %vm3879_vm14, %v3873_v35, %v3885_v2  ;;  %v3859_v45 = vadd.f32 %v3815_v17, %v3596_v55  ;;  %v3853_v5 = vadd.f32 %v3852_v27, %v3834_v63  ;;  %4147 = vmatpush.bf16.msrb.mxu3 %v8411_v38  ;;  %v8347_v55 = vor.u32 %v9753_v23, %v8346_v18  ;;  %v9744_v63 = vld [vmem:[#allocation9 + $0x7e4] sm:$0xf] }
 0x4d2   : > { %v3903_v48 = vrot.slane %v3891_v43, 7  ;;  %v3855_v51 = vpop.f32.mrf.mxu1  ;;  %v8487_v17 = vor.u32 %v9747_v26, %v8486_v12  ;;  %v3601_v20 = vadd.f32 %v11222_v34, %v3583_v50  ;;  %v8470_v43 = vld [vmem:[#allocation9 + $0x7d0] sm:$0xf]  ;;  %v9739_v50 = vld [vmem:[#allocation9 + $0x7b4] sm:$0xf0] }
 0x4d3   : > { %v3872_v49 = vadd.f32 %v11232_v25, %v3859_v45  ;;  %v3862_v29 = vadd.f32 %v3853_v5, %v3634_v3  ;;  %v8471_v41 = vor.u32 %v9743_v53, %v8470_v43  ;;  %v8502_v12 = vld [vmem:[#allocation9 + $0x810] sm:$0xf]  ;;  %v9751_v26 = vld [vmem:[#allocation9 + $0x814] sm:$0xf0]  ;;  %v8496_v43 = vld [vmem:[#allocation9 + $0x808] sm:$0xf0] }
 0x4d4   : > { %3919 = vst.msk [vmem:[#allocation3 + $0x8] sm:$0xfe] %vm989_vm13, %v3903_v48  ;;  %4129 = vmatpush.bf16.msra.mxu2 %v8347_v55  ;;  %v8454_v55 = vld [vmem:[#allocation9 + $0x7b0] sm:$0xf]  ;;  %v9734_v53 = vld [vmem:[#allocation9 + $0x794] sm:$0xf] }
 0x4d5   : > { %vm3878_vm15 = vcmp.ge.f32.partialorder %v3872_v49, 0.0  ;;  %v3884_v6 = vmul.f32 0.01, %v3872_v49  ;;  %v3875_v27 = vadd.f32 %v11228_v54, %v3862_v29 }
 0x4d6   : > { %v3798_v0 = vpop.f32.mrf.mxu2 }
 0x4d7   : > { %v3890_v16 = vsel %vm3878_vm15, %v3872_v49, %v3884_v6  ;;  %vm3881_vm3 = vcmp.ge.f32.partialorder %v3875_v27, 0.0  ;;  %v3887_v11 = vmul.f32 0.01, %v3875_v27  ;;  %v3817_v57 = vadd.f32 %v3816_v31, %v3798_v0  ;;  %v8504_v0 = vld [vmem:[#allocation9 + $0x818] sm:$0xf0] }
 0x4d8   : > { %v3902_v35 = vrot.slane %v3890_v16, 7  ;;  %v3819_v36 = vpop.f32.mrf.mxu3  ;;  %v3837_v40 = vpop.f32.mrf.mxu0  ;;  %v8491_v31 = vor.u32 %v9746_v13, %v8488_v62  ;;  %4300 = vmatpush.bf16.msrb.mxu2 %v8487_v17  ;;  %v8475_v6 = vor.u32 %v9742_v1, %v8472_v10  ;;  %v8462_v16 = vld [vmem:[#allocation9 + $0x7c0] sm:$0xf]  ;;  %v8503_v17 = vor.u32 %v9751_v26, %v8502_v12  ;;  %v9737_v62 = vld [vmem:[#allocation9 + $0x7a4] sm:$0xf0] }
 0x4d9   : > { %v3893_v8 = vsel %vm3881_vm3, %v3875_v27, %v3887_v11  ;;  %v3861_v28 = vadd.f32 %v3817_v57, %v3598_v15  ;;  %v3856_v24 = vadd.f32 %v3855_v51, %v3837_v40  ;;  %v8483_v51 = vor.u32 %v9744_v63, %v8480_v32  ;;  %v9750_v15 = vld [vmem:[#allocation9 + $0x814] sm:$0xf]  ;;  %v9741_v11 = vld [vmem:[#allocation9 + $0x7c4] sm:$0xf0]  ;;  %v8446_v13 = vld [vmem:[#allocation9 + $0x7a0] sm:$0xf] }
 0x4da   : > { %3918 = vst [vmem:[#allocation3] sm:$0xfe] %v3902_v35  ;;  %v3906_v59 = vrot.slane %v3893_v8, 7  ;;  %v3857_v30 = vpop.f32.mrf.mxu1  ;;  %4336 = vmatpush.bf16.msra.mxu0 %v8491_v31  ;;  %v8463_v52 = vor.u32 %v9741_v11, %v8462_v16  ;;  %v9749_v31 = vld [vmem:[#allocation9 + $0x804] sm:$0xf0]  ;;  %4324 = vmatpush.bf16.msra.mxu3 %v8503_v17 }
 0x4db   : > { %v3874_v56 = vadd.f32 %v11232_v25, %v3861_v28  ;;  %v3864_v42 = vadd.f32 %v3856_v24, %v3637_v39  ;;  %v3956_v4 = vld [vmem:[#allocation3 + $0x8] sm:$0xfe]  ;;  %v8455_v30 = vor.u32 %v9739_v50, %v8454_v55  ;;  %v9787_v16 = vld [vmem:[#allocation9 + $0x934] sm:$0xf0]  ;;  %v9786_v11 = vld [vmem:[#allocation9 + $0x934] sm:$0xf] }
 0x4dc   : > { %v3907_v2 = vsel %vm971_vm10, %v3903_v48, %v3906_v59  ;;  %4301 = vmatpush.bf16.msrb.mxu2 %v8479_v44  ;;  %v9740_v39 = vld [vmem:[#allocation9 + $0x7c4] sm:$0xf]  ;;  %v8451_v44 = vor.u32 %v9736_v33, %v8448_v60  ;;  %v9782_v55 = vld [vmem:[#allocation9 + $0x914] sm:$0xf]  ;;  %v8556_v50 = vld [vmem:[#allocation9 + $0x918] sm:$0xf0] }
 0x4dd   : > { %3921 = vst.msk [vmem:[#allocation3 + $0x18] sm:$0xff] %vm958_vm6, %v3907_v2  ;;  %vm3880_vm13 = vcmp.ge.f32.partialorder %v3874_v56, 0.0  ;;  %v3886_v14 = vmul.f32 0.01, %v3874_v56  ;;  %v3877_v3 = vadd.f32 %v11228_v54, %v3864_v42  ;;  %v9748_v63 = vld [vmem:[#allocation9 + $0x804] sm:$0xf]  ;;  %v8559_v12 = vor.u32 %v9782_v55, %v8556_v50 }
 0x4de   : > { %v3801_v9 = vpop.f32.mrf.mxu2  ;;  %4337 = vmatpush.bf16.msra.mxu0 %v8483_v51  ;;  %v8546_v26 = vld [vmem:[#allocation9 + $0x900] sm:$0xf]  ;;  %v9781_v17 = vld [vmem:[#allocation9 + $0x904] sm:$0xf0]  ;;  %v8548_v33 = vld [vmem:[#allocation9 + $0x908] sm:$0xf0] }
 0x4df   : > { %v3892_v45 = vsel %vm3880_vm13, %v3874_v56, %v3886_v14  ;;  %vm3883_vm4 = vcmp.ge.f32.partialorder %v3877_v3, 0.0  ;;  %v3889_v5 = vmul.f32 0.01, %v3877_v3  ;;  %v3820_v38 = vadd.f32 %v3819_v36, %v3801_v9 }
 0x4e0   : > { %v3904_v21 = vrot.slane %v3892_v45, 7  ;;  %v3821_v48 = vpop.f32.mrf.mxu3  ;;  %v3839_v54 = vpop.f32.mrf.mxu0  ;;  %4302 = vmatpush.bf16.msrb.mxu2 %v8471_v41  ;;  %v8447_v14 = vor.u32 %v9737_v62, %v8446_v13  ;;  %v8438_v45 = vld [vmem:[#allocation9 + $0x790] sm:$0xf]  ;;  %v9733_v41 = vld [vmem:[#allocation9 + $0x784] sm:$0xf0] }
 0x4e1   : > { %v3895_v19 = vsel %vm3883_vm4, %v3877_v3, %v3889_v5  ;;  %v3863_v34 = vadd.f32 %v3820_v38, %v3601_v20  ;;  %v3955_v29 = vld [vmem:[#allocation3] sm:$0xfe]  ;;  %v8494_v3 = vld [vmem:[#allocation9 + $0x800] sm:$0xf]  ;;  %v8499_v5 = vor.u32 %v9748_v63, %v8496_v43  ;;  %v9780_v62 = vld [vmem:[#allocation9 + $0x904] sm:$0xf] }
 0x4e2   : > { %v11255_v61 = vsel %vm971_vm10, %v3902_v35, %v3904_v21  ;;  %v3910_v49 = vrot.slane %v3895_v19, 7  ;;  %4338 = vmatpush.bf16.msra.mxu0 %v8475_v6  ;;  %v8464_v35 = vld [vmem:[#allocation9 + $0x7c8] sm:$0xf0]  ;;  %v8495_v32 = vor.u32 %v9749_v31, %v8494_v3  ;;  %v9735_v38 = vld [vmem:[#allocation9 + $0x794] sm:$0xf0] }
 0x4e3   : > { %v3876_v37 = vadd.f32 %v11232_v25, %v3863_v34  ;;  %v11264_v23 = vpack.c.bf16 %v11255_v61, %v3955_v29  ;;  %v8507_v25 = vor.u32 %v9750_v15, %v8504_v0  ;;  %v8467_v40 = vor.u32 %v9740_v39, %v8464_v35  ;;  %v8430_v29 = vld [vmem:[#allocation9 + $0x780] sm:$0xf]  ;;  %v9784_v35 = vld [vmem:[#allocation9 + $0x924] sm:$0xf]  ;;  %v8538_v31 = vld [vmem:[#allocation9 + $0x8f0] sm:$0xf] }
 0x4e4   : > { %v3911_v27 = vsel %vm971_vm10, %v3906_v59, %v3910_v49  ;;  %v11259_v58 = vld [vmem:[#allocation3 + $0x18] sm:$0xff]  ;;  %4303 = vmatpush.bf16.msrb.mxu2 %v8463_v52  ;;  %v8439_v1 = vor.u32 %v9735_v38, %v8438_v45  ;;  %4325 = vmatpush.bf16.msra.mxu3 %v8495_v32  ;;  %v9785_v52 = vld [vmem:[#allocation9 + $0x924] sm:$0xf0]  ;;  %v9779_v63 = vld [vmem:[#allocation9 + $0x8f4] sm:$0xf0] }
 0x4e5   : > { %3923 = vst.msk [vmem:[#allocation3 + $0x28] sm:$0x1f] %vm994_vm1, %v3911_v27  ;;  %vm3882_vm5 = vcmp.ge.f32.partialorder %v3876_v37, 0.0  ;;  %v3888_v46 = vmul.f32 0.01, %v3876_v37  ;;  %v3960_v18 = vpack.c.bf16 %v11259_v58, %v3956_v4  ;;  %4360 = vmatpush.bf16.msra.mxu1 %v8507_v25  ;;  %v3987_v28 = vshll.u32 %v11264_v23, 16 }
 0x4e6   : > { %v3803_v7 = vpop.f32.mrf.mxu2  ;;  %v9738_v59 = vld [vmem:[#allocation9 + $0x7b4] sm:$0xf]  ;;  %4339 = vmatpush.bf16.msra.mxu0 %v8467_v40  ;;  %v3985_v4 = vshrl.u32 %v11264_v23, 16  ;;  %v8432_v27 = vld [vmem:[#allocation9 + $0x788] sm:$0xf0] }
 0x4e7   : > { %v3894_v57 = vsel %vm3882_vm5, %v3876_v37, %v3888_v46  ;;  %v3999_v22 = vshll.u32 %v3960_v18, 16  ;;  %v8459_v42 = vor.u32 %v9738_v59, %v8456_v47  ;;  %v3997_v20 = vshrl.u32 %v3960_v18, 16  ;;  %v9732_v37 = vld [vmem:[#allocation9 + $0x784] sm:$0xf]  ;;  %v8570_v25 = vld [vmem:[#allocation9 + $0x930] sm:$0xf] }
 0x4e8   : > { %v3908_v36 = vrot.slane %v3894_v57, 7  ;;  %4304 = vmatpush.bf16.msrb.mxu2 %v8455_v30  ;;  %v3989_v34 = vrot.slane %v3987_v28, 1  ;;  %v8431_v46 = vor.u32 %v9733_v41, %v8430_v29  ;;  %v8435_v18 = vor.u32 %v9732_v37, %v8432_v27  ;;  %v8572_v23 = vld [vmem:[#allocation9 + $0x938] sm:$0xf0]  ;;  %v8554_v28 = vld [vmem:[#allocation9 + $0x910] sm:$0xf] }
 0x4e9   : > { %v4001_v8 = vrot.slane %v3999_v22, 1  ;;  %4361 = vmatpush.bf16.msra.mxu1 %v8499_v5  ;;  %v8571_v57 = vor.u32 %v9787_v16, %v8570_v25  ;;  %v8562_v22 = vld [vmem:[#allocation9 + $0x920] sm:$0xf]  ;;  %v8575_v39 = vor.u32 %v9786_v11, %v8572_v23  ;;  %v8586_v32 = vld [vmem:[#allocation9 + $0x950] sm:$0xf]  ;;  %v3924_v16 = vld [vmem:[#allocation3] sm:$0xff] }
 0x4ea   : > { %v3909_v24 = vsel %vm971_vm10, %v3904_v21, %v3908_v36  ;;  %4340 = vmatpush.bf16.msra.mxu0 %v8459_v42  ;;  %v8440_v21 = vld [vmem:[#allocation9 + $0x798] sm:$0xf0]  ;;  %v3990_v15 = vor.u32 %v3989_v34, %v3985_v4  ;;  %v8564_v36 = vld [vmem:[#allocation9 + $0x928] sm:$0xf0]  ;;  %v8563_v40 = vor.u32 %v9785_v52, %v8562_v22  ;;  %v9791_v43 = vld [vmem:[#allocation9 + $0x954] sm:$0xf0]  ;;  %v3930_v22 = vpack.c.bf16 %v11255_v61, %v3924_v16 }
 0x4eb   : > { %3922 = vst [vmem:[#allocation3 + $0x20] sm:$0x1f] %v3909_v24  ;;  %v4002_v48 = vor.u32 %v4001_v8, %v3997_v20  ;;  %v8443_v49 = vor.u32 %v9734_v53, %v8440_v21  ;;  %v8567_v8 = vor.u32 %v9784_v35, %v8564_v36  ;;  %v9783_v24 = vld [vmem:[#allocation9 + $0x914] sm:$0xf0]  ;;  %v8588_v42 = vld [vmem:[#allocation9 + $0x958] sm:$0xf0]  ;;  %v8587_v5 = vor.u32 %v9791_v43, %v8586_v32 }
 0x4ec   : > { %v3958_v56 = vld [vmem:[#allocation3 + $0x28] sm:$0x1f]  ;;  %4305 = vmatpush.bf16.msrb.mxu2 %v8447_v14  ;;  %v8555_v30 = vor.u32 %v9783_v24, %v8554_v28  ;;  %v8551_v14 = vor.u32 %v9780_v62, %v8548_v33  ;;  %v9778_v20 = vld [vmem:[#allocation9 + $0x8f4] sm:$0xf]  ;;  %v9777_v53 = vld [vmem:[#allocation9 + $0x8e4] sm:$0xf0] }
 0x4ed   : > { %v11268_v2 = vpack.c.bf16 %v3958_v56, %v3958_v56  ;;  %v9790_v56 = vld [vmem:[#allocation9 + $0x954] sm:$0xf]  ;;  %v8530_v38 = vld [vmem:[#allocation9 + $0x8e0] sm:$0xf]  ;;  %v9776_v21 = vld [vmem:[#allocation9 + $0x8e4] sm:$0xf] }
 0x4ee   : > { %4341 = vmatpush.bf16.msra.mxu0 %v8451_v44  ;;  %v8591_v13 = vor.u32 %v9790_v56, %v8588_v42  ;;  %v8540_v44 = vld [vmem:[#allocation9 + $0x8f8] sm:$0xf0]  ;;  %v8580_v34 = vld [vmem:[#allocation9 + $0x948] sm:$0xf0]  ;;  %v9775_v37 = vld [vmem:[#allocation9 + $0x8d4] sm:$0xf0] }
 0x4ef   : > { %v4004_v9 = vshll.u32 %v11268_v2, 16  ;;  %v4011_v59 = vshrl.u32 %v11268_v2, 16  ;;  %v8547_v2 = vor.u32 %v9781_v17, %v8546_v26  ;;  %v8543_v45 = vor.u32 %v9778_v20, %v8540_v44  ;;  %v9774_v4 = vld [vmem:[#allocation9 + $0x8d4] sm:$0xf]  ;;  %v3925_v27 = vld [vmem:[#allocation3 + $0x8] sm:$0xff]  ;;  %v9796_v43 = vld [vmem:[#allocation12 + $0x20] sm:$0xff] }
 0x4f0   : > { %4306 = vmatpush.bf16.msrb.mxu2 %v8439_v1  ;;  %v9789_v1 = vld [vmem:[#allocation9 + $0x944] sm:$0xf0]  ;;  %v9772_v25 = vld [vmem:[#allocation9 + $0x8c4] sm:$0xf]  ;;  %v3929_v52 = vld [vmem:[#allocation3 + $0x28] sm:$0xf] }
 0x4f1   : > { %v4006_v54 = vrot.slane %v4004_v9, 1  ;;  %v8539_v9 = vor.u32 %v9779_v63, %v8538_v31  ;;  %v4373_v28 = vld [vmem:[#allocation3 + $0x8] sm:$0xfc]  ;;  %v9797_v63 = vld [vmem:[#allocation12 + $0x28] sm:$0xff] }
 0x4f2   : > { %v3957_v51 = vld [vmem:[#allocation3 + $0x20] sm:$0x1f]  ;;  %4342 = vmatpush.bf16.msra.mxu0 %v8443_v49  ;;  %v8522_v49 = vld [vmem:[#allocation9 + $0x8d0] sm:$0xf]  ;;  %v4377_v24 = vpack.c.bf16 %v11259_v58, %v4373_v28  ;;  %v9799_v33 = vld [vmem:[#allocation12 + $0x38] sm:$0xff] }
 0x4f3   : > { %v4007_v10 = vsel %vm1055_vm0, %v4002_v48, %v4006_v54  ;;  %v11272_v19 = vpack.c.bf16 %v3957_v51, %v3957_v51  ;;  %v4013_v47 = vor.u32 %v4011_v59, %v4006_v54  ;;  %v8531_v48 = vor.u32 %v9777_v53, %v8530_v38  ;;  %v8532_v54 = vld [vmem:[#allocation9 + $0x8e8] sm:$0xf0]  ;;  %v8578_v51 = vld [vmem:[#allocation9 + $0x940] sm:$0xf]  ;;  %v3928_v35 = vld [vmem:[#allocation3 + $0x20] sm:$0xf] }
 0x4f4   : > { %8424 = vmatmul.msk.bf16.vlgmr.msrb.gmra.mxu3 %vm958_vm6, %v4007_v10  ;;  %8426 = vmatmul.msk.bf16.vlgmr.msrb.gmra.mxu1 %vm958_vm6, %v4007_v10  ;;  %v8579_v10 = vor.u32 %v9789_v1, %v8578_v51  ;;  %v8535_v29 = vor.u32 %v9776_v21, %v8532_v54  ;;  %v3932_v36 = vpack.c.bf16 %v3928_v35, %v3928_v35  ;;  %v4374_v55 = vld [vmem:[#allocation3 + $0x20] sm:$0x3f]  ;;  %v9795_v38 = vld [vmem:[#allocation12 + $0x18] sm:$0xff]  ;;  %v9808_v1 = vld [vmem:[#allocation12 + $0x80] sm:$0xff] }
 0x4f5   : > { %v3992_v6 = vshll.u32 %v11272_v19, 16  ;;  %4307 = vmatpush.bf16.msrb.mxu2 %v8431_v46  ;;  %v4008_v60 = vshrl.u32 %v11272_v19, 16  ;;  %4579 = vmatpush.bf16.msrb.mxu1 %v8591_v13  ;;  %v9788_v19 = vld [vmem:[#allocation9 + $0x944] sm:$0xf]  ;;  %v4372_v59 = vld [vmem:[#allocation3] sm:$0xfc] }
 0x4f6   : > { %4343 = vmatpush.bf16.msra.mxu0 %v8435_v18  ;;  %4543 = vmatpush.bf16.msrb.mxu3 %v8587_v5  ;;  %v8583_v41 = vor.u32 %v9788_v19, %v8580_v34  ;;  %v8514_v18 = vld [vmem:[#allocation9 + $0x8c0] sm:$0xf]  ;;  %v4376_v56 = vpack.c.bf16 %v11255_v61, %v4372_v59  ;;  %v9809_v5 = vld [vmem:[#allocation12 + $0x88] sm:$0xff] }
 0x4f7   : > { %v3994_v0 = vrot.slane %v3992_v6, 1  ;;  %v8524_v6 = vld [vmem:[#allocation9 + $0x8d8] sm:$0xf0]  ;;  %v9819_v53 = vld [vmem:[#allocation12 + $0xd8] sm:$0xff]  ;;  %v9805_v16 = vld [vmem:[#allocation12 + $0x68] sm:$0xff] }
 0x4f8   : > { %v8527_v46 = vor.u32 %v9774_v4, %v8524_v6  ;;  %v4405_v26 = vrot.slane %v4376_v56, 1  ;;  %v9811_v19 = vld [vmem:[#allocation12 + $0x98] sm:$0xff]  ;;  %v9806_v6 = vld [vmem:[#allocation12 + $0x70] sm:$0xff]  ;;  %v9837_v35 = vld [vmem:[#allocation12 + $0x168] sm:$0xff] }
 0x4f9   : > { %v3995_v7 = vsel %vm1055_vm0, %v3990_v15, %v3994_v0  ;;  %v4010_v3 = vor.u32 %v4008_v60, %v3994_v0  ;;  %4580 = vmatpush.bf16.msrb.mxu1 %v8583_v41  ;;  %v8523_v15 = vor.u32 %v9775_v37, %v8522_v49  ;;  %v3931_v0 = vpack.c.bf16 %v11259_v58, %v3925_v27  ;;  %v9818_v49 = vld [vmem:[#allocation12 + $0xd0] sm:$0xff]  ;;  %v9793_v41 = vld [vmem:[#allocation12 + $0x8] sm:$0xff]  ;;  %v9792_v27 = vld [vmem:[#allocation12] sm:$0xff] }
 0x4fa   : > { %4130 = vmatmul.bf16.vlgmr.msra.gmra.mxu2 %v3995_v7  ;;  %4166 = vmatmul.bf16.vlgmr.msrb.gmra.mxu0 %v3995_v7  ;;  %v9773_v7 = vld [vmem:[#allocation9 + $0x8c4] sm:$0xf0]  ;;  %v9817_v37 = vld [vmem:[#allocation12 + $0xc8] sm:$0xff]  ;;  %v9810_v28 = vld [vmem:[#allocation12 + $0x90] sm:$0xff] }
 0x4fb   : > { %4519 = vmatpush.bf16.msra.mxu2 %v8571_v57  ;;  %4555 = vmatpush.bf16.msrb.mxu0 %v8575_v39  ;;  %v8515_v11 = vor.u32 %v9773_v7, %v8514_v18  ;;  %v8516_v57 = vld [vmem:[#allocation9 + $0x8c8] sm:$0xf0]  ;;  %v3933_v39 = vpack.c.bf16 %v3929_v52, %v3929_v52  ;;  %v9839_v18 = vld [vmem:[#allocation12 + $0x178] sm:$0xff] }
 0x4fc   : > { %4544 = vmatpush.bf16.msrb.mxu3 %v8579_v10  ;;  %v8519_v23 = vor.u32 %v9772_v25, %v8516_v57  ;;  %v9794_v10 = vld [vmem:[#allocation12 + $0x10] sm:$0xff]  ;;  %v9816_v7 = vld [vmem:[#allocation12 + $0xc0] sm:$0xff] }
 0x4ff   : > { %4520 = vmatpush.bf16.msra.mxu2 %v8563_v40  ;;  %4556 = vmatpush.bf16.msrb.mxu0 %v8567_v8  ;;  %v4375_v40 = vld [vmem:[#allocation3 + $0x28] sm:$0x3f] }
 0x500   : > { %v4379_v8 = vpack.c.bf16 %v4375_v40, %v4375_v40 }
 0x502   : > { %v4409_v50 = vrot.slane %v4379_v8, 1  ;;  %v9803_v8 = vld [vmem:[#allocation12 + $0x58] sm:$0xff] }
 0x503   : > { %4521 = vmatpush.bf16.msra.mxu2 %v8555_v30  ;;  %4557 = vmatpush.bf16.msrb.mxu0 %v8559_v12  ;;  %v4408_v30 = vrot.slane %v4377_v24, 1 }
 0x504   : > { %8425 = vmatmul.msk.bf16.gmra.mxu3 %vm958_vm6, %v4013_v47  ;;  %8427 = vmatmul.msk.bf16.gmra.mxu1 %vm958_vm6, %v4013_v47  ;;  %v4378_v47 = vpack.c.bf16 %v4374_v55, %v4374_v55 }
 0x505   : > { %v4410_v12 = vsel %vm1477_vm2, %v4408_v30, %v4409_v50  ;;  %v9813_v30 = vld [vmem:[#allocation12 + $0xa8] sm:$0xff] }
 0x506   : > { %v4406_v42 = vrot.slane %v4378_v47, 1 }
 0x507   : > { %4522 = vmatpush.bf16.msra.mxu2 %v8547_v2  ;;  %4558 = vmatpush.bf16.msrb.mxu0 %v8551_v14 }
 0x508   : > { %v4407_v13 = vsel %vm1477_vm2, %v4405_v26, %v4406_v42  ;;  %v9835_v26 = vld [vmem:[#allocation12 + $0x158] sm:$0xff] }
 0x50a   : > { %4135 = vmatmul.bf16.gmra.mxu2 %v4010_v3  ;;  %4171 = vmatmul.bf16.gmra.mxu0 %v4010_v3  ;;  %v9798_v3 = vld [vmem:[#allocation12 + $0x30] sm:$0xff] }
 0x50b   : > { %4523 = vmatpush.bf16.msra.mxu2 %v8539_v9  ;;  %4559 = vmatpush.bf16.msrb.mxu0 %v8543_v45 }
 0x50f   : > { %4524 = vmatpush.bf16.msra.mxu2 %v8531_v48  ;;  %4560 = vmatpush.bf16.msrb.mxu0 %v8535_v29  ;;  %v9807_v29 = vld [vmem:[#allocation12 + $0x78] sm:$0xff] }
 0x513   : > { %4525 = vmatpush.bf16.msra.mxu2 %v8523_v15  ;;  %4561 = vmatpush.bf16.msrb.mxu0 %v8527_v46 }
 0x514   : > { %8508 = vmatmul.msk.bf16.vlgmr.msra.gmra.mxu3 %vm958_vm6, %v3931_v0  ;;  %8510 = vmatmul.msk.bf16.vlgmr.msra.gmra.mxu1 %vm958_vm6, %v3931_v0 }
 0x515   : > { %4944 = vmatpush.bf16.msra.mxu1 %v9819_v53  ;;  %4760 = vmatpush.bf16.msra.mxu3 %v9811_v19  ;;  %v9833_v53 = vld [vmem:[#allocation12 + $0x148] sm:$0xff] }
 0x517   : > { %4526 = vmatpush.bf16.msra.mxu2 %v8515_v11  ;;  %4562 = vmatpush.bf16.msrb.mxu0 %v8519_v23  ;;  %v9838_v23 = vld [vmem:[#allocation12 + $0x170] sm:$0xff] }
 0x519   : > { %4945 = vmatpush.bf16.msra.mxu1 %v9818_v49  ;;  %4761 = vmatpush.bf16.msra.mxu3 %v9810_v28  ;;  %v9832_v49 = vld [vmem:[#allocation12 + $0x140] sm:$0xff] }
 0x51a   : > { %4308 = vmatmul.bf16.vlgmr.msrb.gmra.mxu2 %v3930_v22  ;;  %4344 = vmatmul.bf16.vlgmr.msra.gmra.mxu0 %v3930_v22  ;;  %v9815_v22 = vld [vmem:[#allocation12 + $0xb8] sm:$0xff] }
 0x51b   : > { %4829 = vmatpush.bf16.msra.mxu0 %v9799_v33  ;;  %4741 = vmatpush.bf16.msrb.mxu2 %v9809_v5 }
 0x51d   : > { %4946 = vmatpush.bf16.msra.mxu1 %v9817_v37 }
 0x51f   : > { %4830 = vmatpush.bf16.msra.mxu0 %v9798_v3  ;;  %4742 = vmatpush.bf16.msrb.mxu2 %v9808_v1 }
 0x521   : > { %4947 = vmatpush.bf16.msra.mxu1 %v9816_v7 }
 0x523   : > { %4831 = vmatpush.bf16.msra.mxu0 %v9797_v63  ;;  %4743 = vmatpush.bf16.msrb.mxu2 %v9807_v29 }
 0x524   : > { %8509 = vmatmul.msk.bf16.gmra.mxu3 %vm958_vm6, %v3933_v39  ;;  %8511 = vmatmul.msk.bf16.gmra.mxu1 %vm958_vm6, %v3933_v39  ;;  %v9804_v39 = vld [vmem:[#allocation12 + $0x60] sm:$0xff] }
 0x525   : > { %4948 = vmatpush.bf16.msra.mxu1 %v9815_v22 }
 0x527   : > { %4832 = vmatpush.bf16.msra.mxu0 %v9796_v43  ;;  %4744 = vmatpush.bf16.msrb.mxu2 %v9806_v6 }
 0x52a   : > { %4313 = vmatmul.bf16.gmra.mxu2 %v3932_v36  ;;  %4349 = vmatmul.bf16.gmra.mxu0 %v3932_v36  ;;  %v9814_v36 = vld [vmem:[#allocation12 + $0xb0] sm:$0xff] }
 0x52b   : > { %4833 = vmatpush.bf16.msra.mxu0 %v9795_v38  ;;  %4745 = vmatpush.bf16.msrb.mxu2 %v9805_v16  ;;  %v9820_v38 = vld [vmem:[#allocation12 + $0xe0] sm:$0xff] }
 0x52c   : > { %4949 = vmatpush.bf16.msra.mxu1 %v9814_v36  ;;  %v9831_v36 = vld [vmem:[#allocation12 + $0x138] sm:$0xff] }
 0x52f   : > { %4834 = vmatpush.bf16.msra.mxu0 %v9794_v10  ;;  %4746 = vmatpush.bf16.msrb.mxu2 %v9804_v39 }
 0x530   : > { %4950 = vmatpush.bf16.msra.mxu1 %v9813_v30 }
 0x533   : > { %4835 = vmatpush.bf16.msra.mxu0 %v9793_v41  ;;  %4747 = vmatpush.bf16.msrb.mxu2 %v9803_v8 }
 0x534   : > { %8592 = vmatmul.msk.bf16.vlgmr.msrb.gmra.mxu3 %vm958_vm6, %v4410_v12  ;;  %8594 = vmatmul.msk.bf16.vlgmr.msrb.gmra.mxu1 %vm958_vm6, %v4410_v12  ;;  %v9802_v12 = vld [vmem:[#allocation12 + $0x50] sm:$0xff] }
 0x537   : > { %4836 = vmatpush.bf16.msra.mxu0 %v9792_v27  ;;  %4748 = vmatpush.bf16.msrb.mxu2 %v9802_v12 }
 0x53a   : > { %4527 = vmatmul.bf16.vlgmr.msra.gmra.mxu2 %v4407_v13  ;;  %4563 = vmatmul.bf16.vlgmr.msrb.gmra.mxu0 %v4407_v13  ;;  %v9812_v13 = vld [vmem:[#allocation12 + $0xa0] sm:$0xff] }
 0x53b   : > { %5172 = vmatpush.bf16.msrb.mxu0 %v9839_v18  ;;  %4951 = vmatpush.bf16.msra.mxu1 %v9812_v13  ;;  %v9851_v13 = vld [vmem:[#allocation12 + $0x1d8] sm:$0xff] }
 0x53f   : > { %5173 = vmatpush.bf16.msrb.mxu0 %v9838_v23 }
 0x543   : > { %5174 = vmatpush.bf16.msrb.mxu0 %v9837_v35 }
 0x544   : > { %8593 = vmatmul.msk.bf16.gmra.mxu3 %vm958_vm6, %v4409_v50  ;;  %8595 = vmatmul.msk.bf16.gmra.mxu1 %vm958_vm6, %v4409_v50  ;;  %v9836_v50 = vld [vmem:[#allocation12 + $0x160] sm:$0xff] }
 0x547   : > { %5175 = vmatpush.bf16.msrb.mxu0 %v9836_v50  ;;  %v9830_v50 = vld [vmem:[#allocation12 + $0x130] sm:$0xff] }
 0x54a   : > { %4532 = vmatmul.bf16.gmra.mxu2 %v4406_v42  ;;  %4568 = vmatmul.bf16.gmra.mxu0 %v4406_v42  ;;  %v9801_v42 = vld [vmem:[#allocation12 + $0x48] sm:$0xff] }
 0x54b   : > { %4848 = vmatpush.bf16.msra.mxu2 %v9801_v42  ;;  %5176 = vmatpush.bf16.msrb.mxu0 %v9835_v26  ;;  %v9829_v26 = vld [vmem:[#allocation12 + $0x128] sm:$0xff] }
 0x571   : > { %v11297_v58 = vpop.f32.mrf.mxu1 }
 0x577   : > { %v11299_v17 = vpop.f32.mrf.mxu3  ;;  %v11301_v61 = vpop.f32.mrf.mxu0 }
 0x578   : > { %v4186_v5 = vadd.f32 %v11297_v58, %v11301_v61  ;;  %v9840_v58 = vld [vmem:[#allocation12 + $0x180] sm:$0xff] }
 0x579   : > { %v11303_v62 = vpop.f32.mrf.mxu1 }
 0x57d   : > { %v11305_v60 = vpop.f32.mrf.mxu2 }
 0x57e   : > { %v4150_v1 = vadd.f32 %v11299_v17, %v11305_v60 }
 0x57f   : > { %v11307_v2 = vpop.f32.mrf.mxu3  ;;  %v11309_v14 = vpop.f32.mrf.mxu0 }
 0x580   : > { %v4188_v6 = vadd.f32 %v11303_v62, %v11309_v14 }
 0x581   : > { %v4190_v31 = vpop.f32.mrf.mxu1 }
 0x585   : > { %v11311_v20 = vpop.f32.mrf.mxu2 }
 0x587   : > { %v4154_v9 = vpop.f32.mrf.mxu3  ;;  %v4172_v44 = vpop.f32.mrf.mxu0 }
 0x588   : > { %v11313_v32 = vadd.f32 %v4190_v31, %v4172_v44  ;;  %v9800_v31 = vld [vmem:[#allocation12 + $0x40] sm:$0xff]  ;;  %v9821_v44 = vld [vmem:[#allocation12 + $0xe8] sm:$0xff] }
 0x589   : > { %v4192_v45 = vpop.f32.mrf.mxu1  ;;  %4849 = vmatpush.bf16.msra.mxu2 %v9800_v31  ;;  %4963 = vmatpush.bf16.msrb.mxu3 %v9821_v44 }
 0x58d   : > { %v4136_v21 = vpop.f32.mrf.mxu2  ;;  %4964 = vmatpush.bf16.msrb.mxu3 %v9820_v38 }
 0x58e   : > { %v11315_v48 = vadd.f32 %v4154_v9, %v4136_v21 }
 0x58f   : > { %v4156_v54 = vpop.f32.mrf.mxu3  ;;  %v4174_v51 = vpop.f32.mrf.mxu0 }
 0x590   : > { %v9841_v51 = vld [vmem:[#allocation12 + $0x188] sm:$0xff] }
 0x591   : > { %v11317_v34 = vpop.f32.mrf.mxu1  ;;  %5191 = vmatpush.bf16.msrb.mxu1 %v9841_v51  ;;  %v9849_v51 = vld [vmem:[#allocation12 + $0x1c8] sm:$0xff] }
 0x595   : > { %v4138_v4 = vpop.f32.mrf.mxu2  ;;  %5192 = vmatpush.bf16.msrb.mxu1 %v9840_v58 }
 0x597   : > { %v11319_v15 = vpop.f32.mrf.mxu3  ;;  %v4345_v0 = vpop.f32.mrf.mxu0 }
 0x598   : > { %v4346_v21 = vadd.f32 %v4345_v0, %v4186_v5 }
 0x599   : > { %v11321_v46 = vpop.f32.mrf.mxu1 }
 0x59a   : > { %v4364_v29 = vadd.f32 %v11317_v34, %v4346_v21 }
 0x59d   : > { %v11323_v25 = vpop.f32.mrf.mxu2 }
 0x59e   : > { %v4310_v61 = vadd.f32 %v11323_v25, %v4150_v1 }
 0x59f   : > { %v11325_v11 = vpop.f32.mrf.mxu3  ;;  %v11327_v57 = vpop.f32.mrf.mxu0 }
 0x5a0   : > { %v4348_v17 = vadd.f32 %v11327_v57, %v4188_v6  ;;  %v4328_v0 = vadd.f32 %v11319_v15, %v4310_v61  ;;  %v9847_v61 = vld [vmem:[#allocation12 + $0x1b8] sm:$0xff]  ;;  %v9824_v6 = vld [vmem:[#allocation12 + $0x100] sm:$0xff] }
 0x5a1   : > { %v4368_v52 = vpop.f32.mrf.mxu1 }
 0x5a2   : > { %v4366_v22 = vadd.f32 %v11321_v46, %v4348_v17  ;;  %v9846_v17 = vld [vmem:[#allocation12 + $0x1b0] sm:$0xff] }
 0x5a5   : > { %v11329_v40 = vpop.f32.mrf.mxu2 }
 0x5a7   : > { %v4332_v24 = vpop.f32.mrf.mxu3  ;;  %v4350_v55 = vpop.f32.mrf.mxu0 }
 0x5a8   : > { %v4351_v59 = vadd.f32 %v4350_v55, %v11313_v32  ;;  %v9834_v32 = vld [vmem:[#allocation12 + $0x150] sm:$0xff] }
 0x5a9   : > { %v4370_v47 = vpop.f32.mrf.mxu1  ;;  %5177 = vmatpush.bf16.msrb.mxu0 %v9834_v32  ;;  %v9828_v32 = vld [vmem:[#allocation12 + $0x120] sm:$0xff] }
 0x5aa   : > { %v11332_v56 = vadd.f32 %v4368_v52, %v4351_v59  ;;  %v9861_v59 = vld [vmem:[#allocation12 + $0x228] sm:$0xff] }
 0x5ad   : > { %v4314_v33 = vpop.f32.mrf.mxu2  ;;  %5178 = vmatpush.bf16.msrb.mxu0 %v9833_v53 }
 0x5ae   : > { %v4315_v3 = vadd.f32 %v4314_v33, %v11315_v48  ;;  %v4598_v48 = vld [vmem:[#allocation10 + $0x8] sm:$0x3] }
 0x5af   : > { %v4334_v63 = vpop.f32.mrf.mxu3  ;;  %v4352_v9 = vpop.f32.mrf.mxu0  ;;  %v4601_v37 = vperm.slane %v4598_v48, 1  ;;  %v11347_v16 = vperm.slane %v4598_v48, 0 }
 0x5b0   : > { %v11335_v43 = vadd.f32 %v4332_v24, %v4315_v3  ;;  %v9860_v9 = vld [vmem:[#allocation12 + $0x220] sm:$0xff] }
 0x5b1   : > { %v4582_v45 = vpop.f32.mrf.mxu1  ;;  %5179 = vmatpush.bf16.msrb.mxu0 %v9832_v49  ;;  %v9848_v49 = vld [vmem:[#allocation12 + $0x1c0] sm:$0xff] }
 0x5b5   : > { %v4316_v54 = vpop.f32.mrf.mxu2 }
 0x5b7   : > { %v4546_v10 = vpop.f32.mrf.mxu3  ;;  %v4564_v19 = vpop.f32.mrf.mxu0 }
 0x5b8   : > { %v4583_v41 = vadd.f32 %v4582_v45, %v4564_v19  ;;  %v9850_v45 = vld [vmem:[#allocation12 + $0x1d0] sm:$0xff] }
 0x5b9   : > { %v4584_v4 = vpop.f32.mrf.mxu1 }
 0x5ba   : > { %v4592_v27 = vadd.f32 %v4583_v41, %v4364_v29  ;;  %v9879_v29 = vld [vmem:[#allocation12 + $0x2b8] sm:$0xff] }
 0x5bc   : > { %v4605_v60 = vadd.f32 %v4601_v37, %v4592_v27  ;;  %v9868_v27 = vld [vmem:[#allocation12 + $0x260] sm:$0xff] }
 0x5bd   : > { %v4528_v18 = vpop.f32.mrf.mxu2 }
 0x5be   : > { %vm4611_vm10 = vcmp.ge.f32.partialorder %v4605_v60, 0.0  ;;  %v4617_v34 = vmul.f32 0.01, %v4605_v60  ;;  %v4547_v7 = vadd.f32 %v4546_v10, %v4528_v18  ;;  %v9826_v10 = vld [vmem:[#allocation12 + $0x110] sm:$0xff]  ;;  %v9867_v18 = vld [vmem:[#allocation12 + $0x258] sm:$0xff] }
 0x5bf   : > { %v11349_v23 = vpop.f32.mrf.mxu3  ;;  %v4566_v25 = vpop.f32.mrf.mxu0 }
 0x5c0   : > { %v4623_v52 = vsel %vm4611_vm10, %v4605_v60, %v4617_v34  ;;  %v4591_v62 = vadd.f32 %v4547_v7, %v4328_v0  ;;  %v4585_v14 = vadd.f32 %v4584_v4, %v4566_v25  ;;  %v9878_v4 = vld [vmem:[#allocation12 + $0x2b0] sm:$0xff]  ;;  %v9877_v60 = vld [vmem:[#allocation12 + $0x2a8] sm:$0xff]  ;;  %v9823_v0 = vld [vmem:[#allocation12 + $0xf8] sm:$0xff]  ;;  %v4152_v34 = vadd.f32 %v11307_v2, %v11311_v20 }
 0x5c1   : > { %v11352_v39 = vpack.c.bf16 %v4623_v52, %v4623_v52  ;;  %v4587_v57 = vpop.f32.mrf.mxu1  ;;  %v9845_v7 = vld [vmem:[#allocation12 + $0x1a8] sm:$0xff]  ;;  %v9876_v25 = vld [vmem:[#allocation12 + $0x2a0] sm:$0xff]  ;;  %v9875_v20 = vld [vmem:[#allocation12 + $0x298] sm:$0xff] }
 0x5c2   : > { %v4604_v35 = vadd.f32 %v11347_v16, %v4591_v62  ;;  %v4594_v15 = vadd.f32 %v4585_v14, %v4366_v22  ;;  %v4312_v22 = vadd.f32 %v11329_v40, %v4152_v34  ;;  %v9822_v62 = vld [vmem:[#allocation12 + $0xf0] sm:$0xff]  ;;  %v9844_v2 = vld [vmem:[#allocation12 + $0x1a0] sm:$0xff]  ;;  %v9885_v34 = vld [vmem:[#allocation12 + $0x2e8] sm:$0xff] }
 0x5c3   : > { %v11356_v8 = vshrl.u32 %v11352_v39, 16  ;;  %v4879_v1 = vrot.slane %v11352_v39, 1  ;;  %v5107_v58 = vrot.slane %v11352_v39, 2  ;;  %v9866_v14 = vld [vmem:[#allocation12 + $0x250] sm:$0xff]  ;;  %v5335_v40 = vrot.slane %v11352_v39, 3 }
 0x5c4   : > { %vm4610_vm0 = vcmp.ge.f32.partialorder %v4604_v35, 0.0  ;;  %v4616_v28 = vmul.f32 0.01, %v4604_v35  ;;  %v11358_v24 = vadd.f32 %v4601_v37, %v4594_v15  ;;  %v4330_v15 = vadd.f32 %v11325_v11, %v4312_v22  ;;  %v9864_v11 = vld [vmem:[#allocation12 + $0x240] sm:$0xff]  ;;  %v9906_v22 = vld [vmem:[#allocation12 + $0x390] sm:$0xff] }
 0x5c5   : > { %v11360_v55 = vpop.f32.mrf.mxu2  ;;  %8636 = vmatmul.msk.bf16.vlgmr.msra.gmra.mxu3 %vm958_vm6, %v11356_v8  ;;  %v4993_v52 = vrot.slane %v11356_v8, 1 }
 0x5c6   : > { %v4622_v46 = vsel %vm4610_vm0, %v4604_v35, %v4616_v28  ;;  %5077 = vmatpush.bf16.msra.mxu3 %v9831_v36  ;;  %v9859_v35 = vld [vmem:[#allocation12 + $0x218] sm:$0xff]  ;;  %v9865_v36 = vld [vmem:[#allocation12 + $0x248] sm:$0xff]  ;;  %vm4613_vm2 = vcmp.ge.f32.partialorder %v11358_v24, 0.0 }
 0x5c7   : > { %v11364_v30 = vpack.c.bf16 %v4622_v46, %v4622_v46  ;;  %v4551_v47 = vpop.f32.mrf.mxu3  ;;  %v4569_v12 = vpop.f32.mrf.mxu0  ;;  %v9858_v46 = vld [vmem:[#allocation12 + $0x210] sm:$0xff] }
 0x5c8   : > { %v4588_v42 = vadd.f32 %v4587_v57, %v4569_v12  ;;  %v4549_v57 = vadd.f32 %v11349_v23, %v11360_v55  ;;  %v5221_v55 = vrot.slane %v11356_v8, 2  ;;  %v9842_v12 = vld [vmem:[#allocation12 + $0x190] sm:$0xff] }
 0x5c9   : > { %v4589_v33 = vpop.f32.mrf.mxu1  ;;  %4837 = vmatmul.bf16.vlgmr.msra.gmra.mxu0 %v11364_v30  ;;  %v11368_v3 = vshrl.u32 %v11364_v30, 16  ;;  %v4878_v31 = vrot.slane %v11364_v30, 1  ;;  %v5106_v41 = vrot.slane %v11364_v30, 2 }
 0x5ca   : > { %v4596_v63 = vadd.f32 %v4588_v42, %v11332_v56  ;;  %5078 = vmatpush.bf16.msra.mxu3 %v9830_v50  ;;  %5419 = vmatpush.bf16.msra.mxu0 %v9861_v59  ;;  %v9827_v56 = vld [vmem:[#allocation12 + $0x118] sm:$0xff]  ;;  %v4593_v28 = vadd.f32 %v4549_v57, %v4330_v15  ;;  %v9874_v59 = vld [vmem:[#allocation12 + $0x290] sm:$0xff]  ;;  %v9873_v42 = vld [vmem:[#allocation12 + $0x288] sm:$0xff] }
 0x5cb   : > { %4749 = vmatmul.bf16.vlgmr.msrb.gmra.mxu2 %v11368_v3  ;;  %4952 = vmatmul.bf16.vlgmr.msra.gmra.mxu1 %v4878_v31  ;;  %v4992_v23 = vrot.slane %v11368_v3, 1  ;;  %v9843_v50 = vld [vmem:[#allocation12 + $0x198] sm:$0xff]  ;;  %v9856_v31 = vld [vmem:[#allocation12 + $0x200] sm:$0xff] }
 0x5cc   : > { %v11373_v44 = vadd.f32 %v4601_v37, %v4596_v63  ;;  %5058 = vmatpush.bf16.msrb.mxu2 %v9829_v26  ;;  %5305 = vmatpush.bf16.msra.mxu1 %v9851_v13  ;;  %v9869_v37 = vld [vmem:[#allocation12 + $0x268] sm:$0xff]  ;;  %v9871_v26 = vld [vmem:[#allocation12 + $0x278] sm:$0xff]  ;;  %v9872_v63 = vld [vmem:[#allocation12 + $0x280] sm:$0xff] }
 0x5cd   : > { %v4533_v5 = vpop.f32.mrf.mxu2  ;;  %v9863_v13 = vld [vmem:[#allocation12 + $0x238] sm:$0xff]  ;;  %v9904_v15 = vld [vmem:[#allocation12 + $0x380] sm:$0xff] }
 0x5ce   : > { %v4552_v38 = vadd.f32 %v4551_v47, %v4533_v5  ;;  %5420 = vmatpush.bf16.msra.mxu0 %v9860_v9  ;;  %v9857_v47 = vld [vmem:[#allocation12 + $0x208] sm:$0xff]  ;;  %v5220_v9 = vrot.slane %v11368_v3, 2  ;;  %vm4615_vm8 = vcmp.ge.f32.partialorder %v11373_v44, 0.0 }
 0x5cf   : > { %v4553_v53 = vpop.f32.mrf.mxu3  ;;  %v4571_v21 = vpop.f32.mrf.mxu0  ;;  %v9889_v5 = vld [vmem:[#allocation12 + $0x308] sm:$0xff] }
 0x5d0   : > { %v4595_v54 = vadd.f32 %v4552_v38, %v11335_v43  ;;  %5059 = vmatpush.bf16.msrb.mxu2 %v9828_v32  ;;  %5306 = vmatpush.bf16.msra.mxu1 %v9850_v45  ;;  %v9825_v43 = vld [vmem:[#allocation12 + $0x108] sm:$0xff]  ;;  %v9862_v45 = vld [vmem:[#allocation12 + $0x230] sm:$0xff]  ;;  %v9855_v53 = vld [vmem:[#allocation12 + $0x1f8] sm:$0xff] }
 0x5d1   : > { %v9901_v32 = vld [vmem:[#allocation12 + $0x368] sm:$0xff]  ;;  %v9891_v21 = vld [vmem:[#allocation12 + $0x318] sm:$0xff] }
 0x5d2   : > { %v11377_v48 = vadd.f32 %v11347_v16, %v4595_v54  ;;  %v9900_v54 = vld [vmem:[#allocation12 + $0x360] sm:$0xff] }
 0x5d4   : > { %5060 = vmatpush.bf16.msrb.mxu2 %v9827_v56  ;;  %vm4614_vm7 = vcmp.ge.f32.partialorder %v11377_v48, 0.0 }
 0x5d5   : > { %v4535_v19 = vpop.f32.mrf.mxu2  ;;  %8718 = vmatmul.msk.bf16.vlgmr.msrb.gmra.mxu3 %vm958_vm6, %v4879_v1  ;;  %v9919_v1 = vld [vmem:[#allocation12 + $0x3f8] sm:$0xff] }
 0x5d6   : > { %5286 = vmatpush.bf16.msrb.mxu3 %v9849_v51  ;;  %v9888_v51 = vld [vmem:[#allocation12 + $0x300] sm:$0xff]  ;;  %v9854_v19 = vld [vmem:[#allocation12 + $0x1f0] sm:$0xff] }
 0x5d8   : > { %5061 = vmatpush.bf16.msrb.mxu2 %v9826_v10  ;;  %v5448_v10 = vrot.slane %v11368_v3, 3  ;;  %v9908_v3 = vld [vmem:[#allocation12 + $0x3a0] sm:$0xff] }
 0x5d9   : > { %5180 = vmatmul.bf16.vlgmr.msrb.gmra.mxu0 %v5106_v41  ;;  %v9887_v41 = vld [vmem:[#allocation12 + $0x2f8] sm:$0xff] }
 0x5da   : > { %5287 = vmatpush.bf16.msrb.mxu3 %v9848_v49  ;;  %5627 = vmatpush.bf16.msrb.mxu0 %v9879_v29  ;;  %v9890_v49 = vld [vmem:[#allocation12 + $0x310] sm:$0xff]  ;;  %v9909_v29 = vld [vmem:[#allocation12 + $0x3a8] sm:$0xff] }
 0x5db   : > { %8677 = vmatmul.msk.bf16.vlgmr.msra.gmra.mxu2 %vm958_vm6, %v11352_v39  ;;  %8800 = vmatmul.msk.bf16.vlgmr.msrb.gmra.mxu1 %vm958_vm6, %v5107_v58  ;;  %v4606_v39 = vadd.f32 %v11347_v16, %v4593_v28  ;;  %v9870_v16 = vld [vmem:[#allocation12 + $0x270] sm:$0xff]  ;;  %v9853_v58 = vld [vmem:[#allocation12 + $0x1e8] sm:$0xff] }
 0x5dc   : > { %5062 = vmatpush.bf16.msrb.mxu2 %v9825_v43  ;;  %5514 = vmatpush.bf16.msrb.mxu1 %v9869_v37  ;;  %v9918_v43 = vld [vmem:[#allocation12 + $0x3f0] sm:$0xff]  ;;  %v4619_v37 = vmul.f32 0.01, %v11358_v24  ;;  %v9913_v28 = vld [vmem:[#allocation12 + $0x3c8] sm:$0xff] }
 0x5dd   : > { %v4618_v33 = vmul.f32 0.01, %v4606_v39  ;;  %vm4612_vm1 = vcmp.ge.f32.partialorder %v4606_v39, 0.0 }
 0x5de   : > { %5288 = vmatpush.bf16.msrb.mxu3 %v9847_v61  ;;  %5628 = vmatpush.bf16.msrb.mxu0 %v9878_v4  ;;  %v9886_v61 = vld [vmem:[#allocation12 + $0x2f0] sm:$0xff]  ;;  %v9917_v4 = vld [vmem:[#allocation12 + $0x3e8] sm:$0xff] }
 0x5df   : > { %v4624_v38 = vsel %vm4612_vm1, %v4606_v39, %v4618_v33  ;;  %v9941_v39 = vld [vmem:[#allocation12 + $0x4a8] sm:$0xff]  ;;  %v9940_v33 = vld [vmem:[#allocation12 + $0x4a0] sm:$0xff] }
 0x5e0   : > { %5063 = vmatpush.bf16.msrb.mxu2 %v9824_v6  ;;  %5515 = vmatpush.bf16.msrb.mxu1 %v9868_v27  ;;  %v11401_v56 = vpack.c.bf16 %v4624_v38, %v4624_v38  ;;  %v4625_v6 = vsel %vm4613_vm2, %v11358_v24, %v4619_v37  ;;  %v9852_v27 = vld [vmem:[#allocation12 + $0x1e0] sm:$0xff]  ;;  %v5334_v24 = vrot.slane %v11364_v30, 3  ;;  %v9898_v30 = vld [vmem:[#allocation12 + $0x350] sm:$0xff] }
 0x5e1   : > { %v9958_v38 = vld [vmem:[#allocation12 + $0x530] sm:$0xff]  ;;  %v9920_v37 = vld [vmem:[#allocation12 + $0x400] sm:$0xff] }
 0x5e2   : > { %5289 = vmatpush.bf16.msrb.mxu3 %v9846_v17  ;;  %5629 = vmatpush.bf16.msrb.mxu0 %v9877_v60  ;;  %v9881_v17 = vld [vmem:[#allocation12 + $0x2c8] sm:$0xff]  ;;  %v9907_v60 = vld [vmem:[#allocation12 + $0x398] sm:$0xff] }
 0x5e4   : > { %5064 = vmatpush.bf16.msrb.mxu2 %v9823_v0  ;;  %5516 = vmatpush.bf16.msrb.mxu1 %v9867_v18  ;;  %v5449_v0 = vrot.slane %v11356_v8, 3  ;;  %v11409_v18 = vpack.c.bf16 %v4625_v6, %v4625_v6  ;;  %v9955_v6 = vld [vmem:[#allocation12 + $0x518] sm:$0xff] }
 0x5e5   : > { %8759 = vmatmul.msk.bf16.vlgmr.msra.gmra.mxu3 %vm958_vm6, %v4993_v52  ;;  %v9899_v52 = vld [vmem:[#allocation12 + $0x358] sm:$0xff] }
 0x5e6   : > { %5290 = vmatpush.bf16.msrb.mxu3 %v9845_v7  ;;  %5630 = vmatpush.bf16.msrb.mxu0 %v9876_v25  ;;  %v9916_v7 = vld [vmem:[#allocation12 + $0x3e0] sm:$0xff]  ;;  %v5795_v8 = vrot.slane %v11409_v18, 1  ;;  %v11416_v57 = vshrl.u32 %v11409_v18, 16 }
 0x5e7   : > { %v9880_v25 = vld [vmem:[#allocation12 + $0x2c0] sm:$0xff] }
 0x5e8   : > { %5065 = vmatpush.bf16.msrb.mxu2 %v9822_v62  ;;  %5517 = vmatpush.bf16.msrb.mxu1 %v9866_v14  ;;  %v9884_v62 = vld [vmem:[#allocation12 + $0x2e0] sm:$0xff]  ;;  %v9915_v14 = vld [vmem:[#allocation12 + $0x3d8] sm:$0xff] }
 0x5e9   : > { %8882 = vmatmul.msk.bf16.vlgmr.msra.gmra.mxu0 %vm958_vm6, %v5335_v40  ;;  %v9897_v40 = vld [vmem:[#allocation12 + $0x348] sm:$0xff] }
 0x5ea   : > { %5291 = vmatpush.bf16.msrb.mxu3 %v9844_v2  ;;  %5631 = vmatpush.bf16.msrb.mxu0 %v9875_v20  ;;  %v9883_v2 = vld [vmem:[#allocation12 + $0x2d8] sm:$0xff]  ;;  %v9914_v20 = vld [vmem:[#allocation12 + $0x3d0] sm:$0xff] }
 0x5eb   : > { %5066 = vmatmul.bf16.vlgmr.msrb.gmra.mxu2 %v4992_v23  ;;  %8841 = vmatmul.msk.bf16.vlgmr.msra.gmra.mxu1 %vm958_vm6, %v5221_v55  ;;  %v9911_v23 = vld [vmem:[#allocation12 + $0x3b8] sm:$0xff] }
 0x5ec   : > { %5400 = vmatpush.bf16.msra.mxu2 %v9859_v35  ;;  %5518 = vmatpush.bf16.msrb.mxu1 %v9865_v36  ;;  %v9905_v35 = vld [vmem:[#allocation12 + $0x388] sm:$0xff]  ;;  %v9882_v36 = vld [vmem:[#allocation12 + $0x2d0] sm:$0xff]  ;;  %v9903_v55 = vld [vmem:[#allocation12 + $0x378] sm:$0xff] }
 0x5ee   : > { %5292 = vmatpush.bf16.msrb.mxu3 %v9843_v50  ;;  %5632 = vmatpush.bf16.msrb.mxu0 %v9874_v59  ;;  %v11421_v50 = vshrl.u32 %v11401_v56, 16  ;;  %v9912_v59 = vld [vmem:[#allocation12 + $0x3c0] sm:$0xff] }
 0x5f0   : > { %5401 = vmatpush.bf16.msra.mxu2 %v9858_v46  ;;  %5519 = vmatpush.bf16.msrb.mxu1 %v9864_v11  ;;  %v9896_v46 = vld [vmem:[#allocation12 + $0x340] sm:$0xff]  ;;  %v9910_v11 = vld [vmem:[#allocation12 + $0x3b0] sm:$0xff] }
 0x5f2   : > { %5293 = vmatpush.bf16.msrb.mxu3 %v9842_v12  ;;  %5633 = vmatpush.bf16.msrb.mxu0 %v9873_v42  ;;  %v9929_v12 = vld [vmem:[#allocation12 + $0x448] sm:$0xff]  ;;  %v9895_v42 = vld [vmem:[#allocation12 + $0x338] sm:$0xff] }
 0x5f4   : > { %5402 = vmatpush.bf16.msra.mxu2 %v9857_v47  ;;  %5520 = vmatpush.bf16.msrb.mxu1 %v9863_v13  ;;  %v9902_v47 = vld [vmem:[#allocation12 + $0x370] sm:$0xff]  ;;  %v6022_v13 = vrot.slane %v11401_v56, 2 }
 0x5f5   : > { %5294 = vmatmul.bf16.vlgmr.msrb.gmra.mxu3 %v5220_v9  ;;  %v5908_v9 = vrot.slane %v11421_v50, 1 }
 0x5f6   : > { %5533 = vmatpush.bf16.msra.mxu3 %v9871_v26  ;;  %5634 = vmatpush.bf16.msrb.mxu0 %v9872_v63  ;;  %v9931_v26 = vld [vmem:[#allocation12 + $0x458] sm:$0xff] }
 0x5f7   : > { %v9959_v63 = vld [vmem:[#allocation12 + $0x538] sm:$0xff] }
 0x5f8   : > { %5403 = vmatpush.bf16.msra.mxu2 %v9856_v31  ;;  %5521 = vmatpush.bf16.msrb.mxu1 %v9862_v45  ;;  %v9928_v31 = vld [vmem:[#allocation12 + $0x440] sm:$0xff]  ;;  %v9949_v45 = vld [vmem:[#allocation12 + $0x4e8] sm:$0xff] }
 0x5f9   : > { %5635 = vmatmul.bf16.vlgmr.msrb.gmra.mxu0 %v11401_v56 }
 0x5fa   : > { %5534 = vmatpush.bf16.msra.mxu3 %v9870_v16  ;;  %5879 = vmatpush.bf16.msra.mxu0 %v9901_v32  ;;  %v9894_v16 = vld [vmem:[#allocation12 + $0x330] sm:$0xff] }
 0x5fb   : > { %5522 = vmatmul.bf16.vlgmr.msrb.gmra.mxu1 %v5448_v10  ;;  %v9930_v32 = vld [vmem:[#allocation12 + $0x450] sm:$0xff]  ;;  %v9921_v10 = vld [vmem:[#allocation12 + $0x408] sm:$0xff] }
 0x5fc   : > { %5404 = vmatpush.bf16.msra.mxu2 %v9855_v53  ;;  %5763 = vmatpush.bf16.msra.mxu1 %v9891_v21  ;;  %v9893_v53 = vld [vmem:[#allocation12 + $0x328] sm:$0xff]  ;;  %v9948_v21 = vld [vmem:[#allocation12 + $0x4e0] sm:$0xff] }
 0x5fe   : > { %5744 = vmatpush.bf16.msrb.mxu3 %v9889_v5  ;;  %5880 = vmatpush.bf16.msra.mxu0 %v9900_v54  ;;  %v9927_v5 = vld [vmem:[#allocation12 + $0x438] sm:$0xff]  ;;  %v9926_v54 = vld [vmem:[#allocation12 + $0x430] sm:$0xff] }
 0x600   : > { %5405 = vmatpush.bf16.msra.mxu2 %v9854_v19  ;;  %5764 = vmatpush.bf16.msra.mxu1 %v9890_v49  ;;  %v5909_v19 = vrot.slane %v11416_v57, 1  ;;  %v9947_v49 = vld [vmem:[#allocation12 + $0x4d8] sm:$0xff] }
 0x602   : > { %5745 = vmatpush.bf16.msrb.mxu3 %v9888_v51  ;;  %6088 = vmatpush.bf16.msrb.mxu0 %v9919_v1  ;;  %v9957_v51 = vld [vmem:[#allocation12 + $0x528] sm:$0xff]  ;;  %v9892_v1 = vld [vmem:[#allocation12 + $0x320] sm:$0xff] }
 0x604   : > { %5974 = vmatpush.bf16.msrb.mxu1 %v9909_v29  ;;  %5406 = vmatpush.bf16.msra.mxu2 %v9853_v58  ;;  %v9925_v29 = vld [vmem:[#allocation12 + $0x428] sm:$0xff]  ;;  %v9946_v58 = vld [vmem:[#allocation12 + $0x4d0] sm:$0xff] }
 0x605   : > { %8923 = vmatmul.msk.bf16.vlgmr.msra.gmra.mxu3 %vm958_vm6, %v5449_v0  ;;  %v9923_v0 = vld [vmem:[#allocation12 + $0x418] sm:$0xff] }
 0x606   : > { %5746 = vmatpush.bf16.msrb.mxu3 %v9887_v41  ;;  %6089 = vmatpush.bf16.msrb.mxu0 %v9918_v43  ;;  %v9956_v41 = vld [vmem:[#allocation12 + $0x520] sm:$0xff]  ;;  %v5794_v43 = vrot.slane %v11401_v56, 1 }
 0x608   : > { %5975 = vmatpush.bf16.msrb.mxu1 %v9908_v3  ;;  %5407 = vmatpush.bf16.msra.mxu2 %v9852_v27  ;;  %v9939_v3 = vld [vmem:[#allocation12 + $0x498] sm:$0xff]  ;;  %v6137_v27 = vrot.slane %v11416_v57, 2 }
 0x609   : > { %9046 = vmatmul.msk.bf16.vlgmr.msra.gmra.mxu0 %vm958_vm6, %v5795_v8  ;;  %v4620_v8 = vmul.f32 0.01, %v11377_v48 }
 0x60a   : > { %5747 = vmatpush.bf16.msrb.mxu3 %v9886_v61  ;;  %6090 = vmatpush.bf16.msrb.mxu0 %v9917_v4  ;;  %v6251_v61 = vrot.slane %v11409_v18, 3  ;;  %v9924_v4 = vld [vmem:[#allocation12 + $0x420] sm:$0xff] }
 0x60b   : > { %5408 = vmatmul.bf16.vlgmr.msra.gmra.mxu2 %v5334_v24  ;;  %9005 = vmatmul.msk.bf16.vlgmr.msra.gmra.mxu1 %vm958_vm6, %v11416_v57  ;;  %v9937_v24 = vld [vmem:[#allocation12 + $0x488] sm:$0xff] }
 0x60c   : > { %5646 = vmatpush.bf16.msrb.mxu2 %v9881_v17  ;;  %5976 = vmatpush.bf16.msrb.mxu1 %v9907_v60  ;;  %v9945_v17 = vld [vmem:[#allocation12 + $0x4c8] sm:$0xff]  ;;  %v9938_v60 = vld [vmem:[#allocation12 + $0x490] sm:$0xff] }
 0x60e   : > { %5748 = vmatpush.bf16.msrb.mxu3 %v9885_v34  ;;  %6091 = vmatpush.bf16.msrb.mxu0 %v9916_v7  ;;  %v9954_v34 = vld [vmem:[#allocation12 + $0x510] sm:$0xff]  ;;  %v9944_v7 = vld [vmem:[#allocation12 + $0x4c0] sm:$0xff] }
 0x610   : > { %5647 = vmatpush.bf16.msrb.mxu2 %v9880_v25  ;;  %5977 = vmatpush.bf16.msrb.mxu1 %v9906_v22  ;;  %v9922_v25 = vld [vmem:[#allocation12 + $0x410] sm:$0xff]  ;;  %v9953_v22 = vld [vmem:[#allocation12 + $0x508] sm:$0xff] }
 0x612   : > { %5749 = vmatpush.bf16.msrb.mxu3 %v9884_v62  ;;  %6092 = vmatpush.bf16.msrb.mxu0 %v9915_v14  ;;  %v9943_v62 = vld [vmem:[#allocation12 + $0x4b8] sm:$0xff]  ;;  %v9936_v14 = vld [vmem:[#allocation12 + $0x480] sm:$0xff] }
 0x614   : > { %5860 = vmatpush.bf16.msra.mxu2 %v9899_v52  ;;  %5978 = vmatpush.bf16.msrb.mxu1 %v9905_v35  ;;  %v9951_v52 = vld [vmem:[#allocation12 + $0x4f8] sm:$0xff]  ;;  %v6136_v35 = vrot.slane %v11421_v50, 2 }
 0x616   : > { %5750 = vmatpush.bf16.msrb.mxu3 %v9883_v2  ;;  %6093 = vmatpush.bf16.msrb.mxu0 %v9914_v20  ;;  %v9950_v2 = vld [vmem:[#allocation12 + $0x4f0] sm:$0xff]  ;;  %v9981_v20 = vld [vmem:[#allocation12 + $0x5e8] sm:$0xff] }
 0x618   : > { %5861 = vmatpush.bf16.msra.mxu2 %v9898_v30  ;;  %5979 = vmatpush.bf16.msrb.mxu1 %v9904_v15  ;;  %v9952_v30 = vld [vmem:[#allocation12 + $0x500] sm:$0xff]  ;;  %v4626_v15 = vsel %vm4614_vm7, %v11377_v48, %v4620_v8  ;;  %v9990_v8 = vld [vmem:[#allocation12 + $0x630] sm:$0xff] }
 0x619   : > { %v9968_v48 = vld [vmem:[#allocation12 + $0x580] sm:$0xff] }
 0x61a   : > { %5751 = vmatpush.bf16.msrb.mxu3 %v9882_v36  ;;  %6094 = vmatpush.bf16.msrb.mxu0 %v9913_v28  ;;  %v9942_v36 = vld [vmem:[#allocation12 + $0x4b0] sm:$0xff]  ;;  %v9969_v28 = vld [vmem:[#allocation12 + $0x588] sm:$0xff] }
 0x61b   : > { %8964 = vmatmul.msk.bf16.vlgmr.msrb.gmra.mxu2 %vm958_vm6, %v11409_v18 }
 0x61c   : > { %5862 = vmatpush.bf16.msra.mxu2 %v9897_v40  ;;  %5980 = vmatpush.bf16.msrb.mxu1 %v9903_v55  ;;  %v6023_v40 = vrot.slane %v11409_v18, 2  ;;  %v9971_v55 = vld [vmem:[#allocation12 + $0x598] sm:$0xff]  ;;  %v6364_v18 = vrot.slane %v11421_v50, 3 }
 0x61d   : > { %5752 = vmatmul.bf16.vlgmr.msrb.gmra.mxu3 %v11421_v50 }
 0x61e   : > { %5993 = vmatpush.bf16.msra.mxu3 %v9911_v23  ;;  %6095 = vmatpush.bf16.msrb.mxu0 %v9912_v59  ;;  %v9935_v23 = vld [vmem:[#allocation12 + $0x478] sm:$0xff]  ;;  %v9980_v59 = vld [vmem:[#allocation12 + $0x5e0] sm:$0xff] }
 0x620   : > { %5863 = vmatpush.bf16.msra.mxu2 %v9896_v46  ;;  %5981 = vmatpush.bf16.msrb.mxu1 %v9902_v47  ;;  %v11441_v46 = vpack.c.bf16 %v4626_v15, %v4626_v15  ;;  %v9989_v47 = vld [vmem:[#allocation12 + $0x628] sm:$0xff] }
 0x621   : > { %6096 = vmatmul.bf16.vlgmr.msrb.gmra.mxu0 %v6022_v13  ;;  %v9988_v13 = vld [vmem:[#allocation12 + $0x620] sm:$0xff] }
 0x622   : > { %5994 = vmatpush.bf16.msra.mxu3 %v9910_v11  ;;  %6335 = vmatpush.bf16.msra.mxu0 %v9941_v39  ;;  %v9934_v11 = vld [vmem:[#allocation12 + $0x470] sm:$0xff] }
 0x623   : > { %5982 = vmatmul.bf16.vlgmr.msrb.gmra.mxu1 %v5908_v9  ;;  %v9970_v39 = vld [vmem:[#allocation12 + $0x590] sm:$0xff] }
 0x624   : > { %5864 = vmatpush.bf16.msra.mxu2 %v9895_v42  ;;  %6221 = vmatpush.bf16.msra.mxu1 %v9931_v26  ;;  %v9967_v42 = vld [vmem:[#allocation12 + $0x578] sm:$0xff]  ;;  %v9933_v26 = vld [vmem:[#allocation12 + $0x468] sm:$0xff] }
 0x626   : > { %6202 = vmatpush.bf16.msrb.mxu3 %v9929_v12  ;;  %6336 = vmatpush.bf16.msra.mxu0 %v9940_v33  ;;  %v4621_v12 = vmul.f32 0.01, %v11373_v44 }
 0x628   : > { %5865 = vmatpush.bf16.msra.mxu2 %v9894_v16  ;;  %6222 = vmatpush.bf16.msra.mxu1 %v9930_v32  ;;  %v4627_v33 = vsel %vm4615_vm8, %v11373_v44, %v4621_v12  ;;  %v9961_v32 = vld [vmem:[#allocation12 + $0x548] sm:$0xff]  ;;  %v6250_v44 = vrot.slane %v11401_v56, 3 }
 0x629   : > { %v9985_v56 = vld [vmem:[#allocation12 + $0x608] sm:$0xff] }
 0x62a   : > { %6203 = vmatpush.bf16.msrb.mxu3 %v9928_v31  ;;  %6543 = vmatpush.bf16.msrb.mxu0 %v9959_v63  ;;  %v9966_v31 = vld [vmem:[#allocation12 + $0x570] sm:$0xff]  ;;  %v9932_v63 = vld [vmem:[#allocation12 + $0x460] sm:$0xff] }
 0x62c   : > { %6430 = vmatpush.bf16.msrb.mxu1 %v9949_v45  ;;  %5866 = vmatpush.bf16.msra.mxu2 %v9893_v53  ;;  %v11448_v45 = vpack.c.bf16 %v4627_v33, %v4627_v33  ;;  %v9965_v53 = vld [vmem:[#allocation12 + $0x568] sm:$0xff] }
 0x62d   : > { %9087 = vmatmul.msk.bf16.vlgmr.msra.gmra.mxu3 %vm958_vm6, %v5909_v19 }
 0x62e   : > { %6204 = vmatpush.bf16.msrb.mxu3 %v9927_v5  ;;  %6544 = vmatpush.bf16.msrb.mxu0 %v9958_v38  ;;  %v6365_v5 = vrot.slane %v11416_v57, 3  ;;  %v9987_v38 = vld [vmem:[#allocation12 + $0x618] sm:$0xff]  ;;  %v9964_v57 = vld [vmem:[#allocation12 + $0x560] sm:$0xff] }
 0x630   : > { %6431 = vmatpush.bf16.msrb.mxu1 %v9948_v21  ;;  %5867 = vmatpush.bf16.msra.mxu2 %v9892_v1  ;;  %v9960_v21 = vld [vmem:[#allocation12 + $0x540] sm:$0xff]  ;;  %v9979_v1 = vld [vmem:[#allocation12 + $0x5d8] sm:$0xff] }
 0x631   : > { %9210 = vmatmul.msk.bf16.vlgmr.msra.gmra.mxu0 %vm958_vm6, %v6251_v61  ;;  %v9984_v61 = vld [vmem:[#allocation12 + $0x600] sm:$0xff] }
 0x632   : > { %6205 = vmatpush.bf16.msrb.mxu3 %v9926_v54  ;;  %6545 = vmatpush.bf16.msrb.mxu0 %v9957_v51  ;;  %v6711_v54 = vrot.slane %v11448_v45, 1  ;;  %v9986_v51 = vld [vmem:[#allocation12 + $0x610] sm:$0xff] }
 0x633   : > { %5868 = vmatmul.bf16.vlgmr.msra.gmra.mxu2 %v5794_v43  ;;  %9169 = vmatmul.msk.bf16.vlgmr.msra.gmra.mxu1 %vm958_vm6, %v6137_v27 }
 0x634   : > { %6107 = vmatpush.bf16.msrb.mxu2 %v9921_v10  ;;  %6432 = vmatpush.bf16.msrb.mxu1 %v9947_v49 }
 0x636   : > { %6206 = vmatpush.bf16.msrb.mxu3 %v9925_v29  ;;  %6546 = vmatpush.bf16.msrb.mxu0 %v9956_v41  ;;  %v6594_v29 = vshrl.u32 %v11448_v45, 16 }
 0x638   : > { %6108 = vmatpush.bf16.msrb.mxu2 %v9920_v37  ;;  %6433 = vmatpush.bf16.msrb.mxu1 %v9946_v58  ;;  %v9978_v37 = vld [vmem:[#allocation12 + $0x5d0] sm:$0xff] }
 0x63a   : > { %6207 = vmatpush.bf16.msrb.mxu3 %v9924_v4  ;;  %6547 = vmatpush.bf16.msrb.mxu0 %v9955_v6  ;;  %v9977_v4 = vld [vmem:[#allocation12 + $0x5c8] sm:$0xff] }
 0x63c   : > { %6316 = vmatpush.bf16.msra.mxu2 %v9939_v3  ;;  %6434 = vmatpush.bf16.msrb.mxu1 %v9945_v17  ;;  %v9963_v3 = vld [vmem:[#allocation12 + $0x558] sm:$0xff]  ;;  %v9962_v17 = vld [vmem:[#allocation12 + $0x550] sm:$0xff] }
 0x63e   : > { %6208 = vmatpush.bf16.msrb.mxu3 %v9923_v0  ;;  %6548 = vmatpush.bf16.msrb.mxu0 %v9954_v34 }
 0x640   : > { %6317 = vmatpush.bf16.msra.mxu2 %v9938_v60  ;;  %6435 = vmatpush.bf16.msrb.mxu1 %v9944_v7  ;;  %v9991_v60 = vld [vmem:[#allocation12 + $0x638] sm:$0xff] }
 0x642   : > { %6209 = vmatpush.bf16.msrb.mxu3 %v9922_v25  ;;  %6549 = vmatpush.bf16.msrb.mxu0 %v9953_v22  ;;  %v9983_v25 = vld [vmem:[#allocation12 + $0x5f8] sm:$0xff]  ;;  %v9976_v22 = vld [vmem:[#allocation12 + $0x5c0] sm:$0xff] }
 0x643   : > { %9128 = vmatmul.msk.bf16.vlgmr.msrb.gmra.mxu2 %vm958_vm6, %v6023_v40 }
 0x644   : > { %6318 = vmatpush.bf16.msra.mxu2 %v9937_v24  ;;  %6436 = vmatpush.bf16.msrb.mxu1 %v9943_v62  ;;  %v9982_v62 = vld [vmem:[#allocation12 + $0x5f0] sm:$0xff] }
 0x645   : > { %6210 = vmatmul.bf16.vlgmr.msrb.gmra.mxu3 %v6136_v35 }
 0x646   : > { %6449 = vmatpush.bf16.msra.mxu3 %v9951_v52  ;;  %6550 = vmatpush.bf16.msrb.mxu0 %v9952_v30  ;;  %v4838_v50 = vpop.f32.mrf.mxu0  ;;  %v6592_v52 = vshrl.u32 %v11441_v46, 16  ;;  %v9975_v30 = vld [vmem:[#allocation12 + $0x5b8] sm:$0xff] }
 0x648   : > { %6319 = vmatpush.bf16.msra.mxu2 %v9936_v14  ;;  %6437 = vmatpush.bf16.msrb.mxu1 %v9942_v36  ;;  %v4763_v9 = vpop.f32.mrf.mxu3  ;;  %v4953_v16 = vpop.f32.mrf.mxu1  ;;  %v6824_v36 = vrot.slane %v6592_v52, 1 }
 0x649   : > { %6551 = vmatmul.bf16.vlgmr.msrb.gmra.mxu0 %v11441_v46 }
 0x64a   : > { %6450 = vmatpush.bf16.msra.mxu3 %v9950_v2  ;;  %6795 = vmatpush.bf16.msra.mxu0 %v9981_v20 }
 0x64b   : > { %6438 = vmatmul.bf16.vlgmr.msrb.gmra.mxu1 %v6364_v18 }
 0x64c   : > { %6320 = vmatpush.bf16.msra.mxu2 %v9935_v23  ;;  %6679 = vmatpush.bf16.msra.mxu1 %v9971_v55 }
 0x64e   : > { %6660 = vmatpush.bf16.msrb.mxu3 %v9969_v28  ;;  %6796 = vmatpush.bf16.msra.mxu0 %v9980_v59  ;;  %v4750_v10 = vpop.f32.mrf.mxu2  ;;  %v4840_v19 = vpop.f32.mrf.mxu0  ;;  %v9974_v28 = vld [vmem:[#allocation12 + $0x5b0] sm:$0xff]  ;;  %v9973_v59 = vld [vmem:[#allocation12 + $0x5a8] sm:$0xff] }
 0x64f   : > { %v4764_v49 = vadd.f32 %v4763_v9, %v4750_v10 }
 0x650   : > { %6321 = vmatpush.bf16.msra.mxu2 %v9934_v11  ;;  %6680 = vmatpush.bf16.msra.mxu1 %v9970_v39  ;;  %v4765_v41 = vpop.f32.mrf.mxu3  ;;  %v4955_v43 = vpop.f32.mrf.mxu1  ;;  %v9972_v11 = vld [vmem:[#allocation12 + $0x5a0] sm:$0xff]  ;;  %v6825_v39 = vrot.slane %v6594_v29, 1 }
 0x651   : > { %v4839_v58 = vadd.f32 %v4838_v50, %v4764_v49 }
 0x652   : > { %6661 = vmatpush.bf16.msrb.mxu3 %v9968_v48 }
 0x654   : > { %6890 = vmatpush.bf16.msrb.mxu1 %v9989_v47  ;;  %6322 = vmatpush.bf16.msra.mxu2 %v9933_v26 }
 0x655   : > { %9251 = vmatmul.msk.bf16.vlgmr.msra.gmra.mxu3 %vm958_vm6, %v6365_v5 }
 0x656   : > { %6662 = vmatpush.bf16.msrb.mxu3 %v9967_v42  ;;  %v4752_v6 = vpop.f32.mrf.mxu2  ;;  %v5181_v27 = vpop.f32.mrf.mxu0  ;;  %v6710_v42 = vrot.slane %v11441_v46, 1 }
 0x658   : > { %6891 = vmatpush.bf16.msrb.mxu1 %v9988_v13  ;;  %6323 = vmatpush.bf16.msra.mxu2 %v9932_v63  ;;  %v4966_v0 = vpop.f32.mrf.mxu3  ;;  %v5194_v34 = vpop.f32.mrf.mxu1 }
 0x659   : > { %9374 = vmatmul.msk.bf16.vlgmr.msra.gmra.mxu0 %vm958_vm6, %v6711_v54  ;;  %v4967_v7 = vadd.f32 %v4966_v0, %v4953_v16  ;;  %v5195_v24 = vadd.f32 %v5194_v34, %v5181_v27 }
 0x65a   : > { %6663 = vmatpush.bf16.msrb.mxu3 %v9966_v31 }
 0x65b   : > { %6324 = vmatmul.bf16.vlgmr.msra.gmra.mxu2 %v6250_v44  ;;  %9333 = vmatmul.msk.bf16.vlgmr.msra.gmra.mxu1 %vm958_vm6, %v6594_v29 }
 0x65c   : > { %6562 = vmatpush.bf16.msrb.mxu2 %v9961_v32  ;;  %6892 = vmatpush.bf16.msrb.mxu1 %v9987_v38 }
 0x65e   : > { %6664 = vmatpush.bf16.msrb.mxu3 %v9965_v53  ;;  %v4851_v14 = vpop.f32.mrf.mxu2  ;;  %v5183_v35 = vpop.f32.mrf.mxu0 }
 0x65f   : > { %v4852_v2 = vadd.f32 %v4851_v14, %v4839_v58 }
 0x660   : > { %6563 = vmatpush.bf16.msrb.mxu2 %v9960_v21  ;;  %6893 = vmatpush.bf16.msrb.mxu1 %v9986_v51  ;;  %v4968_v20 = vpop.f32.mrf.mxu3  ;;  %v5196_v15 = vpop.f32.mrf.mxu1 }
 0x661   : > { %v4970_v40 = vadd.f32 %v4967_v7, %v4852_v2 }
 0x662   : > { %6665 = vmatpush.bf16.msrb.mxu3 %v9964_v57 }
 0x664   : > { %6776 = vmatpush.bf16.msra.mxu2 %v9979_v1  ;;  %6894 = vmatpush.bf16.msrb.mxu1 %v9985_v56 }
 0x666   : > { %6666 = vmatpush.bf16.msrb.mxu3 %v9963_v3  ;;  %v4853_v23 = vpop.f32.mrf.mxu2  ;;  %v5422_v55 = vpop.f32.mrf.mxu0 }
 0x668   : > { %6777 = vmatpush.bf16.msra.mxu2 %v9978_v37  ;;  %6895 = vmatpush.bf16.msrb.mxu1 %v9984_v61  ;;  %v5080_v48 = vpop.f32.mrf.mxu3  ;;  %v5308_v18 = vpop.f32.mrf.mxu1 }
 0x66a   : > { %6667 = vmatpush.bf16.msrb.mxu3 %v9962_v17 }
 0x66b   : > { %9292 = vmatmul.msk.bf16.vlgmr.msrb.gmra.mxu2 %vm958_vm6, %v11448_v45 }
 0x66c   : > { %6778 = vmatpush.bf16.msra.mxu2 %v9977_v4  ;;  %6896 = vmatpush.bf16.msrb.mxu1 %v9983_v25 }
 0x66d   : > { %6668 = vmatmul.bf16.vlgmr.msrb.gmra.mxu3 %v6592_v52 }
 0x66e   : > { %6909 = vmatpush.bf16.msra.mxu3 %v9991_v60  ;;  %v5067_v47 = vpop.f32.mrf.mxu2  ;;  %v5424_v12 = vpop.f32.mrf.mxu0 }
 0x66f   : > { %v5081_v26 = vadd.f32 %v5080_v48, %v5067_v47  ;;  %v9997_v12 = vld [vmem:[#allocation15 + $0x28] sm:$0xff] }
 0x670   : > { %6779 = vmatpush.bf16.msra.mxu2 %v9976_v22  ;;  %6897 = vmatpush.bf16.msrb.mxu1 %v9982_v62  ;;  %v5082_v13 = vpop.f32.mrf.mxu3  ;;  %v5310_v33 = vpop.f32.mrf.mxu1 }
 0x671   : > { %v5084_v50 = vadd.f32 %v5081_v26, %v4970_v40  ;;  %v9996_v26 = vld [vmem:[#allocation15 + $0x20] sm:$0xff] }
 0x672   : > { %6910 = vmatpush.bf16.msra.mxu3 %v9990_v8 }
 0x673   : > { %6898 = vmatmul.bf16.vlgmr.msrb.gmra.mxu1 %v6824_v36  ;;  %v5198_v31 = vadd.f32 %v5195_v24, %v5084_v50 }
 0x674   : > { %6780 = vmatpush.bf16.msra.mxu2 %v9975_v30 }
 0x676   : > { %v5069_v63 = vpop.f32.mrf.mxu2  ;;  %v5636_v9 = vpop.f32.mrf.mxu0 }
 0x677   : > { %v9995_v63 = vld [vmem:[#allocation15 + $0x18] sm:$0xff] }
 0x678   : > { %6781 = vmatpush.bf16.msra.mxu2 %v9974_v28  ;;  %v5295_v16 = vpop.f32.mrf.mxu3  ;;  %v5523_v32 = vpop.f32.mrf.mxu1 }
 0x679   : > { %v5309_v45 = vadd.f32 %v5308_v18, %v5295_v16 }
 0x67b   : > { %v5312_v5 = vadd.f32 %v5309_v45, %v5198_v31 }
 0x67c   : > { %6782 = vmatpush.bf16.msra.mxu2 %v9973_v59  ;;  %v9999_v59 = vld [vmem:[#allocation15 + $0x38] sm:$0xff] }
 0x67d   : > { %9415 = vmatmul.msk.bf16.vlgmr.msra.gmra.mxu3 %vm958_vm6, %v6825_v39  ;;  %6988 = vmatpush.bf16.msrb.mxu0 %v9999_v59  ;;  %v7021_v59 = vld [vmem:[#allocation18] sm:$0x1] }
 0x67e   : > { %v5638_v38 = vpop.f32.mrf.mxu0 }
 0x680   : > { %6783 = vmatpush.bf16.msra.mxu2 %v9972_v11  ;;  %v5297_v53 = vpop.f32.mrf.mxu3  ;;  %v5525_v44 = vpop.f32.mrf.mxu1  ;;  %v9998_v11 = vld [vmem:[#allocation15 + $0x30] sm:$0xff] }
 0x681   : > { %6989 = vmatpush.bf16.msrb.mxu0 %v9998_v11  ;;  %v9994_v53 = vld [vmem:[#allocation15 + $0x10] sm:$0xff] }
 0x683   : > { %6784 = vmatmul.bf16.vlgmr.msra.gmra.mxu2 %v6710_v42 }
 0x685   : > { %6990 = vmatpush.bf16.msrb.mxu0 %v9997_v12 }
 0x686   : > { %v5882_v21 = vpop.f32.mrf.mxu0 }
 0x688   : > { %v5536_v54 = vpop.f32.mrf.mxu3  ;;  %v5766_v1 = vpop.f32.mrf.mxu1 }
 0x689   : > { %v5537_v51 = vadd.f32 %v5536_v54, %v5523_v32  ;;  %6991 = vmatpush.bf16.msrb.mxu0 %v9996_v26  ;;  %v9992_v54 = vld [vmem:[#allocation15] sm:$0xff] }
 0x68d   : > { %6992 = vmatpush.bf16.msrb.mxu0 %v9995_v63 }
 0x68e   : > { %v5409_v46 = vpop.f32.mrf.mxu2  ;;  %v5884_v57 = vpop.f32.mrf.mxu0 }
 0x68f   : > { %v5423_v10 = vadd.f32 %v5422_v55, %v5409_v46 }
 0x690   : > { %v5538_v49 = vpop.f32.mrf.mxu3  ;;  %v5768_v41 = vpop.f32.mrf.mxu1 }
 0x691   : > { %v5426_v19 = vadd.f32 %v5423_v10, %v5312_v5  ;;  %6993 = vmatpush.bf16.msrb.mxu0 %v9994_v53  ;;  %v10007_v10 = vld [vmem:[%s11527_s9 + $0x38] sm:$0xff]  ;;  %v10005_v49 = vld [vmem:[%s11527_s9 + $0x28] sm:$0xff] }
 0x692   : > { %7070 = vmatpush.bf16.msrb.mxu2 %v10007_v10 }
 0x693   : > { %v5540_v29 = vadd.f32 %v5537_v51, %v5426_v19  ;;  %v10006_v19 = vld [vmem:[%s11527_s9 + $0x30] sm:$0xff] }
 0x696   : > { %v5411_v43 = vpop.f32.mrf.mxu2  ;;  %7071 = vmatpush.bf16.msrb.mxu2 %v10006_v19 }
 0x697   : > { %v10004_v43 = vld [vmem:[%s11527_s9 + $0x20] sm:$0xff] }
 0x69a   : > { %7072 = vmatpush.bf16.msrb.mxu2 %v10005_v49 }
 0x69e   : > { %v6097_v56 = vpop.f32.mrf.mxu0  ;;  %v5649_v61 = vpop.f32.mrf.mxu2  ;;  %7073 = vmatpush.bf16.msrb.mxu2 %v10004_v43 }
 0x69f   : > { %v5650_v4 = vadd.f32 %v5649_v61, %v5636_v9  ;;  %v10003_v61 = vld [vmem:[%s11527_s9 + $0x18] sm:$0xff] }
 0x6a0   : > { %v5753_v37 = vpop.f32.mrf.mxu3  ;;  %v5983_v3 = vpop.f32.mrf.mxu1 }
 0x6a1   : > { %v5767_v58 = vadd.f32 %v5766_v1, %v5753_v37  ;;  %v5653_v6 = vadd.f32 %v5650_v4, %v5540_v29 }
 0x6a2   : > { %7074 = vmatpush.bf16.msrb.mxu2 %v10003_v61 }
 0x6a3   : > { %v5770_v17 = vadd.f32 %v5767_v58, %v5653_v6 }
 0x6a6   : > { %v6099_v27 = vpop.f32.mrf.mxu0  ;;  %v5651_v34 = vpop.f32.mrf.mxu2 }
 0x6a8   : > { %v5755_v60 = vpop.f32.mrf.mxu3  ;;  %v5985_v0 = vpop.f32.mrf.mxu1 }
 0x6ae   : > { %v6338_v7 = vpop.f32.mrf.mxu0 }
 0x6b0   : > { %v5996_v24 = vpop.f32.mrf.mxu3  ;;  %v6224_v25 = vpop.f32.mrf.mxu1 }
 0x6b1   : > { %v5997_v8 = vadd.f32 %v5996_v24, %v5983_v3  ;;  %v6917_v24 = vld [vmem:[#allocation13] sm:$0x1] }
 0x6b6   : > { %v5869_v22 = vpop.f32.mrf.mxu2  ;;  %v6340_v14 = vpop.f32.mrf.mxu0 }
 0x6b7   : > { %v5883_v52 = vadd.f32 %v5882_v21, %v5869_v22  ;;  %v9993_v21 = vld [vmem:[#allocation15 + $0x8] sm:$0xff] }
 0x6b8   : > { %v5998_v35 = vpop.f32.mrf.mxu3  ;;  %v6226_v2 = vpop.f32.mrf.mxu1  ;;  %6994 = vmatpush.bf16.msrb.mxu0 %v9993_v21 }
 0x6b9   : > { %v5886_v62 = vadd.f32 %v5883_v52, %v5770_v17  ;;  %v10002_v17 = vld [vmem:[%s11527_s9 + $0x10] sm:$0xff]  ;;  %v10000_v2 = vld [vmem:[%s11527_s9] sm:$0xff] }
 0x6ba   : > { %7075 = vmatpush.bf16.msrb.mxu2 %v10002_v17 }
 0x6bb   : > { %v6000_v30 = vadd.f32 %v5997_v8, %v5886_v62 }
 0x6bc   : > { %6995 = vmatpush.bf16.msrb.mxu0 %v9992_v54 }
 0x6be   : > { %v5871_v20 = vpop.f32.mrf.mxu2 }
 0x6bf   : > { %v6939_v20 = vld [vmem:[#allocation16] sm:$0x1] }
 0x6c6   : > { %v6552_v15 = vpop.f32.mrf.mxu0  ;;  %v6110_v28 = vpop.f32.mrf.mxu2 }
 0x6c7   : > { %v6111_v23 = vadd.f32 %v6110_v28, %v6097_v56 }
 0x6c8   : > { %v6211_v40 = vpop.f32.mrf.mxu3  ;;  %v6439_v36 = vpop.f32.mrf.mxu1 }
 0x6c9   : > { %v6114_v55 = vadd.f32 %v6111_v23, %v6000_v30  ;;  %v6225_v50 = vadd.f32 %v6224_v25, %v6211_v40  ;;  %v10001_v30 = vld [vmem:[%s11527_s9 + $0x8] sm:$0xff] }
 0x6ca   : > { %7076 = vmatpush.bf16.msrb.mxu2 %v10001_v30 }
 0x6cb   : > { %v6228_v9 = vadd.f32 %v6225_v50, %v6114_v55 }
 0x6ce   : > { %v6554_v48 = vpop.f32.mrf.mxu0  ;;  %v6112_v47 = vpop.f32.mrf.mxu2  ;;  %7077 = vmatpush.bf16.msrb.mxu2 %v10000_v2 }
 0x6d0   : > { %v6213_v18 = vpop.f32.mrf.mxu3  ;;  %v6441_v39 = vpop.f32.mrf.mxu1 }
 0x6d6   : > { %v6798_v42 = vpop.f32.mrf.mxu0 }
 0x6d8   : > { %v6452_v13 = vpop.f32.mrf.mxu3  ;;  %v6682_v33 = vpop.f32.mrf.mxu1 }
 0x6d9   : > { %v6453_v56 = vadd.f32 %v6452_v13, %v6439_v36 }
 0x6de   : > { %v6325_v31 = vpop.f32.mrf.mxu2  ;;  %v6800_v45 = vpop.f32.mrf.mxu0 }
 0x6df   : > { %v6339_v16 = vadd.f32 %v6338_v7, %v6325_v31 }
 0x6e0   : > { %v6454_v5 = vpop.f32.mrf.mxu3  ;;  %v6684_v38 = vpop.f32.mrf.mxu1 }
 0x6e1   : > { %v6342_v32 = vadd.f32 %v6339_v16, %v6228_v9 }
 0x6e3   : > { %v6456_v58 = vadd.f32 %v6453_v56, %v6342_v32 }
 0x6e6   : > { %v6327_v44 = vpop.f32.mrf.mxu2 }
 0x6ee   : > { %v6565_v46 = vpop.f32.mrf.mxu2 }
 0x6ef   : > { %v6566_v37 = vadd.f32 %v6565_v46, %v6552_v15 }
 0x6f0   : > { %v6669_v51 = vpop.f32.mrf.mxu3  ;;  %v6899_v1 = vpop.f32.mrf.mxu1 }
 0x6f1   : > { %v6569_v4 = vadd.f32 %v6566_v37, %v6456_v58  ;;  %v6683_v6 = vadd.f32 %v6682_v33, %v6669_v51 }
 0x6f3   : > { %v6686_v60 = vadd.f32 %v6683_v6, %v6569_v4 }
 0x6f6   : > { %v6567_v41 = vpop.f32.mrf.mxu2 }
 0x6f8   : > { %v6671_v57 = vpop.f32.mrf.mxu3  ;;  %v6901_v29 = vpop.f32.mrf.mxu1 }
 0x700   : > { %v6912_v3 = vpop.f32.mrf.mxu3 }
 0x701   : > { %v6913_v34 = vadd.f32 %v6912_v3, %v6899_v1 }
 0x706   : > { %v6785_v27 = vpop.f32.mrf.mxu2 }
 0x707   : > { %v6799_v0 = vadd.f32 %v6798_v42, %v6785_v27 }
 0x708   : > { %v6914_v25 = vpop.f32.mrf.mxu3 }
 0x709   : > { %v6802_v7 = vadd.f32 %v6799_v0, %v6686_v60 }
 0x70b   : > { %v6916_v22 = vadd.f32 %v6913_v34, %v6802_v7 }
 0x70d   : > { %v6918_v52 = vadd.f32 %v6917_v24, %v6916_v22 }
 0x70e   : > { %v6787_v8 = vpop.f32.mrf.mxu2 }
 0x70f   : > { %vm6919_vm6 = vcmp.ge.f32.partialorder %v6918_v52, 0.0  ;;  %v6920_v62 = vmul.f32 0.01, %v6918_v52 }
 0x711   : > { %v6921_v14 = vsel %vm6919_vm6, %v6918_v52, %v6920_v62 }
 0x712   : > { %v6922_v35 = vpack.c.bf16 %v6921_v14, %v6921_v14 }
 0x714   : > { %6996 = vmatmul.bf16.vlgmr.msrb.gmra.mxu0 %v6922_v35 }
 0x791   : > { %v6997_v15 = vpop.f32.mrf.mxu0 }
 0x792   : > { %v6998_v40 = vadd.f32 %v6997_v15, %v6939_v20 }
 0x794   : > { %vm7001_vm9 = vcmp.ge.f32.partialorder %v6998_v40, 0.0  ;;  %v7002_v36 = vmul.f32 0.01, %v6998_v40 }
 0x796   : > { %v7003_v28 = vsel %vm7001_vm9, %v6998_v40, %v7002_v36 }
 0x797   : > { %v7004_v23 = vpack.c.bf16 %v7003_v28, %v7003_v28 }
 0x799   : > { %v6999_v55 = vpop.f32.mrf.mxu0  ;;  %7078 = vmatmul.bf16.vlgmr.msrb.gmra.mxu2 %v7004_v23 }
 0x81c   : > { %v7079_v48 = vpop.f32.mrf.mxu2 }
 0x81d   : > { %v7080_v18 = vadd.f32 %v7079_v48, %v7021_v59 }
 0x81f   : > { %7084 = vst.msk [vmem:[%s521_s2] sm:$0x1] %vm7083_vm11, %v7080_v18 }
 0x820   : > { %10444 = shalt.err (!%p10441_p8)
}
 0x821   : > { %10046 = dma.vmem_to_hbm [thread:$0]  (%p10615_p5), %s7097_s30, 16, %s7099_s15, %s7086_s26  }
 0x824   : > { %v7081_v11 = vpop.f32.mrf.mxu2 }
 0x825 PF: > { %s11552_s13 = sld [smem:[#allocation26_spill]]  ;;  %p10098_p9 = scmp.ge.s32.totalorder %s10499_s20, 2 }
 0x827   : > { %p10077_p10 = pnand %p10098_p9, %p10619_p6 }
 0x829   : > { %p10078_p11 = pneg %p10077_p10 }
 0x82b   : > { %s7110_s4 = sand.u32 1, %s11552_s13  }
 0x82c   : > { %s7111_s1 = scalar_lea.sflag [#allocation6], %s7110_s4 }
 0x82d   : > { %10482 = dma.done.wait (%p10078_p11), %s7111_s1, 16  }
 0x82e   : > { %10484 = vsyncadd (%p10078_p11), %s7111_s1, 4294967280  ;;  %s11554_s20 = sld [smem:[#allocation28_spill]]  ;;  %s11557_s17 = smov %s10491_s18 }
 0x82f   : > { %s11555_s3 = sld [smem:[#allocation27_spill]] }
 0x830   : > { %s11556_s19 = sld [smem:[#allocation29_spill]] }
 0x834   : > { %p26_p12 = scmp.ge.s32.totalorder %s11554_s20, 4  }
 0x835   : > { %s11558_s18 = smov %s11555_s3 }
 0x836   :  { %28 = sbr.rel (!%p26_p12) target bundleno = 13 (0xd), region = 177 }
 0x83b   :  { %7116 = vsyncpa [#allocation5], 1 }
 0x83c   :  { %7118 = vsyncpa [#allocation5 + $0x1], 1 }
 0x83d   :  { %7119 = vsyncpa [#allocation8], 1 }
 0x83e   :  { %7120 = vsyncpa [#allocation11], 1 }
 0x83f   :  { %7121 = vsyncpa [#allocation14], 1 }
 0x840   :  { %7122 = vsyncpa [#allocation17], 1 }
 0x841   :  { %7123 = vsyncpa [#allocation6], 1 }
 0x842   :  { %7125 = vsyncpa [#allocation6 + $0x1], 1 }

</bundles_post_ra>
